<compile_context>
chip_gen: v6e
topology: v6e:2x2x1
jax: 0.10.0
libtpu: 0.0.40
codegen_flags: <defaults>
</compile_context>

<pallas_src>
import functools
import math

import jax
import jax.numpy as jnp
from jax.experimental import pallas as pl
from jax.experimental.pallas import tpu as pltpu


def _detect_vmem_limit():
    # 64 MiB scoped budget on 128-MiB-VMEM chips (v5e/v6e); half of physical on v7x (64 MiB).
    try:
        cap = int(pltpu.get_tpu_info().vmem_capacity_bytes)
        return int(min(cap // 2, 64 * 1024 * 1024))
    except Exception:
        return 32 * 1024 * 1024


_VMEM_LIMIT = _detect_vmem_limit()
_TILE_M = 512          # mem-bound row tile (~85% of HBM roofline vs ~63% at 256)


def _round_up(x, m):
    return ((x + m - 1) // m) * m


def _row_tile(M):
    return min(_TILE_M, _round_up(M, 8))


def _pick_q_tile(L):
    for t in (512, 256, 128, 64, 32, 16, 8):
        if L % t == 0:
            return t
    return L


def _cparams(n_parallel):
    return pltpu.CompilerParams(
        dimension_semantics=("parallel",) * n_parallel,
        vmem_limit_bytes=_VMEM_LIMIT,
    )


# ----------------------------------------------------------------------------
# Pallas kernels
# ----------------------------------------------------------------------------
def _matmul_bias_kernel(x_ref, w_ref, b_ref, o_ref, *, activation):
    x = x_ref[...].astype(jnp.bfloat16)
    y = jnp.dot(x, w_ref[...], preferred_element_type=jnp.float32) + b_ref[...]
    if activation == "gelu":
        # Fused tanh-approx GELU (tanh goes to the EUP slot).
        # TODO(synk): exact erf-based GELU of PyTorch is approximated here.
        c = 0.7978845608028654  # sqrt(2/pi)
        y = 0.5 * y * (1.0 + jnp.tanh(c * (y + 0.044715 * y * y * y)))
    o_ref[...] = y.astype(o_ref.dtype)


def pallas_linear(x, w, b, *, activation=None, out_dtype=jnp.float32):
    """y = act(x @ w + b).  x: (..., K) f32/bf16, w: (K, N), b: (N,).  bf16 MXU, f32 accum."""
    *lead, K = x.shape
    M = int(math.prod(lead)) if lead else 1
    N = w.shape[1]
    x2 = x.reshape(M, K)
    wb = w.astype(jnp.bfloat16)
    b2 = b.reshape(1, N).astype(jnp.float32)
    tm = _row_tile(M)
    out = pl.pallas_call(
        functools.partial(_matmul_bias_kernel, activation=activation),
        out_shape=jax.ShapeDtypeStruct((M, N), out_dtype),
        grid=(pl.cdiv(M, tm),),
        in_specs=[
            pl.BlockSpec((tm, K), lambda i: (i, 0)),
            pl.BlockSpec((K, N), lambda i: (0, 0)),
            pl.BlockSpec((1, N), lambda i: (0, 0)),
        ],
        out_specs=pl.BlockSpec((tm, N), lambda i: (i, 0)),
        compiler_params=_cparams(1),
        cost_estimate=pl.CostEstimate(
            flops=2 * M * K * N,
            transcendentals=(M * N if activation == "gelu" else 0),
            bytes_accessed=M * K * x2.dtype.itemsize + K * N * 2 + N * 4
            + M * N * jnp.dtype(out_dtype).itemsize,
        ),
    )(x2, wb, b2)
    return out.reshape(*lead, N)


def _layernorm_kernel(x_ref, g_ref, b_ref, o_ref):
    x = x_ref[...].astype(jnp.float32)
    mean = jnp.mean(x, axis=-1, keepdims=True)
    xc = x - mean
    var = jnp.mean(xc * xc, axis=-1, keepdims=True)
    o_ref[...] = xc * jax.lax.rsqrt(var + 1e-5) * g_ref[...] + b_ref[...]


def _add_layernorm_kernel(x_ref, y_ref, g_ref, b_ref, o_ref):
    s = x_ref[...].astype(jnp.float32) + y_ref[...].astype(jnp.float32)
    mean = jnp.mean(s, axis=-1, keepdims=True)
    sc = s - mean
    var = jnp.mean(sc * sc, axis=-1, keepdims=True)
    o_ref[...] = sc * jax.lax.rsqrt(var + 1e-5) * g_ref[...] + b_ref[...]


def pallas_layernorm(x, gamma, beta, residual=None):
    """LayerNorm(x) or LayerNorm(x + residual); bf16/f32 in, f32 out (residual stream)."""
    shape = x.shape
    D = shape[-1]
    M = int(math.prod(shape[:-1]))
    tm = _row_tile(M)
    g2 = gamma.reshape(1, D)
    b2 = beta.reshape(1, D)
    row_spec_in = pl.BlockSpec((tm, D), lambda i: (i, 0))
    vec_spec = pl.BlockSpec((1, D), lambda i: (0, 0))
    out_spec = pl.BlockSpec((tm, D), lambda i: (i, 0))
    if residual is None:
        out = pl.pallas_call(
            _layernorm_kernel,
            out_shape=jax.ShapeDtypeStruct((M, D), jnp.float32),
            grid=(pl.cdiv(M, tm),),
            in_specs=[row_spec_in, vec_spec, vec_spec],
            out_specs=out_spec,
            compiler_params=_cparams(1),
        )(x.reshape(M, D), g2, b2)
    else:
        out = pl.pallas_call(
            _add_layernorm_kernel,
            out_shape=jax.ShapeDtypeStruct((M, D), jnp.float32),
            grid=(pl.cdiv(M, tm),),
            in_specs=[row_spec_in, pl.BlockSpec((tm, D), lambda i: (i, 0)),
                      vec_spec, vec_spec],
            out_specs=out_spec,
            compiler_params=_cparams(1),
        )(x.reshape(M, D), residual.reshape(M, D), g2, b2)
    return out.reshape(shape)


def _attn_kernel(q_ref, kv_ref, o_ref, *, n_heads, hd, k_off, scale, causal, tq):
    """Per (batch, q-tile) step, all heads; lane-dense (tq, H*dk) output."""
    q = q_ref[0][:, :hd].astype(jnp.bfloat16)                   # (tq, hd)
    kv = kv_ref[0]                                              # (S, kvw)
    k = kv[:, k_off:k_off + hd].astype(jnp.bfloat16)            # (S, hd)
    v = kv[:, k_off + hd:k_off + 2 * hd].astype(jnp.bfloat16)   # (S, hd)
    dk = hd // n_heads
    Lq, S = q.shape[0], k.shape[0]
    q_start = pl.multiple_of(pl.program_id(1) * tq, tq)
    if causal:
        row = jax.lax.broadcasted_iota(jnp.int32, (Lq, S), 0) + q_start
        col = jax.lax.broadcasted_iota(jnp.int32, (Lq, S), 1)
        mask = col <= row                                       # single 2-D mask, reused per head
    outs = []
    for h in range(n_heads):
        qh = q[:, h * dk:(h + 1) * dk]
        kh = k[:, h * dk:(h + 1) * dk]
        vh = v[:, h * dk:(h + 1) * dk]
        s = jax.lax.dot_general(                                # contract on D, no K transpose
            qh, kh, (((1,), (1,)), ((), ())),
            preferred_element_type=jnp.float32) * scale         # (tq, S) f32
        if causal:
            s = jnp.where(mask, s, -1e30)
        m = jnp.max(s, axis=-1, keepdims=True)
        p = jnp.exp(s - m)
        denom = jnp.sum(p, axis=-1, keepdims=True)
        attn = (p * pl.reciprocal(denom, approx=True)).astype(jnp.bfloat16)
        outs.append(jnp.dot(attn, vh, preferred_element_type=jnp.float32))
    # Heads concatenated along lanes -> lane-dense (tq, H*dk) store.
    o_ref[0] = jnp.concatenate(outs, axis=-1).astype(o_ref.dtype)


def pallas_attention(q_src, kv_src, *, n_heads, hd, k_off, causal,
                     out_dtype=jnp.bfloat16):
    """q_src: (B, L, qw) with q in lanes [:hd]; kv_src: (B, S, kvw) with k/v at k_off.

    Output: (B, L, hd) with heads concatenated along the last dim (mix=False layout).
    """
    # TODO(synk): for realistic S (>=1k) switch to a KV-tiled online-softmax (flash) variant;
    # at Informer-scale S the dense per-batch KV block fits comfortably in VMEM.
    B, L, qw = q_src.shape
    S, kvw = kv_src.shape[1], kv_src.shape[2]
    dk = hd // n_heads
    scale = 1.0 / math.sqrt(dk)
    tq = _pick_q_tile(L)
    out = pl.pallas_call(
        functools.partial(_attn_kernel, n_heads=n_heads, hd=hd, k_off=k_off,
                          scale=scale, causal=causal, tq=tq),
        out_shape=jax.ShapeDtypeStruct((B, L, hd), out_dtype),
        grid=(B, L // tq),
        in_specs=[
            pl.BlockSpec((1, tq, qw), lambda b, i: (b, i, 0)),
            pl.BlockSpec((1, S, kvw), lambda b, i: (b, 0, 0)),   # resident across q-tiles
        ],
        out_specs=pl.BlockSpec((1, tq, hd), lambda b, i: (b, i, 0)),
        compiler_params=_cparams(2),
        cost_estimate=pl.CostEstimate(
            flops=4 * B * L * S * hd,
            transcendentals=B * n_heads * L * S,
            bytes_accessed=2 * (B * L * qw + B * S * kvw + B * L * hd),
        ),
    )(q_src, kv_src)
    return out


def _conv1d_kernel(x_ref, w_ref, sc_ref, sh_ref, o_ref, *, k, pad, apply_elu, maxpool):
    L = x_ref.shape[1]
    x = x_ref[0].astype(jnp.bfloat16)                             # (L, Cin)
    if pad > 0:
        # Circular 'same' padding built in VMEM (no padded HBM copy).
        xp = jnp.concatenate([x[L - pad:], x, x[:pad]], axis=0)   # (L + 2*pad, Cin)
    else:
        xp = x
    acc = jnp.dot(xp[0:L], w_ref[0], preferred_element_type=jnp.float32)
    for j in range(1, k):                                         # unrolled k-tap accumulation
        acc = acc + jnp.dot(xp[j:j + L], w_ref[j], preferred_element_type=jnp.float32)
    y = acc * sc_ref[...] + sh_ref[...]                           # fused bias / BN affine
    if apply_elu:
        y = jnp.where(y > 0, y, jnp.exp(jnp.minimum(y, 0.0)) - 1.0)   # ELU (alpha=1)
    if maxpool:
        # Fused MaxPool1d(kernel=3, stride=2, padding=1): window-max via sublane shifts,
        # stride-2 row selection via a 0/1 selection matmul (no strided slices / relayouts).
        C = y.shape[-1]
        neg = jnp.full((1, C), -1e30, dtype=jnp.float32)
        prev = jnp.concatenate([neg, y[:-1]], axis=0)             # y[i-1]
        nxt = jnp.concatenate([y[1:], neg], axis=0)               # y[i+1]
        full3 = jnp.maximum(jnp.maximum(prev, y), nxt)
        L_out = o_ref.shape[1]
        rows = jax.lax.broadcasted_iota(jnp.int32, (L_out, L), 0)
        cols = jax.lax.broadcasted_iota(jnp.int32, (L_out, L), 1)
        sel = (cols == 2 * rows).astype(jnp.float32)
        y = jax.lax.dot_general(sel, full3, (((1,), (0,)), ((), ())),
                                preferred_element_type=jnp.float32)
    o_ref[0] = y.astype(o_ref.dtype)


def pallas_conv1d_circular(x, w, b=None, bn_scale=None, bn_shift=None,
                           elu=False, maxpool=False, out_dtype=jnp.bfloat16):
    """Conv1d with circular 'same' padding, fused bias / BN-affine / ELU / MaxPool epilogue.

    x: (B, L, Cin) channels-last (any float dtype).  w: (Cout, Cin, k) torch layout.
    """
    # TODO(synk): add a Cout/L-tiled second parallel grid axis for megacore when B is tiny.
    B, L, Cin = x.shape
    Cout, _, k = w.shape
    pad = (k - 1) // 2
    wt = jnp.transpose(w, (2, 1, 0)).astype(jnp.bfloat16)         # (k, Cin, Cout)
    scale = bn_scale if bn_scale is not None else jnp.ones((Cout,), jnp.float32)
    shift = jnp.zeros((Cout,), jnp.float32)
    if b is not None:
        shift = shift + b * scale     # (conv + b) * scale + bn_shift == conv*scale + ...
    if bn_shift is not None:
        shift = shift + bn_shift
    L_out = (L - 1) // 2 + 1 if maxpool else L
    out = pl.pallas_call(
        functools.partial(_conv1d_kernel, k=k, pad=pad, apply_elu=elu, maxpool=maxpool),
        out_shape=jax.ShapeDtypeStruct((B, L_out, Cout), out_dtype),
        grid=(B,),
        in_specs=[
            pl.BlockSpec((1, L, Cin), lambda i: (i, 0, 0)),
            pl.BlockSpec((k, Cin, Cout), lambda i: (0, 0, 0)),
            pl.BlockSpec((1, Cout), lambda i: (0, 0)),
            pl.BlockSpec((1, Cout), lambda i: (0, 0)),
        ],
        out_specs=pl.BlockSpec((1, L_out, Cout), lambda i: (i, 0, 0)),
        compiler_params=_cparams(1),
        cost_estimate=pl.CostEstimate(
            flops=2 * B * L * k * Cin * Cout,
            transcendentals=(B * L * Cout if elu else 0),
            bytes_accessed=B * L * Cin * x.dtype.itemsize + k * Cin * Cout * 2
            + B * L_out * Cout * jnp.dtype(out_dtype).itemsize,
        ),
    )(x, wt, scale.reshape(1, Cout), shift.reshape(1, Cout))
    return out


# ----------------------------------------------------------------------------
# Model pieces
# ----------------------------------------------------------------------------
def attention_layer(p, queries, keys, *, n_heads, mix, causal):
    # TODO(synk): exact KAE-Informer q/k/v Conv1d padding mode is not in the given source;
    # circular 'same' padding (as in TokenEmbedding) is assumed here.
    # TODO(synk): ProbSparse attention (random key sampling + top-u query selection) has no
    # clean Pallas equivalent; dense (Full) attention is used instead.
    B, L, _ = queries.shape
    hd = p["wq"].shape[0]
    H = n_heads
    dk = hd // H
    if queries is keys:
        # Self-attention: one fused q/k/v conv; the packed (B, L, 3*hd) output feeds the
        # attention kernel directly (q/k/v sliced in VMEM -> no XLA split/transpose).
        w_qkv = jnp.concatenate([p["wq"], p["wk"], p["wv"]], axis=0)
        b_qkv = jnp.concatenate([p["bq"], p["bk"], p["bv"]], axis=0)
        qkv = pallas_conv1d_circular(queries, w_qkv, b_qkv, out_dtype=jnp.bfloat16)
        ctx = pallas_attention(qkv, qkv, n_heads=H, hd=hd, k_off=hd, causal=causal)
    else:
        # Cross-attention: q from queries; k/v fused from the shared cross input.
        q = pallas_conv1d_circular(queries, p["wq"], p["bq"], out_dtype=jnp.bfloat16)
        w_kv = jnp.concatenate([p["wk"], p["wv"]], axis=0)
        b_kv = jnp.concatenate([p["bk"], p["bv"]], axis=0)
        kv = pallas_conv1d_circular(keys, w_kv, b_kv, out_dtype=jnp.bfloat16)
        ctx = pallas_attention(q, kv, n_heads=H, hd=hd, k_off=0, causal=causal)
    # ctx is (B, L, H*dk) heads-concatenated == torch .view(B, L, -1) for mix=False.
    if mix:
        # torch: out.transpose(2,1).contiguous().view(B, L, -1)
        ctx = ctx.reshape(B, L, H, dk).transpose(0, 2, 1, 3).reshape(B, L, H * dk)
    # TODO(synk): folding wo into the attention kernel needs the full (L, H*dk) tile per
    # step anyway; kept as a separate tiled matmul.
    return pallas_linear(ctx, p["wo"], p["bo"], out_dtype=jnp.bfloat16)


def encoder_layer(p, x, *, n_heads):
    new_x = attention_layer(p["attn"], x, x, n_heads=n_heads, mix=False, causal=False)
    x = pallas_layernorm(x, p["norm1_g"], p["norm1_b"], residual=new_x)   # fused add+LN
    y = pallas_linear(x, p["w_ff1"], p["b_ff1"], activation="gelu",
                      out_dtype=jnp.bfloat16)                              # Conv1d k=1 == Linear
    y = pallas_linear(y, p["w_ff2"], p["b_ff2"], out_dtype=jnp.bfloat16)
    return pallas_layernorm(x, p["norm2_g"], p["norm2_b"], residual=y)    # fused add+LN


def conv_layer(p, x):
    """Distil ConvLayer: circular Conv1d -> BatchNorm1d (eval) -> ELU -> MaxPool1d(3,2,1),
    all fused into a single Pallas kernel (BN uses running statistics, inference mode)."""
    scale = p["bn_g"] * jax.lax.rsqrt(p["bn_var"] + 1e-5)
    shift = p["bn_b"] - p["bn_mean"] * scale
    return pallas_conv1d_circular(x, p["w"], p["b"], bn_scale=scale, bn_shift=shift,
                                  elu=True, maxpool=True, out_dtype=jnp.float32)


def decoder_layer(p, x, cross, *, n_heads):
    sa = attention_layer(p["self_attn"], x, x, n_heads=n_heads, mix=True, causal=True)
    x = pallas_layernorm(x, p["norm1_g"], p["norm1_b"], residual=sa)
    ca = attention_layer(p["cross_attn"], x, cross, n_heads=n_heads, mix=False, causal=False)
    x = pallas_layernorm(x, p["norm2_g"], p["norm2_b"], residual=ca)
    y = pallas_linear(x, p["w_ff1"], p["b_ff1"], activation="gelu", out_dtype=jnp.bfloat16)
    y = pallas_linear(y, p["w_ff2"], p["b_ff2"], out_dtype=jnp.bfloat16)
    return pallas_layernorm(x, p["norm3_g"], p["norm3_b"], residual=y)


def sinusoid_table(n, d_model):
    position = jnp.arange(n, dtype=jnp.float32)[:, None]
    div_term = jnp.exp(
        jnp.arange(0, d_model, 2, dtype=jnp.float32) * -(math.log(10000.0) / d_model)
    )
    tab = jnp.zeros((n, d_model), jnp.float32)
    tab = tab.at[:, 0::2].set(jnp.sin(position * div_term))
    tab = tab.at[:, 1::2].set(jnp.cos(position * div_term))
    return tab


def data_embedding(p, tables, x, x_mark):
    B, L, _ = x.shape
    val = pallas_conv1d_circular(x, p["token_w"], None,
                                 out_dtype=jnp.bfloat16)   # TokenEmbedding (bias=False)
    pos = tables["pos"][:L][None]                          # PositionalEmbedding (fixed)
    marks = x_mark.astype(jnp.int32)                       # TemporalEmbedding (fixed, freq='h')
    temp = (tables["hour"][marks[:, :, 3]]
            + tables["weekday"][marks[:, :, 2]]
            + tables["day"][marks[:, :, 1]]
            + tables["month"][marks[:, :, 0]])
    return val.astype(jnp.float32) + pos + temp            # dropout p=0.0 -> no-op


def informer_forward(params, x_enc, x_mark_enc, x_dec, x_mark_dec, *, n_heads, pred_len):
    tables = params["tables"]
    # Encoder
    x = data_embedding(params["enc_emb"], tables, x_enc, x_mark_enc)
    n_enc = len(params["enc_layers"])
    for i in range(n_enc - 1):
        x = encoder_layer(params["enc_layers"][i], x, n_heads=n_heads)
        x = conv_layer(params["enc_convs"][i], x)          # distil: halves sequence length
    x = encoder_layer(params["enc_layers"][-1], x, n_heads=n_heads)
    enc_out = pallas_layernorm(x, params["enc_norm_g"], params["enc_norm_b"])
    # Decoder
    x = data_embedding(params["dec_emb"], tables, x_dec, x_mark_dec)
    for lp in params["dec_layers"]:
        x = decoder_layer(lp, x, enc_out, n_heads=n_heads)
    x = pallas_layernorm(x, params["dec_norm_g"], params["dec_norm_b"])
    # Narrow (c_out=4) projection: kept as a Pallas matmul; at real c_out pad to >=128 lanes.
    out = pallas_linear(x, params["proj_w"], params["proj_b"], out_dtype=jnp.float32)
    return out[:, -pred_len:, :]


# ----------------------------------------------------------------------------
# Deterministic parameter construction
# ----------------------------------------------------------------------------
class ParamFactory:
    def __init__(self, key):
        self.key = key

    def normal(self, shape, scale=0.05):
        self.key, sub = jax.random.split(self.key)
        return jax.random.normal(sub, shape, dtype=jnp.float32) * scale

    def zeros(self, shape):
        return jnp.zeros(shape, jnp.float32)

    def ones(self, shape):
        return jnp.ones(shape, jnp.float32)


def make_attn_params(pf, d_model, n_heads, ks):
    d_head = d_model // n_heads
    hd = n_heads * d_head
    return dict(
        wq=pf.normal((hd, d_model, ks)), bq=pf.zeros((hd,)),
        wk=pf.normal((hd, d_model, ks)), bk=pf.zeros((hd,)),
        wv=pf.normal((hd, d_model, ks)), bv=pf.zeros((hd,)),
        wo=pf.normal((hd, d_model)), bo=pf.zeros((d_model,)),
    )


def make_encoder_layer_params(pf, d_model, d_ff, n_heads, ks):
    return dict(
        attn=make_attn_params(pf, d_model, n_heads, ks),
        w_ff1=pf.normal((d_model, d_ff)), b_ff1=pf.zeros((d_ff,)),
        w_ff2=pf.normal((d_ff, d_model)), b_ff2=pf.zeros((d_model,)),
        norm1_g=pf.ones((d_model,)), norm1_b=pf.zeros((d_model,)),
        norm2_g=pf.ones((d_model,)), norm2_b=pf.zeros((d_model,)),
    )


def make_decoder_layer_params(pf, d_model, d_ff, n_heads, ks):
    return dict(
        self_attn=make_attn_params(pf, d_model, n_heads, ks),
        cross_attn=make_attn_params(pf, d_model, n_heads, ks),
        w_ff1=pf.normal((d_model, d_ff)), b_ff1=pf.zeros((d_ff,)),
        w_ff2=pf.normal((d_ff, d_model)), b_ff2=pf.zeros((d_model,)),
        norm1_g=pf.ones((d_model,)), norm1_b=pf.zeros((d_model,)),
        norm2_g=pf.ones((d_model,)), norm2_b=pf.zeros((d_model,)),
        norm3_g=pf.ones((d_model,)), norm3_b=pf.zeros((d_model,)),
    )


def build_params(pf, *, enc_in, dec_in, c_out, d_model, n_heads, e_layers, d_layers,
                 d_ff, qvk_ks, max_len):
    return dict(
        tables=dict(
            pos=sinusoid_table(max_len, d_model),
            hour=sinusoid_table(24, d_model),
            weekday=sinusoid_table(7, d_model),
            day=sinusoid_table(32, d_model),
            month=sinusoid_table(13, d_model),
        ),
        enc_emb=dict(token_w=pf.normal((d_model, enc_in, 3))),
        dec_emb=dict(token_w=pf.normal((d_model, dec_in, 3))),
        enc_layers=[make_encoder_layer_params(pf, d_model, d_ff, n_heads, qvk_ks)
                    for _ in range(e_layers)],
        enc_convs=[dict(w=pf.normal((d_model, d_model, 3)), b=pf.zeros((d_model,)),
                        bn_g=pf.ones((d_model,)), bn_b=pf.zeros((d_model,)),
                        bn_mean=pf.zeros((d_model,)), bn_var=pf.ones((d_model,)))
                   for _ in range(e_layers - 1)],
        enc_norm_g=pf.ones((d_model,)), enc_norm_b=pf.zeros((d_model,)),
        dec_layers=[make_decoder_layer_params(pf, d_model, d_ff, n_heads, qvk_ks)
                    for _ in range(d_layers)],
        dec_norm_g=pf.ones((d_model,)), dec_norm_b=pf.zeros((d_model,)),
        proj_w=pf.normal((d_model, c_out)), proj_b=pf.zeros((c_out,)),
    )


# ----------------------------------------------------------------------------
# Main
# ----------------------------------------------------------------------------
if __name__ == "__main__":
    B = 2
    enc_in = dec_in = c_out = 4
    seq_len, label_len, out_len = 16, 8, 8
    d_model, n_heads, e_layers, d_layers, d_ff = 32, 4, 2, 1, 32
    qvk_kernel_size = 5
    dec_len = label_len + out_len

    pf = ParamFactory(jax.random.PRNGKey(0))
    params = build_params(
        pf, enc_in=enc_in, dec_in=dec_in, c_out=c_out, d_model=d_model,
        n_heads=n_heads, e_layers=e_layers, d_layers=d_layers, d_ff=d_ff,
        qvk_ks=qvk_kernel_size, max_len=64,
    )

    key = jax.random.PRNGKey(0)
    k1, k2 = jax.random.split(key)
    x_enc = jax.random.normal(k1, (B, seq_len, enc_in), dtype=jnp.float32)
    x_dec = jax.random.normal(k2, (B, dec_len, dec_in), dtype=jnp.float32)

    def make_marks(L, start):
        t = jnp.arange(start, start + L)
        hour = t % 24
        weekday = (t // 24) % 7
        day = (t // 24) % 31 + 1
        month = (t // (24 * 31)) % 12 + 1
        return jnp.stack([month, day, weekday, hour], axis=-1).astype(jnp.float32)

    x_mark_enc = jnp.broadcast_to(make_marks(seq_len, 0)[None], (B, seq_len, 4))
    x_mark_dec = jnp.broadcast_to(make_marks(dec_len, seq_len - label_len)[None],
                                  (B, dec_len, 4))

    fwd = jax.jit(functools.partial(informer_forward, n_heads=n_heads, pred_len=out_len))
    out = fwd(params, x_enc, x_mark_enc, x_dec, x_mark_dec)
    out = jax.block_until_ready(out)

    assert out.shape == (B, out_len, c_out), out.shape
    assert jnp.all(jnp.isfinite(out))
    print("KERNEL_OK")
</pallas_src>

<mosaic_0001>
module attributes {stable_mosaic.version = 11 : i64} {
  func.func @_conv1d_kernel(%arg0: i32, %arg1: memref<1x16x4xf32, #tpu.memory_space<vmem>>, %arg2: memref<3x4x32xbf16, #tpu.memory_space<vmem>>, %arg3: memref<1x32xf32, #tpu.memory_space<vmem>>, %arg4: memref<1x32xf32, #tpu.memory_space<vmem>>, %arg5: memref<1x16x32xbf16, #tpu.memory_space<vmem>>) attributes {dimension_semantics = [#tpu.dimension_semantics<parallel>], iteration_bounds = array<i64: 2>, scalar_prefetch = 0 : i64, scratch_operands = 0 : i64, tpu.core_type = #tpu.core_type<tc>, window_params = [{transform_indices = @transform_0, window_bounds = array<i64: 1, 16, 4>}, {pipeline_mode = #tpu.pipeline_mode<synchronous>, transform_indices = @transform_1, window_bounds = array<i64: 3, 4, 32>}, {pipeline_mode = #tpu.pipeline_mode<synchronous>, transform_indices = @transform_2, window_bounds = array<i64: 1, 32>}, {pipeline_mode = #tpu.pipeline_mode<synchronous>, transform_indices = @transform_3, window_bounds = array<i64: 1, 32>}, {transform_indices = @transform_4, window_bounds = array<i64: 1, 16, 32>}]} {
    %c0 = arith.constant 0 : index
    %c0_0 = arith.constant 0 : index
    %c0_1 = arith.constant 0 : index
    %0 = vector.load %arg1[%c0, %c0_0, %c0_1] : memref<1x16x4xf32, #tpu.memory_space<vmem>>, vector<1x16x4xf32>
    %1 = vector.shape_cast %0 : vector<1x16x4xf32> to vector<16x4xf32>
    %2 = arith.truncf %1 : vector<16x4xf32> to vector<16x4xbf16>
    %3 = vector.extract_strided_slice %2 {offsets = [15, 0], sizes = [1, 4], strides = [1, 1]} : vector<16x4xbf16> to vector<1x4xbf16>
    %4 = vector.extract_strided_slice %2 {offsets = [0, 0], sizes = [1, 4], strides = [1, 1]} : vector<16x4xbf16> to vector<1x4xbf16>
    %5 = tpu.concatenate %3, %2, %4 in 0 : vector<1x4xbf16>, vector<16x4xbf16>, vector<1x4xbf16> -> vector<18x4xbf16>
    %6 = vector.extract_strided_slice %5 {offsets = [0, 0], sizes = [16, 4], strides = [1, 1]} : vector<18x4xbf16> to vector<16x4xbf16>
    %c0_2 = arith.constant 0 : index
    %c0_3 = arith.constant 0 : index
    %c0_4 = arith.constant 0 : index
    %7 = vector.load %arg2[%c0_2, %c0_3, %c0_4] : memref<3x4x32xbf16, #tpu.memory_space<vmem>>, vector<1x4x32xbf16>
    %8 = vector.shape_cast %7 : vector<1x4x32xbf16> to vector<4x32xbf16>
    %cst = arith.constant dense<0.000000e+00> : vector<16x32xf32>
    %9 = tpu.matmul %6, %8, %cst {dimension_numbers = #tpu.dot_dimension_numbers<[1], [0], [0], [1], [0, 0, 1, 1], [], []>} : vector<16x4xbf16>, vector<4x32xbf16>, vector<16x32xf32> -> vector<16x32xf32>
    %10 = vector.extract_strided_slice %5 {offsets = [1, 0], sizes = [16, 4], strides = [1, 1]} : vector<18x4xbf16> to vector<16x4xbf16>
    %c1 = arith.constant 1 : index
    %c0_5 = arith.constant 0 : index
    %c0_6 = arith.constant 0 : index
    %11 = vector.load %arg2[%c1, %c0_5, %c0_6] : memref<3x4x32xbf16, #tpu.memory_space<vmem>>, vector<1x4x32xbf16>
    %12 = vector.shape_cast %11 : vector<1x4x32xbf16> to vector<4x32xbf16>
    %cst_7 = arith.constant dense<0.000000e+00> : vector<16x32xf32>
    %13 = tpu.matmul %10, %12, %cst_7 {dimension_numbers = #tpu.dot_dimension_numbers<[1], [0], [0], [1], [0, 0, 1, 1], [], []>} : vector<16x4xbf16>, vector<4x32xbf16>, vector<16x32xf32> -> vector<16x32xf32>
    %14 = arith.addf %9, %13 : vector<16x32xf32>
    %15 = vector.extract_strided_slice %5 {offsets = [2, 0], sizes = [16, 4], strides = [1, 1]} : vector<18x4xbf16> to vector<16x4xbf16>
    %c2 = arith.constant 2 : index
    %c0_8 = arith.constant 0 : index
    %c0_9 = arith.constant 0 : index
    %16 = vector.load %arg2[%c2, %c0_8, %c0_9] : memref<3x4x32xbf16, #tpu.memory_space<vmem>>, vector<1x4x32xbf16>
    %17 = vector.shape_cast %16 : vector<1x4x32xbf16> to vector<4x32xbf16>
    %cst_10 = arith.constant dense<0.000000e+00> : vector<16x32xf32>
    %18 = tpu.matmul %15, %17, %cst_10 {dimension_numbers = #tpu.dot_dimension_numbers<[1], [0], [0], [1], [0, 0, 1, 1], [], []>} : vector<16x4xbf16>, vector<4x32xbf16>, vector<16x32xf32> -> vector<16x32xf32>
    %19 = arith.addf %14, %18 : vector<16x32xf32>
    %c0_11 = arith.constant 0 : index
    %c0_12 = arith.constant 0 : index
    %20 = vector.load %arg3[%c0_11, %c0_12] : memref<1x32xf32, #tpu.memory_space<vmem>>, vector<1x32xf32>
    %21 = vector.broadcast %20 : vector<1x32xf32> to vector<16x32xf32>
    %22 = arith.mulf %19, %21 : vector<16x32xf32>
    %c0_13 = arith.constant 0 : index
    %c0_14 = arith.constant 0 : index
    %23 = vector.load %arg4[%c0_13, %c0_14] : memref<1x32xf32, #tpu.memory_space<vmem>>, vector<1x32xf32>
    %24 = vector.broadcast %23 : vector<1x32xf32> to vector<16x32xf32>
    %25 = arith.addf %22, %24 : vector<16x32xf32>
    %26 = arith.truncf %25 : vector<16x32xf32> to vector<16x32xbf16>
    %c0_15 = arith.constant 0 : index
    %c0_16 = arith.constant 0 : index
    %c0_17 = arith.constant 0 : index
    %27 = vector.load %arg5[%c0_15, %c0_16, %c0_17] : memref<1x16x32xbf16, #tpu.memory_space<vmem>>, vector<1x16x32xbf16>
    %28 = vector.shape_cast %27 : vector<1x16x32xbf16> to vector<16x32xbf16>
    %29 = vector.shape_cast %26 : vector<16x32xbf16> to vector<1x16x32xbf16>
    tpu.vector_store %arg5[%c0_15, %c0_16, %c0_17], %29 {strides = array<i32>} : memref<1x16x32xbf16, #tpu.memory_space<vmem>>, vector<1x16x32xbf16>,
    return
  }
  func.func @transform_0(%arg0: i32) -> (i32, i32, i32) {
    %c0_i32 = arith.constant 0 : i32
    %c0_i32_0 = arith.constant 0 : i32
    %c0_i32_1 = arith.constant 0 : i32
    return %arg0, %c0_i32, %c0_i32_0 : i32, i32, i32
  }
  func.func @transform_1(%arg0: i32) -> (i32, i32, i32) {
    %c0_i32 = arith.constant 0 : i32
    %c0_i32_0 = arith.constant 0 : i32
    %c0_i32_1 = arith.constant 0 : i32
    %c0_i32_2 = arith.constant 0 : i32
    return %c0_i32, %c0_i32_0, %c0_i32_1 : i32, i32, i32
  }
  func.func @transform_2(%arg0: i32) -> (i32, i32) {
    %c0_i32 = arith.constant 0 : i32
    %c0_i32_0 = arith.constant 0 : i32
    %c0_i32_1 = arith.constant 0 : i32
    return %c0_i32, %c0_i32_0 : i32, i32
  }
  func.func @transform_3(%arg0: i32) -> (i32, i32) {
    %c0_i32 = arith.constant 0 : i32
    %c0_i32_0 = arith.constant 0 : i32
    %c0_i32_1 = arith.constant 0 : i32
    return %c0_i32, %c0_i32_0 : i32, i32
  }
  func.func @transform_4(%arg0: i32) -> (i32, i32, i32) {
    %c0_i32 = arith.constant 0 : i32
    %c0_i32_0 = arith.constant 0 : i32
    %c0_i32_1 = arith.constant 0 : i32
    return %arg0, %c0_i32, %c0_i32_0 : i32, i32, i32
  }
}

module attributes {stable_mosaic.version = 11 : i64} {
  func.func @_conv1d_kernel(%arg0: i32, %arg1: memref<1x16x32xf32, #tpu.memory_space<vmem>>, %arg2: memref<5x32x96xbf16, #tpu.memory_space<vmem>>, %arg3: memref<1x96xf32, #tpu.memory_space<vmem>>, %arg4: memref<1x96xf32, #tpu.memory_space<vmem>>, %arg5: memref<1x16x96xbf16, #tpu.memory_space<vmem>>) attributes {dimension_semantics = [#tpu.dimension_semantics<parallel>], iteration_bounds = array<i64: 2>, scalar_prefetch = 0 : i64, scratch_operands = 0 : i64, tpu.core_type = #tpu.core_type<tc>, window_params = [{transform_indices = @transform_0, window_bounds = array<i64: 1, 16, 32>}, {pipeline_mode = #tpu.pipeline_mode<synchronous>, transform_indices = @transform_1, window_bounds = array<i64: 5, 32, 96>}, {pipeline_mode = #tpu.pipeline_mode<synchronous>, transform_indices = @transform_2, window_bounds = array<i64: 1, 96>}, {pipeline_mode = #tpu.pipeline_mode<synchronous>, transform_indices = @transform_3, window_bounds = array<i64: 1, 96>}, {transform_indices = @transform_4, window_bounds = array<i64: 1, 16, 96>}]} {
    %c0 = arith.constant 0 : index
    %c0_0 = arith.constant 0 : index
    %c0_1 = arith.constant 0 : index
    %0 = vector.load %arg1[%c0, %c0_0, %c0_1] : memref<1x16x32xf32, #tpu.memory_space<vmem>>, vector<1x16x32xf32>
    %1 = vector.shape_cast %0 : vector<1x16x32xf32> to vector<16x32xf32>
    %2 = arith.truncf %1 : vector<16x32xf32> to vector<16x32xbf16>
    %3 = vector.extract_strided_slice %2 {offsets = [14, 0], sizes = [2, 32], strides = [1, 1]} : vector<16x32xbf16> to vector<2x32xbf16>
    %4 = vector.extract_strided_slice %2 {offsets = [0, 0], sizes = [2, 32], strides = [1, 1]} : vector<16x32xbf16> to vector<2x32xbf16>
    %5 = tpu.concatenate %3, %2, %4 in 0 : vector<2x32xbf16>, vector<16x32xbf16>, vector<2x32xbf16> -> vector<20x32xbf16>
    %6 = vector.extract_strided_slice %5 {offsets = [0, 0], sizes = [16, 32], strides = [1, 1]} : vector<20x32xbf16> to vector<16x32xbf16>
    %c0_2 = arith.constant 0 : index
    %c0_3 = arith.constant 0 : index
    %c0_4 = arith.constant 0 : index
    %7 = vector.load %arg2[%c0_2, %c0_3, %c0_4] : memref<5x32x96xbf16, #tpu.memory_space<vmem>>, vector<1x32x96xbf16>
    %8 = vector.shape_cast %7 : vector<1x32x96xbf16> to vector<32x96xbf16>
    %cst = arith.constant dense<0.000000e+00> : vector<16x96xf32>
    %9 = tpu.matmul %6, %8, %cst {dimension_numbers = #tpu.dot_dimension_numbers<[1], [0], [0], [1], [0, 0, 1, 1], [], []>} : vector<16x32xbf16>, vector<32x96xbf16>, vector<16x96xf32> -> vector<16x96xf32>
    %10 = vector.extract_strided_slice %5 {offsets = [1, 0], sizes = [16, 32], strides = [1, 1]} : vector<20x32xbf16> to vector<16x32xbf16>
    %c1 = arith.constant 1 : index
    %c0_5 = arith.constant 0 : index
    %c0_6 = arith.constant 0 : index
    %11 = vector.load %arg2[%c1, %c0_5, %c0_6] : memref<5x32x96xbf16, #tpu.memory_space<vmem>>, vector<1x32x96xbf16>
    %12 = vector.shape_cast %11 : vector<1x32x96xbf16> to vector<32x96xbf16>
    %cst_7 = arith.constant dense<0.000000e+00> : vector<16x96xf32>
    %13 = tpu.matmul %10, %12, %cst_7 {dimension_numbers = #tpu.dot_dimension_numbers<[1], [0], [0], [1], [0, 0, 1, 1], [], []>} : vector<16x32xbf16>, vector<32x96xbf16>, vector<16x96xf32> -> vector<16x96xf32>
    %14 = arith.addf %9, %13 : vector<16x96xf32>
    %15 = vector.extract_strided_slice %5 {offsets = [2, 0], sizes = [16, 32], strides = [1, 1]} : vector<20x32xbf16> to vector<16x32xbf16>
    %c2 = arith.constant 2 : index
    %c0_8 = arith.constant 0 : index
    %c0_9 = arith.constant 0 : index
    %16 = vector.load %arg2[%c2, %c0_8, %c0_9] : memref<5x32x96xbf16, #tpu.memory_space<vmem>>, vector<1x32x96xbf16>
    %17 = vector.shape_cast %16 : vector<1x32x96xbf16> to vector<32x96xbf16>
    %cst_10 = arith.constant dense<0.000000e+00> : vector<16x96xf32>
    %18 = tpu.matmul %15, %17, %cst_10 {dimension_numbers = #tpu.dot_dimension_numbers<[1], [0], [0], [1], [0, 0, 1, 1], [], []>} : vector<16x32xbf16>, vector<32x96xbf16>, vector<16x96xf32> -> vector<16x96xf32>
    %19 = arith.addf %14, %18 : vector<16x96xf32>
    %20 = vector.extract_strided_slice %5 {offsets = [3, 0], sizes = [16, 32], strides = [1, 1]} : vector<20x32xbf16> to vector<16x32xbf16>
    %c3 = arith.constant 3 : index
    %c0_11 = arith.constant 0 : index
    %c0_12 = arith.constant 0 : index
    %21 = vector.load %arg2[%c3, %c0_11, %c0_12] : memref<5x32x96xbf16, #tpu.memory_space<vmem>>, vector<1x32x96xbf16>
    %22 = vector.shape_cast %21 : vector<1x32x96xbf16> to vector<32x96xbf16>
    %cst_13 = arith.constant dense<0.000000e+00> : vector<16x96xf32>
    %23 = tpu.matmul %20, %22, %cst_13 {dimension_numbers = #tpu.dot_dimension_numbers<[1], [0], [0], [1], [0, 0, 1, 1], [], []>} : vector<16x32xbf16>, vector<32x96xbf16>, vector<16x96xf32> -> vector<16x96xf32>
    %24 = arith.addf %19, %23 : vector<16x96xf32>
    %25 = vector.extract_strided_slice %5 {offsets = [4, 0], sizes = [16, 32], strides = [1, 1]} : vector<20x32xbf16> to vector<16x32xbf16>
    %c4 = arith.constant 4 : index
    %c0_14 = arith.constant 0 : index
    %c0_15 = arith.constant 0 : index
    %26 = vector.load %arg2[%c4, %c0_14, %c0_15] : memref<5x32x96xbf16, #tpu.memory_space<vmem>>, vector<1x32x96xbf16>
    %27 = vector.shape_cast %26 : vector<1x32x96xbf16> to vector<32x96xbf16>
    %cst_16 = arith.constant dense<0.000000e+00> : vector<16x96xf32>
    %28 = tpu.matmul %25, %27, %cst_16 {dimension_numbers = #tpu.dot_dimension_numbers<[1], [0], [0], [1], [0, 0, 1, 1], [], []>} : vector<16x32xbf16>, vector<32x96xbf16>, vector<16x96xf32> -> vector<16x96xf32>
    %29 = arith.addf %24, %28 : vector<16x96xf32>
    %c0_17 = arith.constant 0 : index
    %c0_18 = arith.constant 0 : index
    %30 = vector.load %arg3[%c0_17, %c0_18] : memref<1x96xf32, #tpu.memory_space<vmem>>, vector<1x96xf32>
    %31 = vector.broadcast %30 : vector<1x96xf32> to vector<16x96xf32>
    %32 = arith.mulf %29, %31 : vector<16x96xf32>
    %c0_19 = arith.constant 0 : index
    %c0_20 = arith.constant 0 : index
    %33 = vector.load %arg4[%c0_19, %c0_20] : memref<1x96xf32, #tpu.memory_space<vmem>>, vector<1x96xf32>
    %34 = vector.broadcast %33 : vector<1x96xf32> to vector<16x96xf32>
    %35 = arith.addf %32, %34 : vector<16x96xf32>
    %36 = arith.truncf %35 : vector<16x96xf32> to vector<16x96xbf16>
    %c0_21 = arith.constant 0 : index
    %c0_22 = arith.constant 0 : index
    %c0_23 = arith.constant 0 : index
    %37 = vector.load %arg5[%c0_21, %c0_22, %c0_23] : memref<1x16x96xbf16, #tpu.memory_space<vmem>>, vector<1x16x96xbf16>
    %38 = vector.shape_cast %37 : vector<1x16x96xbf16> to vector<16x96xbf16>
    %39 = vector.shape_cast %36 : vector<16x96xbf16> to vector<1x16x96xbf16>
    tpu.vector_store %arg5[%c0_21, %c0_22, %c0_23], %39 {strides = array<i32>} : memref<1x16x96xbf16, #tpu.memory_space<vmem>>, vector<1x16x96xbf16>,
    return
  }
  func.func @transform_0(%arg0: i32) -> (i32, i32, i32) {
    %c0_i32 = arith.constant 0 : i32
    %c0_i32_0 = arith.constant 0 : i32
    %c0_i32_1 = arith.constant 0 : i32
    return %arg0, %c0_i32, %c0_i32_0 : i32, i32, i32
  }
  func.func @transform_1(%arg0: i32) -> (i32, i32, i32) {
    %c0_i32 = arith.constant 0 : i32
    %c0_i32_0 = arith.constant 0 : i32
    %c0_i32_1 = arith.constant 0 : i32
    %c0_i32_2 = arith.constant 0 : i32
    return %c0_i32, %c0_i32_0, %c0_i32_1 : i32, i32, i32
  }
  func.func @transform_2(%arg0: i32) -> (i32, i32) {
    %c0_i32 = arith.constant 0 : i32
    %c0_i32_0 = arith.constant 0 : i32
    %c0_i32_1 = arith.constant 0 : i32
    return %c0_i32, %c0_i32_0 : i32, i32
  }
  func.func @transform_3(%arg0: i32) -> (i32, i32) {
    %c0_i32 = arith.constant 0 : i32
    %c0_i32_0 = arith.constant 0 : i32
    %c0_i32_1 = arith.constant 0 : i32
    return %c0_i32, %c0_i32_0 : i32, i32
  }
  func.func @transform_4(%arg0: i32) -> (i32, i32, i32) {
    %c0_i32 = arith.constant 0 : i32
    %c0_i32_0 = arith.constant 0 : i32
    %c0_i32_1 = arith.constant 0 : i32
    return %arg0, %c0_i32, %c0_i32_0 : i32, i32, i32
  }
}

module attributes {stable_mosaic.version = 11 : i64} {
  func.func @_attn_kernel(%arg0: i32, %arg1: i32, %arg2: memref<1x16x96xbf16, #tpu.memory_space<vmem>>, %arg3: memref<1x16x96xbf16, #tpu.memory_space<vmem>>, %arg4: memref<1x16x32xbf16, #tpu.memory_space<vmem>>) attributes {dimension_semantics = [#tpu.dimension_semantics<parallel>, #tpu.dimension_semantics<parallel>], iteration_bounds = array<i64: 2, 1>, scalar_prefetch = 0 : i64, scratch_operands = 0 : i64, tpu.core_type = #tpu.core_type<tc>, window_params = [{transform_indices = @transform_0, window_bounds = array<i64: 1, 16, 96>}, {transform_indices = @transform_1, window_bounds = array<i64: 1, 16, 96>}, {transform_indices = @transform_2, window_bounds = array<i64: 1, 16, 32>}]} {
    %c0 = arith.constant 0 : index
    %c0_0 = arith.constant 0 : index
    %c0_1 = arith.constant 0 : index
    %0 = vector.load %arg2[%c0, %c0_0, %c0_1] : memref<1x16x96xbf16, #tpu.memory_space<vmem>>, vector<1x16x96xbf16>
    %1 = vector.shape_cast %0 : vector<1x16x96xbf16> to vector<16x96xbf16>
    %2 = vector.extract_strided_slice %1 {offsets = [0, 0], sizes = [16, 32], strides = [1, 1]} : vector<16x96xbf16> to vector<16x32xbf16>
    %c0_2 = arith.constant 0 : index
    %c0_3 = arith.constant 0 : index
    %c0_4 = arith.constant 0 : index
    %3 = vector.load %arg3[%c0_2, %c0_3, %c0_4] : memref<1x16x96xbf16, #tpu.memory_space<vmem>>, vector<1x16x96xbf16>
    %4 = vector.shape_cast %3 : vector<1x16x96xbf16> to vector<16x96xbf16>
    %5 = vector.extract_strided_slice %4 {offsets = [0, 32], sizes = [16, 32], strides = [1, 1]} : vector<16x96xbf16> to vector<16x32xbf16>
    %6 = vector.extract_strided_slice %4 {offsets = [0, 64], sizes = [16, 32], strides = [1, 1]} : vector<16x96xbf16> to vector<16x32xbf16>
    %7 = vector.extract_strided_slice %2 {offsets = [0, 0], sizes = [16, 8], strides = [1, 1]} : vector<16x32xbf16> to vector<16x8xbf16>
    %8 = vector.extract_strided_slice %5 {offsets = [0, 0], sizes = [16, 8], strides = [1, 1]} : vector<16x32xbf16> to vector<16x8xbf16>
    %9 = vector.extract_strided_slice %6 {offsets = [0, 0], sizes = [16, 8], strides = [1, 1]} : vector<16x32xbf16> to vector<16x8xbf16>
    %cst = arith.constant dense<0.000000e+00> : vector<16x16xf32>
    %10 = tpu.matmul %7, %8, %cst {dimension_numbers = #tpu.dot_dimension_numbers<[1], [1], [0], [0], [0, 0, 1, 0], [], []>} : vector<16x8xbf16>, vector<16x8xbf16>, vector<16x16xf32> -> vector<16x16xf32>
    %cst_5 = arith.constant 0.353553385 : f32
    %11 = vector.broadcast %cst_5 : f32 to vector<16x16xf32>
    %12 = arith.mulf %10, %11 : vector<16x16xf32>
    %cst_6 = arith.constant dense<0xFF800000> : vector<16xf32>
    %13 = vector.multi_reduction <maximumf>, %12, %cst_6 [1] : vector<16x16xf32> to vector<16xf32>
    %14 = vector.shape_cast %13 : vector<16xf32> to vector<16x1xf32>
    %15 = vector.broadcast %14 : vector<16x1xf32> to vector<16x16xf32>
    %16 = arith.subf %12, %15 : vector<16x16xf32>
    %17 = math.exp %16 : vector<16x16xf32>
    %cst_7 = arith.constant dense<0.000000e+00> : vector<16xf32>
    %18 = vector.multi_reduction <add>, %17, %cst_7 [1] : vector<16x16xf32> to vector<16xf32>
    %19 = vector.shape_cast %18 : vector<16xf32> to vector<16x1xf32>
    %20 = tpu.reciprocal %19 {approx = true} : vector<16x1xf32> -> vector<16x1xf32>
    %21 = vector.broadcast %20 : vector<16x1xf32> to vector<16x16xf32>
    %22 = arith.mulf %17, %21 : vector<16x16xf32>
    %23 = arith.truncf %22 : vector<16x16xf32> to vector<16x16xbf16>
    %cst_8 = arith.constant dense<0.000000e+00> : vector<16x8xf32>
    %24 = tpu.matmul %23, %9, %cst_8 {dimension_numbers = #tpu.dot_dimension_numbers<[1], [0], [0], [1], [0, 0, 1, 1], [], []>} : vector<16x16xbf16>, vector<16x8xbf16>, vector<16x8xf32> -> vector<16x8xf32>
    %25 = vector.extract_strided_slice %2 {offsets = [0, 8], sizes = [16, 8], strides = [1, 1]} : vector<16x32xbf16> to vector<16x8xbf16>
    %26 = vector.extract_strided_slice %5 {offsets = [0, 8], sizes = [16, 8], strides = [1, 1]} : vector<16x32xbf16> to vector<16x8xbf16>
    %27 = vector.extract_strided_slice %6 {offsets = [0, 8], sizes = [16, 8], strides = [1, 1]} : vector<16x32xbf16> to vector<16x8xbf16>
    %cst_9 = arith.constant dense<0.000000e+00> : vector<16x16xf32>
    %28 = tpu.matmul %25, %26, %cst_9 {dimension_numbers = #tpu.dot_dimension_numbers<[1], [1], [0], [0], [0, 0, 1, 0], [], []>} : vector<16x8xbf16>, vector<16x8xbf16>, vector<16x16xf32> -> vector<16x16xf32>
    %cst_10 = arith.constant 0.353553385 : f32
    %29 = vector.broadcast %cst_10 : f32 to vector<16x16xf32>
    %30 = arith.mulf %28, %29 : vector<16x16xf32>
    %cst_11 = arith.constant dense<0xFF800000> : vector<16xf32>
    %31 = vector.multi_reduction <maximumf>, %30, %cst_11 [1] : vector<16x16xf32> to vector<16xf32>
    %32 = vector.shape_cast %31 : vector<16xf32> to vector<16x1xf32>
    %33 = vector.broadcast %32 : vector<16x1xf32> to vector<16x16xf32>
    %34 = arith.subf %30, %33 : vector<16x16xf32>
    %35 = math.exp %34 : vector<16x16xf32>
    %cst_12 = arith.constant dense<0.000000e+00> : vector<16xf32>
    %36 = vector.multi_reduction <add>, %35, %cst_12 [1] : vector<16x16xf32> to vector<16xf32>
    %37 = vector.shape_cast %36 : vector<16xf32> to vector<16x1xf32>
    %38 = tpu.reciprocal %37 {approx = true} : vector<16x1xf32> -> vector<16x1xf32>
    %39 = vector.broadcast %38 : vector<16x1xf32> to vector<16x16xf32>
    %40 = arith.mulf %35, %39 : vector<16x16xf32>
    %41 = arith.truncf %40 : vector<16x16xf32> to vector<16x16xbf16>
    %cst_13 = arith.constant dense<0.000000e+00> : vector<16x8xf32>
    %42 = tpu.matmul %41, %27, %cst_13 {dimension_numbers = #tpu.dot_dimension_numbers<[1], [0], [0], [1], [0, 0, 1, 1], [], []>} : vector<16x16xbf16>, vector<16x8xbf16>, vector<16x8xf32> -> vector<16x8xf32>
    %43 = vector.extract_strided_slice %2 {offsets = [0, 16], sizes = [16, 8], strides = [1, 1]} : vector<16x32xbf16> to vector<16x8xbf16>
    %44 = vector.extract_strided_slice %5 {offsets = [0, 16], sizes = [16, 8], strides = [1, 1]} : vector<16x32xbf16> to vector<16x8xbf16>
    %45 = vector.extract_strided_slice %6 {offsets = [0, 16], sizes = [16, 8], strides = [1, 1]} : vector<16x32xbf16> to vector<16x8xbf16>
    %cst_14 = arith.constant dense<0.000000e+00> : vector<16x16xf32>
    %46 = tpu.matmul %43, %44, %cst_14 {dimension_numbers = #tpu.dot_dimension_numbers<[1], [1], [0], [0], [0, 0, 1, 0], [], []>} : vector<16x8xbf16>, vector<16x8xbf16>, vector<16x16xf32> -> vector<16x16xf32>
    %cst_15 = arith.constant 0.353553385 : f32
    %47 = vector.broadcast %cst_15 : f32 to vector<16x16xf32>
    %48 = arith.mulf %46, %47 : vector<16x16xf32>
    %cst_16 = arith.constant dense<0xFF800000> : vector<16xf32>
    %49 = vector.multi_reduction <maximumf>, %48, %cst_16 [1] : vector<16x16xf32> to vector<16xf32>
    %50 = vector.shape_cast %49 : vector<16xf32> to vector<16x1xf32>
    %51 = vector.broadcast %50 : vector<16x1xf32> to vector<16x16xf32>
    %52 = arith.subf %48, %51 : vector<16x16xf32>
    %53 = math.exp %52 : vector<16x16xf32>
    %cst_17 = arith.constant dense<0.000000e+00> : vector<16xf32>
    %54 = vector.multi_reduction <add>, %53, %cst_17 [1] : vector<16x16xf32> to vector<16xf32>
    %55 = vector.shape_cast %54 : vector<16xf32> to vector<16x1xf32>
    %56 = tpu.reciprocal %55 {approx = true} : vector<16x1xf32> -> vector<16x1xf32>
    %57 = vector.broadcast %56 : vector<16x1xf32> to vector<16x16xf32>
    %58 = arith.mulf %53, %57 : vector<16x16xf32>
    %59 = arith.truncf %58 : vector<16x16xf32> to vector<16x16xbf16>
    %cst_18 = arith.constant dense<0.000000e+00> : vector<16x8xf32>
    %60 = tpu.matmul %59, %45, %cst_18 {dimension_numbers = #tpu.dot_dimension_numbers<[1], [0], [0], [1], [0, 0, 1, 1], [], []>} : vector<16x16xbf16>, vector<16x8xbf16>, vector<16x8xf32> -> vector<16x8xf32>
    %61 = vector.extract_strided_slice %2 {offsets = [0, 24], sizes = [16, 8], strides = [1, 1]} : vector<16x32xbf16> to vector<16x8xbf16>
    %62 = vector.extract_strided_slice %5 {offsets = [0, 24], sizes = [16, 8], strides = [1, 1]} : vector<16x32xbf16> to vector<16x8xbf16>
    %63 = vector.extract_strided_slice %6 {offsets = [0, 24], sizes = [16, 8], strides = [1, 1]} : vector<16x32xbf16> to vector<16x8xbf16>
    %cst_19 = arith.constant dense<0.000000e+00> : vector<16x16xf32>
    %64 = tpu.matmul %61, %62, %cst_19 {dimension_numbers = #tpu.dot_dimension_numbers<[1], [1], [0], [0], [0, 0, 1, 0], [], []>} : vector<16x8xbf16>, vector<16x8xbf16>, vector<16x16xf32> -> vector<16x16xf32>
    %cst_20 = arith.constant 0.353553385 : f32
    %65 = vector.broadcast %cst_20 : f32 to vector<16x16xf32>
    %66 = arith.mulf %64, %65 : vector<16x16xf32>
    %cst_21 = arith.constant dense<0xFF800000> : vector<16xf32>
    %67 = vector.multi_reduction <maximumf>, %66, %cst_21 [1] : vector<16x16xf32> to vector<16xf32>
    %68 = vector.shape_cast %67 : vector<16xf32> to vector<16x1xf32>
    %69 = vector.broadcast %68 : vector<16x1xf32> to vector<16x16xf32>
    %70 = arith.subf %66, %69 : vector<16x16xf32>
    %71 = math.exp %70 : vector<16x16xf32>
    %cst_22 = arith.constant dense<0.000000e+00> : vector<16xf32>
    %72 = vector.multi_reduction <add>, %71, %cst_22 [1] : vector<16x16xf32> to vector<16xf32>
    %73 = vector.shape_cast %72 : vector<16xf32> to vector<16x1xf32>
    %74 = tpu.reciprocal %73 {approx = true} : vector<16x1xf32> -> vector<16x1xf32>
    %75 = vector.broadcast %74 : vector<16x1xf32> to vector<16x16xf32>
    %76 = arith.mulf %71, %75 : vector<16x16xf32>
    %77 = arith.truncf %76 : vector<16x16xf32> to vector<16x16xbf16>
    %cst_23 = arith.constant dense<0.000000e+00> : vector<16x8xf32>
    %78 = tpu.matmul %77, %63, %cst_23 {dimension_numbers = #tpu.dot_dimension_numbers<[1], [0], [0], [1], [0, 0, 1, 1], [], []>} : vector<16x16xbf16>, vector<16x8xbf16>, vector<16x8xf32> -> vector<16x8xf32>
    %79 = tpu.concatenate %24, %42, %60, %78 in 1 : vector<16x8xf32>, vector<16x8xf32>, vector<16x8xf32>, vector<16x8xf32> -> vector<16x32xf32>
    %80 = arith.truncf %79 : vector<16x32xf32> to vector<16x32xbf16>
    %c0_24 = arith.constant 0 : index
    %c0_25 = arith.constant 0 : index
    %c0_26 = arith.constant 0 : index
    %81 = vector.load %arg4[%c0_24, %c0_25, %c0_26] : memref<1x16x32xbf16, #tpu.memory_space<vmem>>, vector<1x16x32xbf16>
    %82 = vector.shape_cast %81 : vector<1x16x32xbf16> to vector<16x32xbf16>
    %83 = vector.shape_cast %80 : vector<16x32xbf16> to vector<1x16x32xbf16>
    tpu.vector_store %arg4[%c0_24, %c0_25, %c0_26], %83 {strides = array<i32>} : memref<1x16x32xbf16, #tpu.memory_space<vmem>>, vector<1x16x32xbf16>,
    return
  }
  func.func @transform_0(%arg0: i32, %arg1: i32) -> (i32, i32, i32) {
    %c0_i32 = arith.constant 0 : i32
    %c0_i32_0 = arith.constant 0 : i32
    return %arg0, %arg1, %c0_i32 : i32, i32, i32
  }
  func.func @transform_1(%arg0: i32, %arg1: i32) -> (i32, i32, i32) {
    %c0_i32 = arith.constant 0 : i32
    %c0_i32_0 = arith.constant 0 : i32
    %c0_i32_1 = arith.constant 0 : i32
    return %arg0, %c0_i32, %c0_i32_0 : i32, i32, i32
  }
  func.func @transform_2(%arg0: i32, %arg1: i32) -> (i32, i32, i32) {
    %c0_i32 = arith.constant 0 : i32
    %c0_i32_0 = arith.constant 0 : i32
    return %arg0, %arg1, %c0_i32 : i32, i32, i32
  }
}

module attributes {stable_mosaic.version = 11 : i64} {
  func.func @_matmul_bias_kernel(%arg0: i32, %arg1: memref<32x32xbf16, #tpu.memory_space<vmem>>, %arg2: memref<32x32xbf16, #tpu.memory_space<vmem>>, %arg3: memref<1x32xf32, #tpu.memory_space<vmem>>, %arg4: memref<32x32xbf16, #tpu.memory_space<vmem>>) attributes {dimension_semantics = [#tpu.dimension_semantics<parallel>], iteration_bounds = array<i64: 1>, scalar_prefetch = 0 : i64, scratch_operands = 0 : i64, tpu.core_type = #tpu.core_type<tc>, window_params = [{transform_indices = @transform_0, window_bounds = array<i64: 32, 32>}, {pipeline_mode = #tpu.pipeline_mode<synchronous>, transform_indices = @transform_1, window_bounds = array<i64: 32, 32>}, {pipeline_mode = #tpu.pipeline_mode<synchronous>, transform_indices = @transform_2, window_bounds = array<i64: 1, 32>}, {transform_indices = @transform_3, window_bounds = array<i64: 32, 32>}]} {
    %c0 = arith.constant 0 : index
    %c0_0 = arith.constant 0 : index
    %0 = vector.load %arg1[%c0, %c0_0] : memref<32x32xbf16, #tpu.memory_space<vmem>>, vector<32x32xbf16>
    %c0_1 = arith.constant 0 : index
    %c0_2 = arith.constant 0 : index
    %1 = vector.load %arg2[%c0_1, %c0_2] : memref<32x32xbf16, #tpu.memory_space<vmem>>, vector<32x32xbf16>
    %cst = arith.constant dense<0.000000e+00> : vector<32x32xf32>
    %2 = tpu.matmul %0, %1, %cst {dimension_numbers = #tpu.dot_dimension_numbers<[1], [0], [0], [1], [0, 0, 1, 1], [], []>} : vector<32x32xbf16>, vector<32x32xbf16>, vector<32x32xf32> -> vector<32x32xf32>
    %c0_3 = arith.constant 0 : index
    %c0_4 = arith.constant 0 : index
    %3 = vector.load %arg3[%c0_3, %c0_4] : memref<1x32xf32, #tpu.memory_space<vmem>>, vector<1x32xf32>
    %4 = vector.broadcast %3 : vector<1x32xf32> to vector<32x32xf32>
    %5 = arith.addf %2, %4 : vector<32x32xf32>
    %6 = arith.truncf %5 : vector<32x32xf32> to vector<32x32xbf16>
    %c0_5 = arith.constant 0 : index
    %c0_6 = arith.constant 0 : index
    %7 = vector.load %arg4[%c0_5, %c0_6] : memref<32x32xbf16, #tpu.memory_space<vmem>>, vector<32x32xbf16>
    tpu.vector_store %arg4[%c0_5, %c0_6], %6 {strides = array<i32>} : memref<32x32xbf16, #tpu.memory_space<vmem>>, vector<32x32xbf16>,
    return
  }
  func.func @transform_0(%arg0: i32) -> (i32, i32) {
    %c0_i32 = arith.constant 0 : i32
    %c0_i32_0 = arith.constant 0 : i32
    return %arg0, %c0_i32 : i32, i32
  }
  func.func @transform_1(%arg0: i32) -> (i32, i32) {
    %c0_i32 = arith.constant 0 : i32
    %c0_i32_0 = arith.constant 0 : i32
    %c0_i32_1 = arith.constant 0 : i32
    return %c0_i32, %c0_i32_0 : i32, i32
  }
  func.func @transform_2(%arg0: i32) -> (i32, i32) {
    %c0_i32 = arith.constant 0 : i32
    %c0_i32_0 = arith.constant 0 : i32
    %c0_i32_1 = arith.constant 0 : i32
    return %c0_i32, %c0_i32_0 : i32, i32
  }
  func.func @transform_3(%arg0: i32) -> (i32, i32) {
    %c0_i32 = arith.constant 0 : i32
    %c0_i32_0 = arith.constant 0 : i32
    return %arg0, %c0_i32 : i32, i32
  }
}

module attributes {stable_mosaic.version = 11 : i64} {
  func.func @_add_layernorm_kernel(%arg0: i32, %arg1: memref<32x32xf32, #tpu.memory_space<vmem>>, %arg2: memref<32x32xbf16, #tpu.memory_space<vmem>>, %arg3: memref<1x32xf32, #tpu.memory_space<vmem>>, %arg4: memref<1x32xf32, #tpu.memory_space<vmem>>, %arg5: memref<32x32xf32, #tpu.memory_space<vmem>>) attributes {dimension_semantics = [#tpu.dimension_semantics<parallel>], iteration_bounds = array<i64: 1>, scalar_prefetch = 0 : i64, scratch_operands = 0 : i64, tpu.core_type = #tpu.core_type<tc>, window_params = [{transform_indices = @transform_0, window_bounds = array<i64: 32, 32>}, {transform_indices = @transform_1, window_bounds = array<i64: 32, 32>}, {pipeline_mode = #tpu.pipeline_mode<synchronous>, transform_indices = @transform_2, window_bounds = array<i64: 1, 32>}, {pipeline_mode = #tpu.pipeline_mode<synchronous>, transform_indices = @transform_3, window_bounds = array<i64: 1, 32>}, {transform_indices = @transform_4, window_bounds = array<i64: 32, 32>}]} {
    %c0 = arith.constant 0 : index
    %c0_0 = arith.constant 0 : index
    %0 = vector.load %arg1[%c0, %c0_0] : memref<32x32xf32, #tpu.memory_space<vmem>>, vector<32x32xf32>
    %c0_1 = arith.constant 0 : index
    %c0_2 = arith.constant 0 : index
    %1 = vector.load %arg2[%c0_1, %c0_2] : memref<32x32xbf16, #tpu.memory_space<vmem>>, vector<32x32xbf16>
    %2 = arith.extf %1 : vector<32x32xbf16> to vector<32x32xf32>
    %3 = arith.addf %0, %2 : vector<32x32xf32>
    %cst = arith.constant dense<0.000000e+00> : vector<32xf32>
    %4 = vector.multi_reduction <add>, %3, %cst [1] : vector<32x32xf32> to vector<32xf32>
    %5 = vector.shape_cast %4 : vector<32xf32> to vector<32x1xf32>
    %cst_3 = arith.constant 3.200000e+01 : f32
    %6 = vector.broadcast %cst_3 : f32 to vector<32x1xf32>
    %7 = arith.divf %5, %6 : vector<32x1xf32>
    %8 = vector.broadcast %7 : vector<32x1xf32> to vector<32x32xf32>
    %9 = arith.subf %3, %8 : vector<32x32xf32>
    %10 = arith.mulf %9, %9 : vector<32x32xf32>
    %cst_4 = arith.constant dense<0.000000e+00> : vector<32xf32>
    %11 = vector.multi_reduction <add>, %10, %cst_4 [1] : vector<32x32xf32> to vector<32xf32>
    %12 = vector.shape_cast %11 : vector<32xf32> to vector<32x1xf32>
    %cst_5 = arith.constant 3.200000e+01 : f32
    %13 = vector.broadcast %cst_5 : f32 to vector<32x1xf32>
    %14 = arith.divf %12, %13 : vector<32x1xf32>
    %cst_6 = arith.constant 9.99999974E-6 : f32
    %15 = vector.broadcast %cst_6 : f32 to vector<32x1xf32>
    %16 = arith.addf %14, %15 : vector<32x1xf32>
    %17 = math.rsqrt %16 : vector<32x1xf32>
    %18 = vector.broadcast %17 : vector<32x1xf32> to vector<32x32xf32>
    %19 = arith.mulf %9, %18 : vector<32x32xf32>
    %c0_7 = arith.constant 0 : index
    %c0_8 = arith.constant 0 : index
    %20 = vector.load %arg3[%c0_7, %c0_8] : memref<1x32xf32, #tpu.memory_space<vmem>>, vector<1x32xf32>
    %21 = vector.broadcast %20 : vector<1x32xf32> to vector<32x32xf32>
    %22 = arith.mulf %19, %21 : vector<32x32xf32>
    %c0_9 = arith.constant 0 : index
    %c0_10 = arith.constant 0 : index
    %23 = vector.load %arg4[%c0_9, %c0_10] : memref<1x32xf32, #tpu.memory_space<vmem>>, vector<1x32xf32>
    %24 = vector.broadcast %23 : vector<1x32xf32> to vector<32x32xf32>
    %25 = arith.addf %22, %24 : vector<32x32xf32>
    %c0_11 = arith.constant 0 : index
    %c0_12 = arith.constant 0 : index
    %26 = vector.load %arg5[%c0_11, %c0_12] : memref<32x32xf32, #tpu.memory_space<vmem>>, vector<32x32xf32>
    tpu.vector_store %arg5[%c0_11, %c0_12], %25 {strides = array<i32>} : memref<32x32xf32, #tpu.memory_space<vmem>>, vector<32x32xf32>,
    return
  }
  func.func @transform_0(%arg0: i32) -> (i32, i32) {
    %c0_i32 = arith.constant 0 : i32
    %c0_i32_0 = arith.constant 0 : i32
    return %arg0, %c0_i32 : i32, i32
  }
  func.func @transform_1(%arg0: i32) -> (i32, i32) {
    %c0_i32 = arith.constant 0 : i32
    %c0_i32_0 = arith.constant 0 : i32
    return %arg0, %c0_i32 : i32, i32
  }
  func.func @transform_2(%arg0: i32) -> (i32, i32) {
    %c0_i32 = arith.constant 0 : i32
    %c0_i32_0 = arith.constant 0 : i32
    %c0_i32_1 = arith.constant 0 : i32
    return %c0_i32, %c0_i32_0 : i32, i32
  }
  func.func @transform_3(%arg0: i32) -> (i32, i32) {
    %c0_i32 = arith.constant 0 : i32
    %c0_i32_0 = arith.constant 0 : i32
    %c0_i32_1 = arith.constant 0 : i32
    return %c0_i32, %c0_i32_0 : i32, i32
  }
  func.func @transform_4(%arg0: i32) -> (i32, i32) {
    %c0_i32 = arith.constant 0 : i32
    %c0_i32_0 = arith.constant 0 : i32
    return %arg0, %c0_i32 : i32, i32
  }
}

module attributes {stable_mosaic.version = 11 : i64} {
  func.func @_matmul_bias_kernel(%arg0: i32, %arg1: memref<32x32xf32, #tpu.memory_space<vmem>>, %arg2: memref<32x32xbf16, #tpu.memory_space<vmem>>, %arg3: memref<1x32xf32, #tpu.memory_space<vmem>>, %arg4: memref<32x32xbf16, #tpu.memory_space<vmem>>) attributes {dimension_semantics = [#tpu.dimension_semantics<parallel>], iteration_bounds = array<i64: 1>, scalar_prefetch = 0 : i64, scratch_operands = 0 : i64, tpu.core_type = #tpu.core_type<tc>, window_params = [{transform_indices = @transform_0, window_bounds = array<i64: 32, 32>}, {pipeline_mode = #tpu.pipeline_mode<synchronous>, transform_indices = @transform_1, window_bounds = array<i64: 32, 32>}, {pipeline_mode = #tpu.pipeline_mode<synchronous>, transform_indices = @transform_2, window_bounds = array<i64: 1, 32>}, {transform_indices = @transform_3, window_bounds = array<i64: 32, 32>}]} {
    %c0 = arith.constant 0 : index
    %c0_0 = arith.constant 0 : index
    %0 = vector.load %arg1[%c0, %c0_0] : memref<32x32xf32, #tpu.memory_space<vmem>>, vector<32x32xf32>
    %1 = arith.truncf %0 : vector<32x32xf32> to vector<32x32xbf16>
    %c0_1 = arith.constant 0 : index
    %c0_2 = arith.constant 0 : index
    %2 = vector.load %arg2[%c0_1, %c0_2] : memref<32x32xbf16, #tpu.memory_space<vmem>>, vector<32x32xbf16>
    %cst = arith.constant dense<0.000000e+00> : vector<32x32xf32>
    %3 = tpu.matmul %1, %2, %cst {dimension_numbers = #tpu.dot_dimension_numbers<[1], [0], [0], [1], [0, 0, 1, 1], [], []>} : vector<32x32xbf16>, vector<32x32xbf16>, vector<32x32xf32> -> vector<32x32xf32>
    %c0_3 = arith.constant 0 : index
    %c0_4 = arith.constant 0 : index
    %4 = vector.load %arg3[%c0_3, %c0_4] : memref<1x32xf32, #tpu.memory_space<vmem>>, vector<1x32xf32>
    %5 = vector.broadcast %4 : vector<1x32xf32> to vector<32x32xf32>
    %6 = arith.addf %3, %5 : vector<32x32xf32>
    %cst_5 = arith.constant 5.000000e-01 : f32
    %7 = vector.broadcast %cst_5 : f32 to vector<32x32xf32>
    %8 = arith.mulf %7, %6 : vector<32x32xf32>
    %cst_6 = arith.constant 4.471500e-02 : f32
    %9 = vector.broadcast %cst_6 : f32 to vector<32x32xf32>
    %10 = arith.mulf %9, %6 : vector<32x32xf32>
    %11 = arith.mulf %10, %6 : vector<32x32xf32>
    %12 = arith.mulf %11, %6 : vector<32x32xf32>
    %13 = arith.addf %6, %12 : vector<32x32xf32>
    %cst_7 = arith.constant 0.797884583 : f32
    %14 = vector.broadcast %cst_7 : f32 to vector<32x32xf32>
    %15 = arith.mulf %14, %13 : vector<32x32xf32>
    %16 = math.tanh %15 : vector<32x32xf32>
    %cst_8 = arith.constant 1.000000e+00 : f32
    %17 = vector.broadcast %cst_8 : f32 to vector<32x32xf32>
    %18 = arith.addf %17, %16 : vector<32x32xf32>
    %19 = arith.mulf %8, %18 : vector<32x32xf32>
    %20 = arith.truncf %19 : vector<32x32xf32> to vector<32x32xbf16>
    %c0_9 = arith.constant 0 : index
    %c0_10 = arith.constant 0 : index
    %21 = vector.load %arg4[%c0_9, %c0_10] : memref<32x32xbf16, #tpu.memory_space<vmem>>, vector<32x32xbf16>
    tpu.vector_store %arg4[%c0_9, %c0_10], %20 {strides = array<i32>} : memref<32x32xbf16, #tpu.memory_space<vmem>>, vector<32x32xbf16>,
    return
  }
  func.func @transform_0(%arg0: i32) -> (i32, i32) {
    %c0_i32 = arith.constant 0 : i32
    %c0_i32_0 = arith.constant 0 : i32
    return %arg0, %c0_i32 : i32, i32
  }
  func.func @transform_1(%arg0: i32) -> (i32, i32) {
    %c0_i32 = arith.constant 0 : i32
    %c0_i32_0 = arith.constant 0 : i32
    %c0_i32_1 = arith.constant 0 : i32
    return %c0_i32, %c0_i32_0 : i32, i32
  }
  func.func @transform_2(%arg0: i32) -> (i32, i32) {
    %c0_i32 = arith.constant 0 : i32
    %c0_i32_0 = arith.constant 0 : i32
    %c0_i32_1 = arith.constant 0 : i32
    return %c0_i32, %c0_i32_0 : i32, i32
  }
  func.func @transform_3(%arg0: i32) -> (i32, i32) {
    %c0_i32 = arith.constant 0 : i32
    %c0_i32_0 = arith.constant 0 : i32
    return %arg0, %c0_i32 : i32, i32
  }
}

module attributes {stable_mosaic.version = 11 : i64} {
  func.func @_conv1d_kernel(%arg0: i32, %arg1: memref<1x16x32xf32, #tpu.memory_space<vmem>>, %arg2: memref<3x32x32xbf16, #tpu.memory_space<vmem>>, %arg3: memref<1x32xf32, #tpu.memory_space<vmem>>, %arg4: memref<1x32xf32, #tpu.memory_space<vmem>>, %arg5: memref<1x8x32xf32, #tpu.memory_space<vmem>>) attributes {dimension_semantics = [#tpu.dimension_semantics<parallel>], iteration_bounds = array<i64: 2>, scalar_prefetch = 0 : i64, scratch_operands = 0 : i64, tpu.core_type = #tpu.core_type<tc>, window_params = [{transform_indices = @transform_0, window_bounds = array<i64: 1, 16, 32>}, {pipeline_mode = #tpu.pipeline_mode<synchronous>, transform_indices = @transform_1, window_bounds = array<i64: 3, 32, 32>}, {pipeline_mode = #tpu.pipeline_mode<synchronous>, transform_indices = @transform_2, window_bounds = array<i64: 1, 32>}, {pipeline_mode = #tpu.pipeline_mode<synchronous>, transform_indices = @transform_3, window_bounds = array<i64: 1, 32>}, {transform_indices = @transform_4, window_bounds = array<i64: 1, 8, 32>}]} {
    %c0 = arith.constant 0 : index
    %c0_0 = arith.constant 0 : index
    %c0_1 = arith.constant 0 : index
    %0 = vector.load %arg1[%c0, %c0_0, %c0_1] : memref<1x16x32xf32, #tpu.memory_space<vmem>>, vector<1x16x32xf32>
    %1 = vector.shape_cast %0 : vector<1x16x32xf32> to vector<16x32xf32>
    %2 = arith.truncf %1 : vector<16x32xf32> to vector<16x32xbf16>
    %3 = vector.extract_strided_slice %2 {offsets = [15, 0], sizes = [1, 32], strides = [1, 1]} : vector<16x32xbf16> to vector<1x32xbf16>
    %4 = vector.extract_strided_slice %2 {offsets = [0, 0], sizes = [1, 32], strides = [1, 1]} : vector<16x32xbf16> to vector<1x32xbf16>
    %5 = tpu.concatenate %3, %2, %4 in 0 : vector<1x32xbf16>, vector<16x32xbf16>, vector<1x32xbf16> -> vector<18x32xbf16>
    %6 = vector.extract_strided_slice %5 {offsets = [0, 0], sizes = [16, 32], strides = [1, 1]} : vector<18x32xbf16> to vector<16x32xbf16>
    %c0_2 = arith.constant 0 : index
    %c0_3 = arith.constant 0 : index
    %c0_4 = arith.constant 0 : index
    %7 = vector.load %arg2[%c0_2, %c0_3, %c0_4] : memref<3x32x32xbf16, #tpu.memory_space<vmem>>, vector<1x32x32xbf16>
    %8 = vector.shape_cast %7 : vector<1x32x32xbf16> to vector<32x32xbf16>
    %cst = arith.constant dense<0.000000e+00> : vector<16x32xf32>
    %9 = tpu.matmul %6, %8, %cst {dimension_numbers = #tpu.dot_dimension_numbers<[1], [0], [0], [1], [0, 0, 1, 1], [], []>} : vector<16x32xbf16>, vector<32x32xbf16>, vector<16x32xf32> -> vector<16x32xf32>
    %10 = vector.extract_strided_slice %5 {offsets = [1, 0], sizes = [16, 32], strides = [1, 1]} : vector<18x32xbf16> to vector<16x32xbf16>
    %c1 = arith.constant 1 : index
    %c0_5 = arith.constant 0 : index
    %c0_6 = arith.constant 0 : index
    %11 = vector.load %arg2[%c1, %c0_5, %c0_6] : memref<3x32x32xbf16, #tpu.memory_space<vmem>>, vector<1x32x32xbf16>
    %12 = vector.shape_cast %11 : vector<1x32x32xbf16> to vector<32x32xbf16>
    %cst_7 = arith.constant dense<0.000000e+00> : vector<16x32xf32>
    %13 = tpu.matmul %10, %12, %cst_7 {dimension_numbers = #tpu.dot_dimension_numbers<[1], [0], [0], [1], [0, 0, 1, 1], [], []>} : vector<16x32xbf16>, vector<32x32xbf16>, vector<16x32xf32> -> vector<16x32xf32>
    %14 = arith.addf %9, %13 : vector<16x32xf32>
    %15 = vector.extract_strided_slice %5 {offsets = [2, 0], sizes = [16, 32], strides = [1, 1]} : vector<18x32xbf16> to vector<16x32xbf16>
    %c2 = arith.constant 2 : index
    %c0_8 = arith.constant 0 : index
    %c0_9 = arith.constant 0 : index
    %16 = vector.load %arg2[%c2, %c0_8, %c0_9] : memref<3x32x32xbf16, #tpu.memory_space<vmem>>, vector<1x32x32xbf16>
    %17 = vector.shape_cast %16 : vector<1x32x32xbf16> to vector<32x32xbf16>
    %cst_10 = arith.constant dense<0.000000e+00> : vector<16x32xf32>
    %18 = tpu.matmul %15, %17, %cst_10 {dimension_numbers = #tpu.dot_dimension_numbers<[1], [0], [0], [1], [0, 0, 1, 1], [], []>} : vector<16x32xbf16>, vector<32x32xbf16>, vector<16x32xf32> -> vector<16x32xf32>
    %19 = arith.addf %14, %18 : vector<16x32xf32>
    %c0_11 = arith.constant 0 : index
    %c0_12 = arith.constant 0 : index
    %20 = vector.load %arg3[%c0_11, %c0_12] : memref<1x32xf32, #tpu.memory_space<vmem>>, vector<1x32xf32>
    %21 = vector.broadcast %20 : vector<1x32xf32> to vector<16x32xf32>
    %22 = arith.mulf %19, %21 : vector<16x32xf32>
    %c0_13 = arith.constant 0 : index
    %c0_14 = arith.constant 0 : index
    %23 = vector.load %arg4[%c0_13, %c0_14] : memref<1x32xf32, #tpu.memory_space<vmem>>, vector<1x32xf32>
    %24 = vector.broadcast %23 : vector<1x32xf32> to vector<16x32xf32>
    %25 = arith.addf %22, %24 : vector<16x32xf32>
    %cst_15 = arith.constant 0.000000e+00 : f32
    %26 = vector.broadcast %cst_15 : f32 to vector<16x32xf32>
    %27 = arith.cmpf ogt, %25, %26 : vector<16x32xf32>
    %cst_16 = arith.constant 0.000000e+00 : f32
    %28 = vector.broadcast %cst_16 : f32 to vector<16x32xf32>
    %29 = arith.minimumf %25, %28 : vector<16x32xf32>
    %30 = math.exp %29 : vector<16x32xf32>
    %cst_17 = arith.constant 1.000000e+00 : f32
    %31 = vector.broadcast %cst_17 : f32 to vector<16x32xf32>
    %32 = arith.subf %30, %31 : vector<16x32xf32>
    %33 = arith.select %27, %25, %32 : vector<16x32xi1>, vector<16x32xf32>
    %cst_18 = arith.constant -1.000000e+30 : f32
    %34 = vector.broadcast %cst_18 : f32 to vector<1x32xf32>
    %35 = vector.extract_strided_slice %33 {offsets = [0, 0], sizes = [15, 32], strides = [1, 1]} : vector<16x32xf32> to vector<15x32xf32>
    %36 = tpu.concatenate %34, %35 in 0 : vector<1x32xf32>, vector<15x32xf32> -> vector<16x32xf32>
    %37 = vector.extract_strided_slice %33 {offsets = [1, 0], sizes = [15, 32], strides = [1, 1]} : vector<16x32xf32> to vector<15x32xf32>
    %38 = tpu.concatenate %37, %34 in 0 : vector<15x32xf32>, vector<1x32xf32> -> vector<16x32xf32>
    %39 = arith.maximumf %36, %33 : vector<16x32xf32>
    %40 = arith.maximumf %39, %38 : vector<16x32xf32>
    %41 = tpu.iota {dimensions = array<i32: 0>} : vector<8x16xi32>
    %42 = tpu.iota {dimensions = array<i32: 1>} : vector<8x16xi32>
    %c2_i32 = arith.constant 2 : i32
    %43 = vector.broadcast %c2_i32 : i32 to vector<8x16xi32>
    %44 = arith.muli %43, %41 : vector<8x16xi32>
    %45 = arith.cmpi eq, %42, %44 : vector<8x16xi32>
    %46 = arith.extui %45 : vector<8x16xi1> to vector<8x16xi32>
    %47 = arith.sitofp %46 : vector<8x16xi32> to vector<8x16xf32>
    %cst_19 = arith.constant dense<0.000000e+00> : vector<8x32xf32>
    %48 = tpu.matmul %47, %40, %cst_19 {dimension_numbers = #tpu.dot_dimension_numbers<[1], [0], [0], [1], [0, 0, 1, 1], [], []>} : vector<8x16xf32>, vector<16x32xf32>, vector<8x32xf32> -> vector<8x32xf32>
    %c0_20 = arith.constant 0 : index
    %c0_21 = arith.constant 0 : index
    %c0_22 = arith.constant 0 : index
    %49 = vector.load %arg5[%c0_20, %c0_21, %c0_22] : memref<1x8x32xf32, #tpu.memory_space<vmem>>, vector<1x8x32xf32>
    %50 = vector.shape_cast %49 : vector<1x8x32xf32> to vector<8x32xf32>
    %51 = vector.shape_cast %48 : vector<8x32xf32> to vector<1x8x32xf32>
    tpu.vector_store %arg5[%c0_20, %c0_21, %c0_22], %51 {strides = array<i32>} : memref<1x8x32xf32, #tpu.memory_space<vmem>>, vector<1x8x32xf32>,
    return
  }
  func.func @transform_0(%arg0: i32) -> (i32, i32, i32) {
    %c0_i32 = arith.constant 0 : i32
    %c0_i32_0 = arith.constant 0 : i32
    %c0_i32_1 = arith.constant 0 : i32
    return %arg0, %c0_i32, %c0_i32_0 : i32, i32, i32
  }
  func.func @transform_1(%arg0: i32) -> (i32, i32, i32) {
    %c0_i32 = arith.constant 0 : i32
    %c0_i32_0 = arith.constant 0 : i32
    %c0_i32_1 = arith.constant 0 : i32
    %c0_i32_2 = arith.constant 0 : i32
    return %c0_i32, %c0_i32_0, %c0_i32_1 : i32, i32, i32
  }
  func.func @transform_2(%arg0: i32) -> (i32, i32) {
    %c0_i32 = arith.constant 0 : i32
    %c0_i32_0 = arith.constant 0 : i32
    %c0_i32_1 = arith.constant 0 : i32
    return %c0_i32, %c0_i32_0 : i32, i32
  }
  func.func @transform_3(%arg0: i32) -> (i32, i32) {
    %c0_i32 = arith.constant 0 : i32
    %c0_i32_0 = arith.constant 0 : i32
    %c0_i32_1 = arith.constant 0 : i32
    return %c0_i32, %c0_i32_0 : i32, i32
  }
  func.func @transform_4(%arg0: i32) -> (i32, i32, i32) {
    %c0_i32 = arith.constant 0 : i32
    %c0_i32_0 = arith.constant 0 : i32
    %c0_i32_1 = arith.constant 0 : i32
    return %arg0, %c0_i32, %c0_i32_0 : i32, i32, i32
  }
}

module attributes {stable_mosaic.version = 11 : i64} {
  func.func @_attn_kernel(%arg0: i32, %arg1: i32, %arg2: memref<1x8x96xbf16, #tpu.memory_space<vmem>>, %arg3: memref<1x8x96xbf16, #tpu.memory_space<vmem>>, %arg4: memref<1x8x32xbf16, #tpu.memory_space<vmem>>) attributes {dimension_semantics = [#tpu.dimension_semantics<parallel>, #tpu.dimension_semantics<parallel>], iteration_bounds = array<i64: 2, 1>, scalar_prefetch = 0 : i64, scratch_operands = 0 : i64, tpu.core_type = #tpu.core_type<tc>, window_params = [{transform_indices = @transform_0, window_bounds = array<i64: 1, 8, 96>}, {transform_indices = @transform_1, window_bounds = array<i64: 1, 8, 96>}, {transform_indices = @transform_2, window_bounds = array<i64: 1, 8, 32>}]} {
    %c0 = arith.constant 0 : index
    %c0_0 = arith.constant 0 : index
    %c0_1 = arith.constant 0 : index
    %0 = vector.load %arg2[%c0, %c0_0, %c0_1] : memref<1x8x96xbf16, #tpu.memory_space<vmem>>, vector<1x8x96xbf16>
    %1 = vector.shape_cast %0 : vector<1x8x96xbf16> to vector<8x96xbf16>
    %2 = vector.extract_strided_slice %1 {offsets = [0, 0], sizes = [8, 32], strides = [1, 1]} : vector<8x96xbf16> to vector<8x32xbf16>
    %c0_2 = arith.constant 0 : index
    %c0_3 = arith.constant 0 : index
    %c0_4 = arith.constant 0 : index
    %3 = vector.load %arg3[%c0_2, %c0_3, %c0_4] : memref<1x8x96xbf16, #tpu.memory_space<vmem>>, vector<1x8x96xbf16>
    %4 = vector.shape_cast %3 : vector<1x8x96xbf16> to vector<8x96xbf16>
    %5 = vector.extract_strided_slice %4 {offsets = [0, 32], sizes = [8, 32], strides = [1, 1]} : vector<8x96xbf16> to vector<8x32xbf16>
    %6 = vector.extract_strided_slice %4 {offsets = [0, 64], sizes = [8, 32], strides = [1, 1]} : vector<8x96xbf16> to vector<8x32xbf16>
    %7 = vector.extract_strided_slice %2 {offsets = [0, 0], sizes = [8, 8], strides = [1, 1]} : vector<8x32xbf16> to vector<8x8xbf16>
    %8 = vector.extract_strided_slice %5 {offsets = [0, 0], sizes = [8, 8], strides = [1, 1]} : vector<8x32xbf16> to vector<8x8xbf16>
    %9 = vector.extract_strided_slice %6 {offsets = [0, 0], sizes = [8, 8], strides = [1, 1]} : vector<8x32xbf16> to vector<8x8xbf16>
    %cst = arith.constant dense<0.000000e+00> : vector<8x8xf32>
    %10 = tpu.matmul %7, %8, %cst {dimension_numbers = #tpu.dot_dimension_numbers<[1], [1], [0], [0], [0, 0, 1, 0], [], []>} : vector<8x8xbf16>, vector<8x8xbf16>, vector<8x8xf32> -> vector<8x8xf32>
    %cst_5 = arith.constant 0.353553385 : f32
    %11 = vector.broadcast %cst_5 : f32 to vector<8x8xf32>
    %12 = arith.mulf %10, %11 : vector<8x8xf32>
    %cst_6 = arith.constant dense<0xFF800000> : vector<8xf32>
    %13 = vector.multi_reduction <maximumf>, %12, %cst_6 [1] : vector<8x8xf32> to vector<8xf32>
    %14 = vector.shape_cast %13 : vector<8xf32> to vector<8x1xf32>
    %15 = vector.broadcast %14 : vector<8x1xf32> to vector<8x8xf32>
    %16 = arith.subf %12, %15 : vector<8x8xf32>
    %17 = math.exp %16 : vector<8x8xf32>
    %cst_7 = arith.constant dense<0.000000e+00> : vector<8xf32>
    %18 = vector.multi_reduction <add>, %17, %cst_7 [1] : vector<8x8xf32> to vector<8xf32>
    %19 = vector.shape_cast %18 : vector<8xf32> to vector<8x1xf32>
    %20 = tpu.reciprocal %19 {approx = true} : vector<8x1xf32> -> vector<8x1xf32>
    %21 = vector.broadcast %20 : vector<8x1xf32> to vector<8x8xf32>
    %22 = arith.mulf %17, %21 : vector<8x8xf32>
    %23 = arith.truncf %22 : vector<8x8xf32> to vector<8x8xbf16>
    %cst_8 = arith.constant dense<0.000000e+00> : vector<8x8xf32>
    %24 = tpu.matmul %23, %9, %cst_8 {dimension_numbers = #tpu.dot_dimension_numbers<[1], [0], [0], [1], [0, 0, 1, 1], [], []>} : vector<8x8xbf16>, vector<8x8xbf16>, vector<8x8xf32> -> vector<8x8xf32>
    %25 = vector.extract_strided_slice %2 {offsets = [0, 8], sizes = [8, 8], strides = [1, 1]} : vector<8x32xbf16> to vector<8x8xbf16>
    %26 = vector.extract_strided_slice %5 {offsets = [0, 8], sizes = [8, 8], strides = [1, 1]} : vector<8x32xbf16> to vector<8x8xbf16>
    %27 = vector.extract_strided_slice %6 {offsets = [0, 8], sizes = [8, 8], strides = [1, 1]} : vector<8x32xbf16> to vector<8x8xbf16>
    %cst_9 = arith.constant dense<0.000000e+00> : vector<8x8xf32>
    %28 = tpu.matmul %25, %26, %cst_9 {dimension_numbers = #tpu.dot_dimension_numbers<[1], [1], [0], [0], [0, 0, 1, 0], [], []>} : vector<8x8xbf16>, vector<8x8xbf16>, vector<8x8xf32> -> vector<8x8xf32>
    %cst_10 = arith.constant 0.353553385 : f32
    %29 = vector.broadcast %cst_10 : f32 to vector<8x8xf32>
    %30 = arith.mulf %28, %29 : vector<8x8xf32>
    %cst_11 = arith.constant dense<0xFF800000> : vector<8xf32>
    %31 = vector.multi_reduction <maximumf>, %30, %cst_11 [1] : vector<8x8xf32> to vector<8xf32>
    %32 = vector.shape_cast %31 : vector<8xf32> to vector<8x1xf32>
    %33 = vector.broadcast %32 : vector<8x1xf32> to vector<8x8xf32>
    %34 = arith.subf %30, %33 : vector<8x8xf32>
    %35 = math.exp %34 : vector<8x8xf32>
    %cst_12 = arith.constant dense<0.000000e+00> : vector<8xf32>
    %36 = vector.multi_reduction <add>, %35, %cst_12 [1] : vector<8x8xf32> to vector<8xf32>
    %37 = vector.shape_cast %36 : vector<8xf32> to vector<8x1xf32>
    %38 = tpu.reciprocal %37 {approx = true} : vector<8x1xf32> -> vector<8x1xf32>
    %39 = vector.broadcast %38 : vector<8x1xf32> to vector<8x8xf32>
    %40 = arith.mulf %35, %39 : vector<8x8xf32>
    %41 = arith.truncf %40 : vector<8x8xf32> to vector<8x8xbf16>
    %cst_13 = arith.constant dense<0.000000e+00> : vector<8x8xf32>
    %42 = tpu.matmul %41, %27, %cst_13 {dimension_numbers = #tpu.dot_dimension_numbers<[1], [0], [0], [1], [0, 0, 1, 1], [], []>} : vector<8x8xbf16>, vector<8x8xbf16>, vector<8x8xf32> -> vector<8x8xf32>
    %43 = vector.extract_strided_slice %2 {offsets = [0, 16], sizes = [8, 8], strides = [1, 1]} : vector<8x32xbf16> to vector<8x8xbf16>
    %44 = vector.extract_strided_slice %5 {offsets = [0, 16], sizes = [8, 8], strides = [1, 1]} : vector<8x32xbf16> to vector<8x8xbf16>
    %45 = vector.extract_strided_slice %6 {offsets = [0, 16], sizes = [8, 8], strides = [1, 1]} : vector<8x32xbf16> to vector<8x8xbf16>
    %cst_14 = arith.constant dense<0.000000e+00> : vector<8x8xf32>
    %46 = tpu.matmul %43, %44, %cst_14 {dimension_numbers = #tpu.dot_dimension_numbers<[1], [1], [0], [0], [0, 0, 1, 0], [], []>} : vector<8x8xbf16>, vector<8x8xbf16>, vector<8x8xf32> -> vector<8x8xf32>
    %cst_15 = arith.constant 0.353553385 : f32
    %47 = vector.broadcast %cst_15 : f32 to vector<8x8xf32>
    %48 = arith.mulf %46, %47 : vector<8x8xf32>
    %cst_16 = arith.constant dense<0xFF800000> : vector<8xf32>
    %49 = vector.multi_reduction <maximumf>, %48, %cst_16 [1] : vector<8x8xf32> to vector<8xf32>
    %50 = vector.shape_cast %49 : vector<8xf32> to vector<8x1xf32>
    %51 = vector.broadcast %50 : vector<8x1xf32> to vector<8x8xf32>
    %52 = arith.subf %48, %51 : vector<8x8xf32>
    %53 = math.exp %52 : vector<8x8xf32>
    %cst_17 = arith.constant dense<0.000000e+00> : vector<8xf32>
    %54 = vector.multi_reduction <add>, %53, %cst_17 [1] : vector<8x8xf32> to vector<8xf32>
    %55 = vector.shape_cast %54 : vector<8xf32> to vector<8x1xf32>
    %56 = tpu.reciprocal %55 {approx = true} : vector<8x1xf32> -> vector<8x1xf32>
    %57 = vector.broadcast %56 : vector<8x1xf32> to vector<8x8xf32>
    %58 = arith.mulf %53, %57 : vector<8x8xf32>
    %59 = arith.truncf %58 : vector<8x8xf32> to vector<8x8xbf16>
    %cst_18 = arith.constant dense<0.000000e+00> : vector<8x8xf32>
    %60 = tpu.matmul %59, %45, %cst_18 {dimension_numbers = #tpu.dot_dimension_numbers<[1], [0], [0], [1], [0, 0, 1, 1], [], []>} : vector<8x8xbf16>, vector<8x8xbf16>, vector<8x8xf32> -> vector<8x8xf32>
    %61 = vector.extract_strided_slice %2 {offsets = [0, 24], sizes = [8, 8], strides = [1, 1]} : vector<8x32xbf16> to vector<8x8xbf16>
    %62 = vector.extract_strided_slice %5 {offsets = [0, 24], sizes = [8, 8], strides = [1, 1]} : vector<8x32xbf16> to vector<8x8xbf16>
    %63 = vector.extract_strided_slice %6 {offsets = [0, 24], sizes = [8, 8], strides = [1, 1]} : vector<8x32xbf16> to vector<8x8xbf16>
    %cst_19 = arith.constant dense<0.000000e+00> : vector<8x8xf32>
    %64 = tpu.matmul %61, %62, %cst_19 {dimension_numbers = #tpu.dot_dimension_numbers<[1], [1], [0], [0], [0, 0, 1, 0], [], []>} : vector<8x8xbf16>, vector<8x8xbf16>, vector<8x8xf32> -> vector<8x8xf32>
    %cst_20 = arith.constant 0.353553385 : f32
    %65 = vector.broadcast %cst_20 : f32 to vector<8x8xf32>
    %66 = arith.mulf %64, %65 : vector<8x8xf32>
    %cst_21 = arith.constant dense<0xFF800000> : vector<8xf32>
    %67 = vector.multi_reduction <maximumf>, %66, %cst_21 [1] : vector<8x8xf32> to vector<8xf32>
    %68 = vector.shape_cast %67 : vector<8xf32> to vector<8x1xf32>
    %69 = vector.broadcast %68 : vector<8x1xf32> to vector<8x8xf32>
    %70 = arith.subf %66, %69 : vector<8x8xf32>
    %71 = math.exp %70 : vector<8x8xf32>
    %cst_22 = arith.constant dense<0.000000e+00> : vector<8xf32>
    %72 = vector.multi_reduction <add>, %71, %cst_22 [1] : vector<8x8xf32> to vector<8xf32>
    %73 = vector.shape_cast %72 : vector<8xf32> to vector<8x1xf32>
    %74 = tpu.reciprocal %73 {approx = true} : vector<8x1xf32> -> vector<8x1xf32>
    %75 = vector.broadcast %74 : vector<8x1xf32> to vector<8x8xf32>
    %76 = arith.mulf %71, %75 : vector<8x8xf32>
    %77 = arith.truncf %76 : vector<8x8xf32> to vector<8x8xbf16>
    %cst_23 = arith.constant dense<0.000000e+00> : vector<8x8xf32>
    %78 = tpu.matmul %77, %63, %cst_23 {dimension_numbers = #tpu.dot_dimension_numbers<[1], [0], [0], [1], [0, 0, 1, 1], [], []>} : vector<8x8xbf16>, vector<8x8xbf16>, vector<8x8xf32> -> vector<8x8xf32>
    %79 = tpu.concatenate %24, %42, %60, %78 in 1 : vector<8x8xf32>, vector<8x8xf32>, vector<8x8xf32>, vector<8x8xf32> -> vector<8x32xf32>
    %80 = arith.truncf %79 : vector<8x32xf32> to vector<8x32xbf16>
    %c0_24 = arith.constant 0 : index
    %c0_25 = arith.constant 0 : index
    %c0_26 = arith.constant 0 : index
    %81 = vector.load %arg4[%c0_24, %c0_25, %c0_26] : memref<1x8x32xbf16, #tpu.memory_space<vmem>>, vector<1x8x32xbf16>
    %82 = vector.shape_cast %81 : vector<1x8x32xbf16> to vector<8x32xbf16>
    %83 = vector.shape_cast %80 : vector<8x32xbf16> to vector<1x8x32xbf16>
    tpu.vector_store %arg4[%c0_24, %c0_25, %c0_26], %83 {strides = array<i32>} : memref<1x8x32xbf16, #tpu.memory_space<vmem>>, vector<1x8x32xbf16>,
    return
  }
  func.func @transform_0(%arg0: i32, %arg1: i32) -> (i32, i32, i32) {
    %c0_i32 = arith.constant 0 : i32
    %c0_i32_0 = arith.constant 0 : i32
    return %arg0, %arg1, %c0_i32 : i32, i32, i32
  }
  func.func @transform_1(%arg0: i32, %arg1: i32) -> (i32, i32, i32) {
    %c0_i32 = arith.constant 0 : i32
    %c0_i32_0 = arith.constant 0 : i32
    %c0_i32_1 = arith.constant 0 : i32
    return %arg0, %c0_i32, %c0_i32_0 : i32, i32, i32
  }
  func.func @transform_2(%arg0: i32, %arg1: i32) -> (i32, i32, i32) {
    %c0_i32 = arith.constant 0 : i32
    %c0_i32_0 = arith.constant 0 : i32
    return %arg0, %arg1, %c0_i32 : i32, i32, i32
  }
}

module attributes {stable_mosaic.version = 11 : i64} {
  func.func @_conv1d_kernel(%arg0: i32, %arg1: memref<1x8x32xf32, #tpu.memory_space<vmem>>, %arg2: memref<5x32x96xbf16, #tpu.memory_space<vmem>>, %arg3: memref<1x96xf32, #tpu.memory_space<vmem>>, %arg4: memref<1x96xf32, #tpu.memory_space<vmem>>, %arg5: memref<1x8x96xbf16, #tpu.memory_space<vmem>>) attributes {dimension_semantics = [#tpu.dimension_semantics<parallel>], iteration_bounds = array<i64: 2>, scalar_prefetch = 0 : i64, scratch_operands = 0 : i64, tpu.core_type = #tpu.core_type<tc>, window_params = [{transform_indices = @transform_0, window_bounds = array<i64: 1, 8, 32>}, {pipeline_mode = #tpu.pipeline_mode<synchronous>, transform_indices = @transform_1, window_bounds = array<i64: 5, 32, 96>}, {pipeline_mode = #tpu.pipeline_mode<synchronous>, transform_indices = @transform_2, window_bounds = array<i64: 1, 96>}, {pipeline_mode = #tpu.pipeline_mode<synchronous>, transform_indices = @transform_3, window_bounds = array<i64: 1, 96>}, {transform_indices = @transform_4, window_bounds = array<i64: 1, 8, 96>}]} {
    %c0 = arith.constant 0 : index
    %c0_0 = arith.constant 0 : index
    %c0_1 = arith.constant 0 : index
    %0 = vector.load %arg1[%c0, %c0_0, %c0_1] : memref<1x8x32xf32, #tpu.memory_space<vmem>>, vector<1x8x32xf32>
    %1 = vector.shape_cast %0 : vector<1x8x32xf32> to vector<8x32xf32>
    %2 = arith.truncf %1 : vector<8x32xf32> to vector<8x32xbf16>
    %3 = vector.extract_strided_slice %2 {offsets = [6, 0], sizes = [2, 32], strides = [1, 1]} : vector<8x32xbf16> to vector<2x32xbf16>
    %4 = vector.extract_strided_slice %2 {offsets = [0, 0], sizes = [2, 32], strides = [1, 1]} : vector<8x32xbf16> to vector<2x32xbf16>
    %5 = tpu.concatenate %3, %2, %4 in 0 : vector<2x32xbf16>, vector<8x32xbf16>, vector<2x32xbf16> -> vector<12x32xbf16>
    %6 = vector.extract_strided_slice %5 {offsets = [0, 0], sizes = [8, 32], strides = [1, 1]} : vector<12x32xbf16> to vector<8x32xbf16>
    %c0_2 = arith.constant 0 : index
    %c0_3 = arith.constant 0 : index
    %c0_4 = arith.constant 0 : index
    %7 = vector.load %arg2[%c0_2, %c0_3, %c0_4] : memref<5x32x96xbf16, #tpu.memory_space<vmem>>, vector<1x32x96xbf16>
    %8 = vector.shape_cast %7 : vector<1x32x96xbf16> to vector<32x96xbf16>
    %cst = arith.constant dense<0.000000e+00> : vector<8x96xf32>
    %9 = tpu.matmul %6, %8, %cst {dimension_numbers = #tpu.dot_dimension_numbers<[1], [0], [0], [1], [0, 0, 1, 1], [], []>} : vector<8x32xbf16>, vector<32x96xbf16>, vector<8x96xf32> -> vector<8x96xf32>
    %10 = vector.extract_strided_slice %5 {offsets = [1, 0], sizes = [8, 32], strides = [1, 1]} : vector<12x32xbf16> to vector<8x32xbf16>
    %c1 = arith.constant 1 : index
    %c0_5 = arith.constant 0 : index
    %c0_6 = arith.constant 0 : index
    %11 = vector.load %arg2[%c1, %c0_5, %c0_6] : memref<5x32x96xbf16, #tpu.memory_space<vmem>>, vector<1x32x96xbf16>
    %12 = vector.shape_cast %11 : vector<1x32x96xbf16> to vector<32x96xbf16>
    %cst_7 = arith.constant dense<0.000000e+00> : vector<8x96xf32>
    %13 = tpu.matmul %10, %12, %cst_7 {dimension_numbers = #tpu.dot_dimension_numbers<[1], [0], [0], [1], [0, 0, 1, 1], [], []>} : vector<8x32xbf16>, vector<32x96xbf16>, vector<8x96xf32> -> vector<8x96xf32>
    %14 = arith.addf %9, %13 : vector<8x96xf32>
    %15 = vector.extract_strided_slice %5 {offsets = [2, 0], sizes = [8, 32], strides = [1, 1]} : vector<12x32xbf16> to vector<8x32xbf16>
    %c2 = arith.constant 2 : index
    %c0_8 = arith.constant 0 : index
    %c0_9 = arith.constant 0 : index
    %16 = vector.load %arg2[%c2, %c0_8, %c0_9] : memref<5x32x96xbf16, #tpu.memory_space<vmem>>, vector<1x32x96xbf16>
    %17 = vector.shape_cast %16 : vector<1x32x96xbf16> to vector<32x96xbf16>
    %cst_10 = arith.constant dense<0.000000e+00> : vector<8x96xf32>
    %18 = tpu.matmul %15, %17, %cst_10 {dimension_numbers = #tpu.dot_dimension_numbers<[1], [0], [0], [1], [0, 0, 1, 1], [], []>} : vector<8x32xbf16>, vector<32x96xbf16>, vector<8x96xf32> -> vector<8x96xf32>
    %19 = arith.addf %14, %18 : vector<8x96xf32>
    %20 = vector.extract_strided_slice %5 {offsets = [3, 0], sizes = [8, 32], strides = [1, 1]} : vector<12x32xbf16> to vector<8x32xbf16>
    %c3 = arith.constant 3 : index
    %c0_11 = arith.constant 0 : index
    %c0_12 = arith.constant 0 : index
    %21 = vector.load %arg2[%c3, %c0_11, %c0_12] : memref<5x32x96xbf16, #tpu.memory_space<vmem>>, vector<1x32x96xbf16>
    %22 = vector.shape_cast %21 : vector<1x32x96xbf16> to vector<32x96xbf16>
    %cst_13 = arith.constant dense<0.000000e+00> : vector<8x96xf32>
    %23 = tpu.matmul %20, %22, %cst_13 {dimension_numbers = #tpu.dot_dimension_numbers<[1], [0], [0], [1], [0, 0, 1, 1], [], []>} : vector<8x32xbf16>, vector<32x96xbf16>, vector<8x96xf32> -> vector<8x96xf32>
    %24 = arith.addf %19, %23 : vector<8x96xf32>
    %25 = vector.extract_strided_slice %5 {offsets = [4, 0], sizes = [8, 32], strides = [1, 1]} : vector<12x32xbf16> to vector<8x32xbf16>
    %c4 = arith.constant 4 : index
    %c0_14 = arith.constant 0 : index
    %c0_15 = arith.constant 0 : index
    %26 = vector.load %arg2[%c4, %c0_14, %c0_15] : memref<5x32x96xbf16, #tpu.memory_space<vmem>>, vector<1x32x96xbf16>
    %27 = vector.shape_cast %26 : vector<1x32x96xbf16> to vector<32x96xbf16>
    %cst_16 = arith.constant dense<0.000000e+00> : vector<8x96xf32>
    %28 = tpu.matmul %25, %27, %cst_16 {dimension_numbers = #tpu.dot_dimension_numbers<[1], [0], [0], [1], [0, 0, 1, 1], [], []>} : vector<8x32xbf16>, vector<32x96xbf16>, vector<8x96xf32> -> vector<8x96xf32>
    %29 = arith.addf %24, %28 : vector<8x96xf32>
    %c0_17 = arith.constant 0 : index
    %c0_18 = arith.constant 0 : index
    %30 = vector.load %arg3[%c0_17, %c0_18] : memref<1x96xf32, #tpu.memory_space<vmem>>, vector<1x96xf32>
    %31 = vector.broadcast %30 : vector<1x96xf32> to vector<8x96xf32>
    %32 = arith.mulf %29, %31 : vector<8x96xf32>
    %c0_19 = arith.constant 0 : index
    %c0_20 = arith.constant 0 : index
    %33 = vector.load %arg4[%c0_19, %c0_20] : memref<1x96xf32, #tpu.memory_space<vmem>>, vector<1x96xf32>
    %34 = vector.broadcast %33 : vector<1x96xf32> to vector<8x96xf32>
    %35 = arith.addf %32, %34 : vector<8x96xf32>
    %36 = arith.truncf %35 : vector<8x96xf32> to vector<8x96xbf16>
    %c0_21 = arith.constant 0 : index
    %c0_22 = arith.constant 0 : index
    %c0_23 = arith.constant 0 : index
    %37 = vector.load %arg5[%c0_21, %c0_22, %c0_23] : memref<1x8x96xbf16, #tpu.memory_space<vmem>>, vector<1x8x96xbf16>
    %38 = vector.shape_cast %37 : vector<1x8x96xbf16> to vector<8x96xbf16>
    %39 = vector.shape_cast %36 : vector<8x96xbf16> to vector<1x8x96xbf16>
    tpu.vector_store %arg5[%c0_21, %c0_22, %c0_23], %39 {strides = array<i32>} : memref<1x8x96xbf16, #tpu.memory_space<vmem>>, vector<1x8x96xbf16>,
    return
  }
  func.func @transform_0(%arg0: i32) -> (i32, i32, i32) {
    %c0_i32 = arith.constant 0 : i32
    %c0_i32_0 = arith.constant 0 : i32
    %c0_i32_1 = arith.constant 0 : i32
    return %arg0, %c0_i32, %c0_i32_0 : i32, i32, i32
  }
  func.func @transform_1(%arg0: i32) -> (i32, i32, i32) {
    %c0_i32 = arith.constant 0 : i32
    %c0_i32_0 = arith.constant 0 : i32
    %c0_i32_1 = arith.constant 0 : i32
    %c0_i32_2 = arith.constant 0 : i32
    return %c0_i32, %c0_i32_0, %c0_i32_1 : i32, i32, i32
  }
  func.func @transform_2(%arg0: i32) -> (i32, i32) {
    %c0_i32 = arith.constant 0 : i32
    %c0_i32_0 = arith.constant 0 : i32
    %c0_i32_1 = arith.constant 0 : i32
    return %c0_i32, %c0_i32_0 : i32, i32
  }
  func.func @transform_3(%arg0: i32) -> (i32, i32) {
    %c0_i32 = arith.constant 0 : i32
    %c0_i32_0 = arith.constant 0 : i32
    %c0_i32_1 = arith.constant 0 : i32
    return %c0_i32, %c0_i32_0 : i32, i32
  }
  func.func @transform_4(%arg0: i32) -> (i32, i32, i32) {
    %c0_i32 = arith.constant 0 : i32
    %c0_i32_0 = arith.constant 0 : i32
    %c0_i32_1 = arith.constant 0 : i32
    return %arg0, %c0_i32, %c0_i32_0 : i32, i32, i32
  }
}

module attributes {stable_mosaic.version = 11 : i64} {
  func.func @_matmul_bias_kernel(%arg0: i32, %arg1: memref<16x32xbf16, #tpu.memory_space<vmem>>, %arg2: memref<32x32xbf16, #tpu.memory_space<vmem>>, %arg3: memref<1x32xf32, #tpu.memory_space<vmem>>, %arg4: memref<16x32xbf16, #tpu.memory_space<vmem>>) attributes {dimension_semantics = [#tpu.dimension_semantics<parallel>], iteration_bounds = array<i64: 1>, scalar_prefetch = 0 : i64, scratch_operands = 0 : i64, tpu.core_type = #tpu.core_type<tc>, window_params = [{transform_indices = @transform_0, window_bounds = array<i64: 16, 32>}, {pipeline_mode = #tpu.pipeline_mode<synchronous>, transform_indices = @transform_1, window_bounds = array<i64: 32, 32>}, {pipeline_mode = #tpu.pipeline_mode<synchronous>, transform_indices = @transform_2, window_bounds = array<i64: 1, 32>}, {transform_indices = @transform_3, window_bounds = array<i64: 16, 32>}]} {
    %c0 = arith.constant 0 : index
    %c0_0 = arith.constant 0 : index
    %0 = vector.load %arg1[%c0, %c0_0] : memref<16x32xbf16, #tpu.memory_space<vmem>>, vector<16x32xbf16>
    %c0_1 = arith.constant 0 : index
    %c0_2 = arith.constant 0 : index
    %1 = vector.load %arg2[%c0_1, %c0_2] : memref<32x32xbf16, #tpu.memory_space<vmem>>, vector<32x32xbf16>
    %cst = arith.constant dense<0.000000e+00> : vector<16x32xf32>
    %2 = tpu.matmul %0, %1, %cst {dimension_numbers = #tpu.dot_dimension_numbers<[1], [0], [0], [1], [0, 0, 1, 1], [], []>} : vector<16x32xbf16>, vector<32x32xbf16>, vector<16x32xf32> -> vector<16x32xf32>
    %c0_3 = arith.constant 0 : index
    %c0_4 = arith.constant 0 : index
    %3 = vector.load %arg3[%c0_3, %c0_4] : memref<1x32xf32, #tpu.memory_space<vmem>>, vector<1x32xf32>
    %4 = vector.broadcast %3 : vector<1x32xf32> to vector<16x32xf32>
    %5 = arith.addf %2, %4 : vector<16x32xf32>
    %6 = arith.truncf %5 : vector<16x32xf32> to vector<16x32xbf16>
    %c0_5 = arith.constant 0 : index
    %c0_6 = arith.constant 0 : index
    %7 = vector.load %arg4[%c0_5, %c0_6] : memref<16x32xbf16, #tpu.memory_space<vmem>>, vector<16x32xbf16>
    tpu.vector_store %arg4[%c0_5, %c0_6], %6 {strides = array<i32>} : memref<16x32xbf16, #tpu.memory_space<vmem>>, vector<16x32xbf16>,
    return
  }
  func.func @transform_0(%arg0: i32) -> (i32, i32) {
    %c0_i32 = arith.constant 0 : i32
    %c0_i32_0 = arith.constant 0 : i32
    return %arg0, %c0_i32 : i32, i32
  }
  func.func @transform_1(%arg0: i32) -> (i32, i32) {
    %c0_i32 = arith.constant 0 : i32
    %c0_i32_0 = arith.constant 0 : i32
    %c0_i32_1 = arith.constant 0 : i32
    return %c0_i32, %c0_i32_0 : i32, i32
  }
  func.func @transform_2(%arg0: i32) -> (i32, i32) {
    %c0_i32 = arith.constant 0 : i32
    %c0_i32_0 = arith.constant 0 : i32
    %c0_i32_1 = arith.constant 0 : i32
    return %c0_i32, %c0_i32_0 : i32, i32
  }
  func.func @transform_3(%arg0: i32) -> (i32, i32) {
    %c0_i32 = arith.constant 0 : i32
    %c0_i32_0 = arith.constant 0 : i32
    return %arg0, %c0_i32 : i32, i32
  }
}

module attributes {stable_mosaic.version = 11 : i64} {
  func.func @_matmul_bias_kernel(%arg0: i32, %arg1: memref<16x32xf32, #tpu.memory_space<vmem>>, %arg2: memref<32x32xbf16, #tpu.memory_space<vmem>>, %arg3: memref<1x32xf32, #tpu.memory_space<vmem>>, %arg4: memref<16x32xbf16, #tpu.memory_space<vmem>>) attributes {dimension_semantics = [#tpu.dimension_semantics<parallel>], iteration_bounds = array<i64: 1>, scalar_prefetch = 0 : i64, scratch_operands = 0 : i64, tpu.core_type = #tpu.core_type<tc>, window_params = [{transform_indices = @transform_0, window_bounds = array<i64: 16, 32>}, {pipeline_mode = #tpu.pipeline_mode<synchronous>, transform_indices = @transform_1, window_bounds = array<i64: 32, 32>}, {pipeline_mode = #tpu.pipeline_mode<synchronous>, transform_indices = @transform_2, window_bounds = array<i64: 1, 32>}, {transform_indices = @transform_3, window_bounds = array<i64: 16, 32>}]} {
    %c0 = arith.constant 0 : index
    %c0_0 = arith.constant 0 : index
    %0 = vector.load %arg1[%c0, %c0_0] : memref<16x32xf32, #tpu.memory_space<vmem>>, vector<16x32xf32>
    %1 = arith.truncf %0 : vector<16x32xf32> to vector<16x32xbf16>
    %c0_1 = arith.constant 0 : index
    %c0_2 = arith.constant 0 : index
    %2 = vector.load %arg2[%c0_1, %c0_2] : memref<32x32xbf16, #tpu.memory_space<vmem>>, vector<32x32xbf16>
    %cst = arith.constant dense<0.000000e+00> : vector<16x32xf32>
    %3 = tpu.matmul %1, %2, %cst {dimension_numbers = #tpu.dot_dimension_numbers<[1], [0], [0], [1], [0, 0, 1, 1], [], []>} : vector<16x32xbf16>, vector<32x32xbf16>, vector<16x32xf32> -> vector<16x32xf32>
    %c0_3 = arith.constant 0 : index
    %c0_4 = arith.constant 0 : index
    %4 = vector.load %arg3[%c0_3, %c0_4] : memref<1x32xf32, #tpu.memory_space<vmem>>, vector<1x32xf32>
    %5 = vector.broadcast %4 : vector<1x32xf32> to vector<16x32xf32>
    %6 = arith.addf %3, %5 : vector<16x32xf32>
    %cst_5 = arith.constant 5.000000e-01 : f32
    %7 = vector.broadcast %cst_5 : f32 to vector<16x32xf32>
    %8 = arith.mulf %7, %6 : vector<16x32xf32>
    %cst_6 = arith.constant 4.471500e-02 : f32
    %9 = vector.broadcast %cst_6 : f32 to vector<16x32xf32>
    %10 = arith.mulf %9, %6 : vector<16x32xf32>
    %11 = arith.mulf %10, %6 : vector<16x32xf32>
    %12 = arith.mulf %11, %6 : vector<16x32xf32>
    %13 = arith.addf %6, %12 : vector<16x32xf32>
    %cst_7 = arith.constant 0.797884583 : f32
    %14 = vector.broadcast %cst_7 : f32 to vector<16x32xf32>
    %15 = arith.mulf %14, %13 : vector<16x32xf32>
    %16 = math.tanh %15 : vector<16x32xf32>
    %cst_8 = arith.constant 1.000000e+00 : f32
    %17 = vector.broadcast %cst_8 : f32 to vector<16x32xf32>
    %18 = arith.addf %17, %16 : vector<16x32xf32>
    %19 = arith.mulf %8, %18 : vector<16x32xf32>
    %20 = arith.truncf %19 : vector<16x32xf32> to vector<16x32xbf16>
    %c0_9 = arith.constant 0 : index
    %c0_10 = arith.constant 0 : index
    %21 = vector.load %arg4[%c0_9, %c0_10] : memref<16x32xbf16, #tpu.memory_space<vmem>>, vector<16x32xbf16>
    tpu.vector_store %arg4[%c0_9, %c0_10], %20 {strides = array<i32>} : memref<16x32xbf16, #tpu.memory_space<vmem>>, vector<16x32xbf16>,
    return
  }
  func.func @transform_0(%arg0: i32) -> (i32, i32) {
    %c0_i32 = arith.constant 0 : i32
    %c0_i32_0 = arith.constant 0 : i32
    return %arg0, %c0_i32 : i32, i32
  }
  func.func @transform_1(%arg0: i32) -> (i32, i32) {
    %c0_i32 = arith.constant 0 : i32
    %c0_i32_0 = arith.constant 0 : i32
    %c0_i32_1 = arith.constant 0 : i32
    return %c0_i32, %c0_i32_0 : i32, i32
  }
  func.func @transform_2(%arg0: i32) -> (i32, i32) {
    %c0_i32 = arith.constant 0 : i32
    %c0_i32_0 = arith.constant 0 : i32
    %c0_i32_1 = arith.constant 0 : i32
    return %c0_i32, %c0_i32_0 : i32, i32
  }
  func.func @transform_3(%arg0: i32) -> (i32, i32) {
    %c0_i32 = arith.constant 0 : i32
    %c0_i32_0 = arith.constant 0 : i32
    return %arg0, %c0_i32 : i32, i32
  }
}

module attributes {stable_mosaic.version = 11 : i64} {
  func.func @_add_layernorm_kernel(%arg0: i32, %arg1: memref<16x32xf32, #tpu.memory_space<vmem>>, %arg2: memref<16x32xbf16, #tpu.memory_space<vmem>>, %arg3: memref<1x32xf32, #tpu.memory_space<vmem>>, %arg4: memref<1x32xf32, #tpu.memory_space<vmem>>, %arg5: memref<16x32xf32, #tpu.memory_space<vmem>>) attributes {dimension_semantics = [#tpu.dimension_semantics<parallel>], iteration_bounds = array<i64: 1>, scalar_prefetch = 0 : i64, scratch_operands = 0 : i64, tpu.core_type = #tpu.core_type<tc>, window_params = [{transform_indices = @transform_0, window_bounds = array<i64: 16, 32>}, {transform_indices = @transform_1, window_bounds = array<i64: 16, 32>}, {pipeline_mode = #tpu.pipeline_mode<synchronous>, transform_indices = @transform_2, window_bounds = array<i64: 1, 32>}, {pipeline_mode = #tpu.pipeline_mode<synchronous>, transform_indices = @transform_3, window_bounds = array<i64: 1, 32>}, {transform_indices = @transform_4, window_bounds = array<i64: 16, 32>}]} {
    %c0 = arith.constant 0 : index
    %c0_0 = arith.constant 0 : index
    %0 = vector.load %arg1[%c0, %c0_0] : memref<16x32xf32, #tpu.memory_space<vmem>>, vector<16x32xf32>
    %c0_1 = arith.constant 0 : index
    %c0_2 = arith.constant 0 : index
    %1 = vector.load %arg2[%c0_1, %c0_2] : memref<16x32xbf16, #tpu.memory_space<vmem>>, vector<16x32xbf16>
    %2 = arith.extf %1 : vector<16x32xbf16> to vector<16x32xf32>
    %3 = arith.addf %0, %2 : vector<16x32xf32>
    %cst = arith.constant dense<0.000000e+00> : vector<16xf32>
    %4 = vector.multi_reduction <add>, %3, %cst [1] : vector<16x32xf32> to vector<16xf32>
    %5 = vector.shape_cast %4 : vector<16xf32> to vector<16x1xf32>
    %cst_3 = arith.constant 3.200000e+01 : f32
    %6 = vector.broadcast %cst_3 : f32 to vector<16x1xf32>
    %7 = arith.divf %5, %6 : vector<16x1xf32>
    %8 = vector.broadcast %7 : vector<16x1xf32> to vector<16x32xf32>
    %9 = arith.subf %3, %8 : vector<16x32xf32>
    %10 = arith.mulf %9, %9 : vector<16x32xf32>
    %cst_4 = arith.constant dense<0.000000e+00> : vector<16xf32>
    %11 = vector.multi_reduction <add>, %10, %cst_4 [1] : vector<16x32xf32> to vector<16xf32>
    %12 = vector.shape_cast %11 : vector<16xf32> to vector<16x1xf32>
    %cst_5 = arith.constant 3.200000e+01 : f32
    %13 = vector.broadcast %cst_5 : f32 to vector<16x1xf32>
    %14 = arith.divf %12, %13 : vector<16x1xf32>
    %cst_6 = arith.constant 9.99999974E-6 : f32
    %15 = vector.broadcast %cst_6 : f32 to vector<16x1xf32>
    %16 = arith.addf %14, %15 : vector<16x1xf32>
    %17 = math.rsqrt %16 : vector<16x1xf32>
    %18 = vector.broadcast %17 : vector<16x1xf32> to vector<16x32xf32>
    %19 = arith.mulf %9, %18 : vector<16x32xf32>
    %c0_7 = arith.constant 0 : index
    %c0_8 = arith.constant 0 : index
    %20 = vector.load %arg3[%c0_7, %c0_8] : memref<1x32xf32, #tpu.memory_space<vmem>>, vector<1x32xf32>
    %21 = vector.broadcast %20 : vector<1x32xf32> to vector<16x32xf32>
    %22 = arith.mulf %19, %21 : vector<16x32xf32>
    %c0_9 = arith.constant 0 : index
    %c0_10 = arith.constant 0 : index
    %23 = vector.load %arg4[%c0_9, %c0_10] : memref<1x32xf32, #tpu.memory_space<vmem>>, vector<1x32xf32>
    %24 = vector.broadcast %23 : vector<1x32xf32> to vector<16x32xf32>
    %25 = arith.addf %22, %24 : vector<16x32xf32>
    %c0_11 = arith.constant 0 : index
    %c0_12 = arith.constant 0 : index
    %26 = vector.load %arg5[%c0_11, %c0_12] : memref<16x32xf32, #tpu.memory_space<vmem>>, vector<16x32xf32>
    tpu.vector_store %arg5[%c0_11, %c0_12], %25 {strides = array<i32>} : memref<16x32xf32, #tpu.memory_space<vmem>>, vector<16x32xf32>,
    return
  }
  func.func @transform_0(%arg0: i32) -> (i32, i32) {
    %c0_i32 = arith.constant 0 : i32
    %c0_i32_0 = arith.constant 0 : i32
    return %arg0, %c0_i32 : i32, i32
  }
  func.func @transform_1(%arg0: i32) -> (i32, i32) {
    %c0_i32 = arith.constant 0 : i32
    %c0_i32_0 = arith.constant 0 : i32
    return %arg0, %c0_i32 : i32, i32
  }
  func.func @transform_2(%arg0: i32) -> (i32, i32) {
    %c0_i32 = arith.constant 0 : i32
    %c0_i32_0 = arith.constant 0 : i32
    %c0_i32_1 = arith.constant 0 : i32
    return %c0_i32, %c0_i32_0 : i32, i32
  }
  func.func @transform_3(%arg0: i32) -> (i32, i32) {
    %c0_i32 = arith.constant 0 : i32
    %c0_i32_0 = arith.constant 0 : i32
    %c0_i32_1 = arith.constant 0 : i32
    return %c0_i32, %c0_i32_0 : i32, i32
  }
  func.func @transform_4(%arg0: i32) -> (i32, i32) {
    %c0_i32 = arith.constant 0 : i32
    %c0_i32_0 = arith.constant 0 : i32
    return %arg0, %c0_i32 : i32, i32
  }
}

module attributes {stable_mosaic.version = 11 : i64} {
  func.func @_layernorm_kernel(%arg0: i32, %arg1: memref<16x32xf32, #tpu.memory_space<vmem>>, %arg2: memref<1x32xf32, #tpu.memory_space<vmem>>, %arg3: memref<1x32xf32, #tpu.memory_space<vmem>>, %arg4: memref<16x32xf32, #tpu.memory_space<vmem>>) attributes {dimension_semantics = [#tpu.dimension_semantics<parallel>], iteration_bounds = array<i64: 1>, scalar_prefetch = 0 : i64, scratch_operands = 0 : i64, tpu.core_type = #tpu.core_type<tc>, window_params = [{transform_indices = @transform_0, window_bounds = array<i64: 16, 32>}, {pipeline_mode = #tpu.pipeline_mode<synchronous>, transform_indices = @transform_1, window_bounds = array<i64: 1, 32>}, {pipeline_mode = #tpu.pipeline_mode<synchronous>, transform_indices = @transform_2, window_bounds = array<i64: 1, 32>}, {transform_indices = @transform_3, window_bounds = array<i64: 16, 32>}]} {
    %c0 = arith.constant 0 : index
    %c0_0 = arith.constant 0 : index
    %0 = vector.load %arg1[%c0, %c0_0] : memref<16x32xf32, #tpu.memory_space<vmem>>, vector<16x32xf32>
    %cst = arith.constant dense<0.000000e+00> : vector<16xf32>
    %1 = vector.multi_reduction <add>, %0, %cst [1] : vector<16x32xf32> to vector<16xf32>
    %2 = vector.shape_cast %1 : vector<16xf32> to vector<16x1xf32>
    %cst_1 = arith.constant 3.200000e+01 : f32
    %3 = vector.broadcast %cst_1 : f32 to vector<16x1xf32>
    %4 = arith.divf %2, %3 : vector<16x1xf32>
    %5 = vector.broadcast %4 : vector<16x1xf32> to vector<16x32xf32>
    %6 = arith.subf %0, %5 : vector<16x32xf32>
    %7 = arith.mulf %6, %6 : vector<16x32xf32>
    %cst_2 = arith.constant dense<0.000000e+00> : vector<16xf32>
    %8 = vector.multi_reduction <add>, %7, %cst_2 [1] : vector<16x32xf32> to vector<16xf32>
    %9 = vector.shape_cast %8 : vector<16xf32> to vector<16x1xf32>
    %cst_3 = arith.constant 3.200000e+01 : f32
    %10 = vector.broadcast %cst_3 : f32 to vector<16x1xf32>
    %11 = arith.divf %9, %10 : vector<16x1xf32>
    %cst_4 = arith.constant 9.99999974E-6 : f32
    %12 = vector.broadcast %cst_4 : f32 to vector<16x1xf32>
    %13 = arith.addf %11, %12 : vector<16x1xf32>
    %14 = math.rsqrt %13 : vector<16x1xf32>
    %15 = vector.broadcast %14 : vector<16x1xf32> to vector<16x32xf32>
    %16 = arith.mulf %6, %15 : vector<16x32xf32>
    %c0_5 = arith.constant 0 : index
    %c0_6 = arith.constant 0 : index
    %17 = vector.load %arg2[%c0_5, %c0_6] : memref<1x32xf32, #tpu.memory_space<vmem>>, vector<1x32xf32>
    %18 = vector.broadcast %17 : vector<1x32xf32> to vector<16x32xf32>
    %19 = arith.mulf %16, %18 : vector<16x32xf32>
    %c0_7 = arith.constant 0 : index
    %c0_8 = arith.constant 0 : index
    %20 = vector.load %arg3[%c0_7, %c0_8] : memref<1x32xf32, #tpu.memory_space<vmem>>, vector<1x32xf32>
    %21 = vector.broadcast %20 : vector<1x32xf32> to vector<16x32xf32>
    %22 = arith.addf %19, %21 : vector<16x32xf32>
    %c0_9 = arith.constant 0 : index
    %c0_10 = arith.constant 0 : index
    %23 = vector.load %arg4[%c0_9, %c0_10] : memref<16x32xf32, #tpu.memory_space<vmem>>, vector<16x32xf32>
    tpu.vector_store %arg4[%c0_9, %c0_10], %22 {strides = array<i32>} : memref<16x32xf32, #tpu.memory_space<vmem>>, vector<16x32xf32>,
    return
  }
  func.func @transform_0(%arg0: i32) -> (i32, i32) {
    %c0_i32 = arith.constant 0 : i32
    %c0_i32_0 = arith.constant 0 : i32
    return %arg0, %c0_i32 : i32, i32
  }
  func.func @transform_1(%arg0: i32) -> (i32, i32) {
    %c0_i32 = arith.constant 0 : i32
    %c0_i32_0 = arith.constant 0 : i32
    %c0_i32_1 = arith.constant 0 : i32
    return %c0_i32, %c0_i32_0 : i32, i32
  }
  func.func @transform_2(%arg0: i32) -> (i32, i32) {
    %c0_i32 = arith.constant 0 : i32
    %c0_i32_0 = arith.constant 0 : i32
    %c0_i32_1 = arith.constant 0 : i32
    return %c0_i32, %c0_i32_0 : i32, i32
  }
  func.func @transform_3(%arg0: i32) -> (i32, i32) {
    %c0_i32 = arith.constant 0 : i32
    %c0_i32_0 = arith.constant 0 : i32
    return %arg0, %c0_i32 : i32, i32
  }
}

module attributes {stable_mosaic.version = 11 : i64} {
  func.func @_conv1d_kernel(%arg0: i32, %arg1: memref<1x8x32xf32, #tpu.memory_space<vmem>>, %arg2: memref<5x32x64xbf16, #tpu.memory_space<vmem>>, %arg3: memref<1x64xf32, #tpu.memory_space<vmem>>, %arg4: memref<1x64xf32, #tpu.memory_space<vmem>>, %arg5: memref<1x8x64xbf16, #tpu.memory_space<vmem>>) attributes {dimension_semantics = [#tpu.dimension_semantics<parallel>], iteration_bounds = array<i64: 2>, scalar_prefetch = 0 : i64, scratch_operands = 0 : i64, tpu.core_type = #tpu.core_type<tc>, window_params = [{transform_indices = @transform_0, window_bounds = array<i64: 1, 8, 32>}, {pipeline_mode = #tpu.pipeline_mode<synchronous>, transform_indices = @transform_1, window_bounds = array<i64: 5, 32, 64>}, {pipeline_mode = #tpu.pipeline_mode<synchronous>, transform_indices = @transform_2, window_bounds = array<i64: 1, 64>}, {pipeline_mode = #tpu.pipeline_mode<synchronous>, transform_indices = @transform_3, window_bounds = array<i64: 1, 64>}, {transform_indices = @transform_4, window_bounds = array<i64: 1, 8, 64>}]} {
    %c0 = arith.constant 0 : index
    %c0_0 = arith.constant 0 : index
    %c0_1 = arith.constant 0 : index
    %0 = vector.load %arg1[%c0, %c0_0, %c0_1] : memref<1x8x32xf32, #tpu.memory_space<vmem>>, vector<1x8x32xf32>
    %1 = vector.shape_cast %0 : vector<1x8x32xf32> to vector<8x32xf32>
    %2 = arith.truncf %1 : vector<8x32xf32> to vector<8x32xbf16>
    %3 = vector.extract_strided_slice %2 {offsets = [6, 0], sizes = [2, 32], strides = [1, 1]} : vector<8x32xbf16> to vector<2x32xbf16>
    %4 = vector.extract_strided_slice %2 {offsets = [0, 0], sizes = [2, 32], strides = [1, 1]} : vector<8x32xbf16> to vector<2x32xbf16>
    %5 = tpu.concatenate %3, %2, %4 in 0 : vector<2x32xbf16>, vector<8x32xbf16>, vector<2x32xbf16> -> vector<12x32xbf16>
    %6 = vector.extract_strided_slice %5 {offsets = [0, 0], sizes = [8, 32], strides = [1, 1]} : vector<12x32xbf16> to vector<8x32xbf16>
    %c0_2 = arith.constant 0 : index
    %c0_3 = arith.constant 0 : index
    %c0_4 = arith.constant 0 : index
    %7 = vector.load %arg2[%c0_2, %c0_3, %c0_4] : memref<5x32x64xbf16, #tpu.memory_space<vmem>>, vector<1x32x64xbf16>
    %8 = vector.shape_cast %7 : vector<1x32x64xbf16> to vector<32x64xbf16>
    %cst = arith.constant dense<0.000000e+00> : vector<8x64xf32>
    %9 = tpu.matmul %6, %8, %cst {dimension_numbers = #tpu.dot_dimension_numbers<[1], [0], [0], [1], [0, 0, 1, 1], [], []>} : vector<8x32xbf16>, vector<32x64xbf16>, vector<8x64xf32> -> vector<8x64xf32>
    %10 = vector.extract_strided_slice %5 {offsets = [1, 0], sizes = [8, 32], strides = [1, 1]} : vector<12x32xbf16> to vector<8x32xbf16>
    %c1 = arith.constant 1 : index
    %c0_5 = arith.constant 0 : index
    %c0_6 = arith.constant 0 : index
    %11 = vector.load %arg2[%c1, %c0_5, %c0_6] : memref<5x32x64xbf16, #tpu.memory_space<vmem>>, vector<1x32x64xbf16>
    %12 = vector.shape_cast %11 : vector<1x32x64xbf16> to vector<32x64xbf16>
    %cst_7 = arith.constant dense<0.000000e+00> : vector<8x64xf32>
    %13 = tpu.matmul %10, %12, %cst_7 {dimension_numbers = #tpu.dot_dimension_numbers<[1], [0], [0], [1], [0, 0, 1, 1], [], []>} : vector<8x32xbf16>, vector<32x64xbf16>, vector<8x64xf32> -> vector<8x64xf32>
    %14 = arith.addf %9, %13 : vector<8x64xf32>
    %15 = vector.extract_strided_slice %5 {offsets = [2, 0], sizes = [8, 32], strides = [1, 1]} : vector<12x32xbf16> to vector<8x32xbf16>
    %c2 = arith.constant 2 : index
    %c0_8 = arith.constant 0 : index
    %c0_9 = arith.constant 0 : index
    %16 = vector.load %arg2[%c2, %c0_8, %c0_9] : memref<5x32x64xbf16, #tpu.memory_space<vmem>>, vector<1x32x64xbf16>
    %17 = vector.shape_cast %16 : vector<1x32x64xbf16> to vector<32x64xbf16>
    %cst_10 = arith.constant dense<0.000000e+00> : vector<8x64xf32>
    %18 = tpu.matmul %15, %17, %cst_10 {dimension_numbers = #tpu.dot_dimension_numbers<[1], [0], [0], [1], [0, 0, 1, 1], [], []>} : vector<8x32xbf16>, vector<32x64xbf16>, vector<8x64xf32> -> vector<8x64xf32>
    %19 = arith.addf %14, %18 : vector<8x64xf32>
    %20 = vector.extract_strided_slice %5 {offsets = [3, 0], sizes = [8, 32], strides = [1, 1]} : vector<12x32xbf16> to vector<8x32xbf16>
    %c3 = arith.constant 3 : index
    %c0_11 = arith.constant 0 : index
    %c0_12 = arith.constant 0 : index
    %21 = vector.load %arg2[%c3, %c0_11, %c0_12] : memref<5x32x64xbf16, #tpu.memory_space<vmem>>, vector<1x32x64xbf16>
    %22 = vector.shape_cast %21 : vector<1x32x64xbf16> to vector<32x64xbf16>
    %cst_13 = arith.constant dense<0.000000e+00> : vector<8x64xf32>
    %23 = tpu.matmul %20, %22, %cst_13 {dimension_numbers = #tpu.dot_dimension_numbers<[1], [0], [0], [1], [0, 0, 1, 1], [], []>} : vector<8x32xbf16>, vector<32x64xbf16>, vector<8x64xf32> -> vector<8x64xf32>
    %24 = arith.addf %19, %23 : vector<8x64xf32>
    %25 = vector.extract_strided_slice %5 {offsets = [4, 0], sizes = [8, 32], strides = [1, 1]} : vector<12x32xbf16> to vector<8x32xbf16>
    %c4 = arith.constant 4 : index
    %c0_14 = arith.constant 0 : index
    %c0_15 = arith.constant 0 : index
    %26 = vector.load %arg2[%c4, %c0_14, %c0_15] : memref<5x32x64xbf16, #tpu.memory_space<vmem>>, vector<1x32x64xbf16>
    %27 = vector.shape_cast %26 : vector<1x32x64xbf16> to vector<32x64xbf16>
    %cst_16 = arith.constant dense<0.000000e+00> : vector<8x64xf32>
    %28 = tpu.matmul %25, %27, %cst_16 {dimension_numbers = #tpu.dot_dimension_numbers<[1], [0], [0], [1], [0, 0, 1, 1], [], []>} : vector<8x32xbf16>, vector<32x64xbf16>, vector<8x64xf32> -> vector<8x64xf32>
    %29 = arith.addf %24, %28 : vector<8x64xf32>
    %c0_17 = arith.constant 0 : index
    %c0_18 = arith.constant 0 : index
    %30 = vector.load %arg3[%c0_17, %c0_18] : memref<1x64xf32, #tpu.memory_space<vmem>>, vector<1x64xf32>
    %31 = vector.broadcast %30 : vector<1x64xf32> to vector<8x64xf32>
    %32 = arith.mulf %29, %31 : vector<8x64xf32>
    %c0_19 = arith.constant 0 : index
    %c0_20 = arith.constant 0 : index
    %33 = vector.load %arg4[%c0_19, %c0_20] : memref<1x64xf32, #tpu.memory_space<vmem>>, vector<1x64xf32>
    %34 = vector.broadcast %33 : vector<1x64xf32> to vector<8x64xf32>
    %35 = arith.addf %32, %34 : vector<8x64xf32>
    %36 = arith.truncf %35 : vector<8x64xf32> to vector<8x64xbf16>
    %c0_21 = arith.constant 0 : index
    %c0_22 = arith.constant 0 : index
    %c0_23 = arith.constant 0 : index
    %37 = vector.load %arg5[%c0_21, %c0_22, %c0_23] : memref<1x8x64xbf16, #tpu.memory_space<vmem>>, vector<1x8x64xbf16>
    %38 = vector.shape_cast %37 : vector<1x8x64xbf16> to vector<8x64xbf16>
    %39 = vector.shape_cast %36 : vector<8x64xbf16> to vector<1x8x64xbf16>
    tpu.vector_store %arg5[%c0_21, %c0_22, %c0_23], %39 {strides = array<i32>} : memref<1x8x64xbf16, #tpu.memory_space<vmem>>, vector<1x8x64xbf16>,
    return
  }
  func.func @transform_0(%arg0: i32) -> (i32, i32, i32) {
    %c0_i32 = arith.constant 0 : i32
    %c0_i32_0 = arith.constant 0 : i32
    %c0_i32_1 = arith.constant 0 : i32
    return %arg0, %c0_i32, %c0_i32_0 : i32, i32, i32
  }
  func.func @transform_1(%arg0: i32) -> (i32, i32, i32) {
    %c0_i32 = arith.constant 0 : i32
    %c0_i32_0 = arith.constant 0 : i32
    %c0_i32_1 = arith.constant 0 : i32
    %c0_i32_2 = arith.constant 0 : i32
    return %c0_i32, %c0_i32_0, %c0_i32_1 : i32, i32, i32
  }
  func.func @transform_2(%arg0: i32) -> (i32, i32) {
    %c0_i32 = arith.constant 0 : i32
    %c0_i32_0 = arith.constant 0 : i32
    %c0_i32_1 = arith.constant 0 : i32
    return %c0_i32, %c0_i32_0 : i32, i32
  }
  func.func @transform_3(%arg0: i32) -> (i32, i32) {
    %c0_i32 = arith.constant 0 : i32
    %c0_i32_0 = arith.constant 0 : i32
    %c0_i32_1 = arith.constant 0 : i32
    return %c0_i32, %c0_i32_0 : i32, i32
  }
  func.func @transform_4(%arg0: i32) -> (i32, i32, i32) {
    %c0_i32 = arith.constant 0 : i32
    %c0_i32_0 = arith.constant 0 : i32
    %c0_i32_1 = arith.constant 0 : i32
    return %arg0, %c0_i32, %c0_i32_0 : i32, i32, i32
  }
}

module attributes {stable_mosaic.version = 11 : i64} {
  func.func @_attn_kernel(%arg0: i32, %arg1: i32, %arg2: memref<1x16x96xbf16, #tpu.memory_space<vmem>>, %arg3: memref<1x16x96xbf16, #tpu.memory_space<vmem>>, %arg4: memref<1x16x32xbf16, #tpu.memory_space<vmem>>) attributes {dimension_semantics = [#tpu.dimension_semantics<parallel>, #tpu.dimension_semantics<parallel>], iteration_bounds = array<i64: 2, 1>, scalar_prefetch = 0 : i64, scratch_operands = 0 : i64, tpu.core_type = #tpu.core_type<tc>, window_params = [{transform_indices = @transform_0, window_bounds = array<i64: 1, 16, 96>}, {transform_indices = @transform_1, window_bounds = array<i64: 1, 16, 96>}, {transform_indices = @transform_2, window_bounds = array<i64: 1, 16, 32>}]} {
    %c0 = arith.constant 0 : index
    %c0_0 = arith.constant 0 : index
    %c0_1 = arith.constant 0 : index
    %0 = vector.load %arg2[%c0, %c0_0, %c0_1] : memref<1x16x96xbf16, #tpu.memory_space<vmem>>, vector<1x16x96xbf16>
    %1 = vector.shape_cast %0 : vector<1x16x96xbf16> to vector<16x96xbf16>
    %2 = vector.extract_strided_slice %1 {offsets = [0, 0], sizes = [16, 32], strides = [1, 1]} : vector<16x96xbf16> to vector<16x32xbf16>
    %c0_2 = arith.constant 0 : index
    %c0_3 = arith.constant 0 : index
    %c0_4 = arith.constant 0 : index
    %3 = vector.load %arg3[%c0_2, %c0_3, %c0_4] : memref<1x16x96xbf16, #tpu.memory_space<vmem>>, vector<1x16x96xbf16>
    %4 = vector.shape_cast %3 : vector<1x16x96xbf16> to vector<16x96xbf16>
    %5 = vector.extract_strided_slice %4 {offsets = [0, 32], sizes = [16, 32], strides = [1, 1]} : vector<16x96xbf16> to vector<16x32xbf16>
    %6 = vector.extract_strided_slice %4 {offsets = [0, 64], sizes = [16, 32], strides = [1, 1]} : vector<16x96xbf16> to vector<16x32xbf16>
    %c16_i32 = arith.constant 16 : i32
    %7 = arith.muli %arg1, %c16_i32 : i32
    %8 = tpu.assume_multiple %7, 16 : i32
    %9 = tpu.iota {dimensions = array<i32: 0>} : vector<16x16xi32>
    %10 = vector.broadcast %8 : i32 to vector<16x16xi32>
    %11 = arith.addi %9, %10 : vector<16x16xi32>
    %12 = tpu.iota {dimensions = array<i32: 1>} : vector<16x16xi32>
    %13 = arith.cmpi sle, %12, %11 : vector<16x16xi32>
    %14 = vector.extract_strided_slice %2 {offsets = [0, 0], sizes = [16, 8], strides = [1, 1]} : vector<16x32xbf16> to vector<16x8xbf16>
    %15 = vector.extract_strided_slice %5 {offsets = [0, 0], sizes = [16, 8], strides = [1, 1]} : vector<16x32xbf16> to vector<16x8xbf16>
    %16 = vector.extract_strided_slice %6 {offsets = [0, 0], sizes = [16, 8], strides = [1, 1]} : vector<16x32xbf16> to vector<16x8xbf16>
    %cst = arith.constant dense<0.000000e+00> : vector<16x16xf32>
    %17 = tpu.matmul %14, %15, %cst {dimension_numbers = #tpu.dot_dimension_numbers<[1], [1], [0], [0], [0, 0, 1, 0], [], []>} : vector<16x8xbf16>, vector<16x8xbf16>, vector<16x16xf32> -> vector<16x16xf32>
    %cst_5 = arith.constant 0.353553385 : f32
    %18 = vector.broadcast %cst_5 : f32 to vector<16x16xf32>
    %19 = arith.mulf %17, %18 : vector<16x16xf32>
    %cst_6 = arith.constant -1.000000e+30 : f32
    %20 = vector.broadcast %cst_6 : f32 to vector<16x16xf32>
    %21 = arith.select %13, %19, %20 : vector<16x16xi1>, vector<16x16xf32>
    %cst_7 = arith.constant dense<0xFF800000> : vector<16xf32>
    %22 = vector.multi_reduction <maximumf>, %21, %cst_7 [1] : vector<16x16xf32> to vector<16xf32>
    %23 = vector.shape_cast %22 : vector<16xf32> to vector<16x1xf32>
    %24 = vector.broadcast %23 : vector<16x1xf32> to vector<16x16xf32>
    %25 = arith.subf %21, %24 : vector<16x16xf32>
    %26 = math.exp %25 : vector<16x16xf32>
    %cst_8 = arith.constant dense<0.000000e+00> : vector<16xf32>
    %27 = vector.multi_reduction <add>, %26, %cst_8 [1] : vector<16x16xf32> to vector<16xf32>
    %28 = vector.shape_cast %27 : vector<16xf32> to vector<16x1xf32>
    %29 = tpu.reciprocal %28 {approx = true} : vector<16x1xf32> -> vector<16x1xf32>
    %30 = vector.broadcast %29 : vector<16x1xf32> to vector<16x16xf32>
    %31 = arith.mulf %26, %30 : vector<16x16xf32>
    %32 = arith.truncf %31 : vector<16x16xf32> to vector<16x16xbf16>
    %cst_9 = arith.constant dense<0.000000e+00> : vector<16x8xf32>
    %33 = tpu.matmul %32, %16, %cst_9 {dimension_numbers = #tpu.dot_dimension_numbers<[1], [0], [0], [1], [0, 0, 1, 1], [], []>} : vector<16x16xbf16>, vector<16x8xbf16>, vector<16x8xf32> -> vector<16x8xf32>
    %34 = vector.extract_strided_slice %2 {offsets = [0, 8], sizes = [16, 8], strides = [1, 1]} : vector<16x32xbf16> to vector<16x8xbf16>
    %35 = vector.extract_strided_slice %5 {offsets = [0, 8], sizes = [16, 8], strides = [1, 1]} : vector<16x32xbf16> to vector<16x8xbf16>
    %36 = vector.extract_strided_slice %6 {offsets = [0, 8], sizes = [16, 8], strides = [1, 1]} : vector<16x32xbf16> to vector<16x8xbf16>
    %cst_10 = arith.constant dense<0.000000e+00> : vector<16x16xf32>
    %37 = tpu.matmul %34, %35, %cst_10 {dimension_numbers = #tpu.dot_dimension_numbers<[1], [1], [0], [0], [0, 0, 1, 0], [], []>} : vector<16x8xbf16>, vector<16x8xbf16>, vector<16x16xf32> -> vector<16x16xf32>
    %cst_11 = arith.constant 0.353553385 : f32
    %38 = vector.broadcast %cst_11 : f32 to vector<16x16xf32>
    %39 = arith.mulf %37, %38 : vector<16x16xf32>
    %cst_12 = arith.constant -1.000000e+30 : f32
    %40 = vector.broadcast %cst_12 : f32 to vector<16x16xf32>
    %41 = arith.select %13, %39, %40 : vector<16x16xi1>, vector<16x16xf32>
    %cst_13 = arith.constant dense<0xFF800000> : vector<16xf32>
    %42 = vector.multi_reduction <maximumf>, %41, %cst_13 [1] : vector<16x16xf32> to vector<16xf32>
    %43 = vector.shape_cast %42 : vector<16xf32> to vector<16x1xf32>
    %44 = vector.broadcast %43 : vector<16x1xf32> to vector<16x16xf32>
    %45 = arith.subf %41, %44 : vector<16x16xf32>
    %46 = math.exp %45 : vector<16x16xf32>
    %cst_14 = arith.constant dense<0.000000e+00> : vector<16xf32>
    %47 = vector.multi_reduction <add>, %46, %cst_14 [1] : vector<16x16xf32> to vector<16xf32>
    %48 = vector.shape_cast %47 : vector<16xf32> to vector<16x1xf32>
    %49 = tpu.reciprocal %48 {approx = true} : vector<16x1xf32> -> vector<16x1xf32>
    %50 = vector.broadcast %49 : vector<16x1xf32> to vector<16x16xf32>
    %51 = arith.mulf %46, %50 : vector<16x16xf32>
    %52 = arith.truncf %51 : vector<16x16xf32> to vector<16x16xbf16>
    %cst_15 = arith.constant dense<0.000000e+00> : vector<16x8xf32>
    %53 = tpu.matmul %52, %36, %cst_15 {dimension_numbers = #tpu.dot_dimension_numbers<[1], [0], [0], [1], [0, 0, 1, 1], [], []>} : vector<16x16xbf16>, vector<16x8xbf16>, vector<16x8xf32> -> vector<16x8xf32>
    %54 = vector.extract_strided_slice %2 {offsets = [0, 16], sizes = [16, 8], strides = [1, 1]} : vector<16x32xbf16> to vector<16x8xbf16>
    %55 = vector.extract_strided_slice %5 {offsets = [0, 16], sizes = [16, 8], strides = [1, 1]} : vector<16x32xbf16> to vector<16x8xbf16>
    %56 = vector.extract_strided_slice %6 {offsets = [0, 16], sizes = [16, 8], strides = [1, 1]} : vector<16x32xbf16> to vector<16x8xbf16>
    %cst_16 = arith.constant dense<0.000000e+00> : vector<16x16xf32>
    %57 = tpu.matmul %54, %55, %cst_16 {dimension_numbers = #tpu.dot_dimension_numbers<[1], [1], [0], [0], [0, 0, 1, 0], [], []>} : vector<16x8xbf16>, vector<16x8xbf16>, vector<16x16xf32> -> vector<16x16xf32>
    %cst_17 = arith.constant 0.353553385 : f32
    %58 = vector.broadcast %cst_17 : f32 to vector<16x16xf32>
    %59 = arith.mulf %57, %58 : vector<16x16xf32>
    %cst_18 = arith.constant -1.000000e+30 : f32
    %60 = vector.broadcast %cst_18 : f32 to vector<16x16xf32>
    %61 = arith.select %13, %59, %60 : vector<16x16xi1>, vector<16x16xf32>
    %cst_19 = arith.constant dense<0xFF800000> : vector<16xf32>
    %62 = vector.multi_reduction <maximumf>, %61, %cst_19 [1] : vector<16x16xf32> to vector<16xf32>
    %63 = vector.shape_cast %62 : vector<16xf32> to vector<16x1xf32>
    %64 = vector.broadcast %63 : vector<16x1xf32> to vector<16x16xf32>
    %65 = arith.subf %61, %64 : vector<16x16xf32>
    %66 = math.exp %65 : vector<16x16xf32>
    %cst_20 = arith.constant dense<0.000000e+00> : vector<16xf32>
    %67 = vector.multi_reduction <add>, %66, %cst_20 [1] : vector<16x16xf32> to vector<16xf32>
    %68 = vector.shape_cast %67 : vector<16xf32> to vector<16x1xf32>
    %69 = tpu.reciprocal %68 {approx = true} : vector<16x1xf32> -> vector<16x1xf32>
    %70 = vector.broadcast %69 : vector<16x1xf32> to vector<16x16xf32>
    %71 = arith.mulf %66, %70 : vector<16x16xf32>
    %72 = arith.truncf %71 : vector<16x16xf32> to vector<16x16xbf16>
    %cst_21 = arith.constant dense<0.000000e+00> : vector<16x8xf32>
    %73 = tpu.matmul %72, %56, %cst_21 {dimension_numbers = #tpu.dot_dimension_numbers<[1], [0], [0], [1], [0, 0, 1, 1], [], []>} : vector<16x16xbf16>, vector<16x8xbf16>, vector<16x8xf32> -> vector<16x8xf32>
    %74 = vector.extract_strided_slice %2 {offsets = [0, 24], sizes = [16, 8], strides = [1, 1]} : vector<16x32xbf16> to vector<16x8xbf16>
    %75 = vector.extract_strided_slice %5 {offsets = [0, 24], sizes = [16, 8], strides = [1, 1]} : vector<16x32xbf16> to vector<16x8xbf16>
    %76 = vector.extract_strided_slice %6 {offsets = [0, 24], sizes = [16, 8], strides = [1, 1]} : vector<16x32xbf16> to vector<16x8xbf16>
    %cst_22 = arith.constant dense<0.000000e+00> : vector<16x16xf32>
    %77 = tpu.matmul %74, %75, %cst_22 {dimension_numbers = #tpu.dot_dimension_numbers<[1], [1], [0], [0], [0, 0, 1, 0], [], []>} : vector<16x8xbf16>, vector<16x8xbf16>, vector<16x16xf32> -> vector<16x16xf32>
    %cst_23 = arith.constant 0.353553385 : f32
    %78 = vector.broadcast %cst_23 : f32 to vector<16x16xf32>
    %79 = arith.mulf %77, %78 : vector<16x16xf32>
    %cst_24 = arith.constant -1.000000e+30 : f32
    %80 = vector.broadcast %cst_24 : f32 to vector<16x16xf32>
    %81 = arith.select %13, %79, %80 : vector<16x16xi1>, vector<16x16xf32>
    %cst_25 = arith.constant dense<0xFF800000> : vector<16xf32>
    %82 = vector.multi_reduction <maximumf>, %81, %cst_25 [1] : vector<16x16xf32> to vector<16xf32>
    %83 = vector.shape_cast %82 : vector<16xf32> to vector<16x1xf32>
    %84 = vector.broadcast %83 : vector<16x1xf32> to vector<16x16xf32>
    %85 = arith.subf %81, %84 : vector<16x16xf32>
    %86 = math.exp %85 : vector<16x16xf32>
    %cst_26 = arith.constant dense<0.000000e+00> : vector<16xf32>
    %87 = vector.multi_reduction <add>, %86, %cst_26 [1] : vector<16x16xf32> to vector<16xf32>
    %88 = vector.shape_cast %87 : vector<16xf32> to vector<16x1xf32>
    %89 = tpu.reciprocal %88 {approx = true} : vector<16x1xf32> -> vector<16x1xf32>
    %90 = vector.broadcast %89 : vector<16x1xf32> to vector<16x16xf32>
    %91 = arith.mulf %86, %90 : vector<16x16xf32>
    %92 = arith.truncf %91 : vector<16x16xf32> to vector<16x16xbf16>
    %cst_27 = arith.constant dense<0.000000e+00> : vector<16x8xf32>
    %93 = tpu.matmul %92, %76, %cst_27 {dimension_numbers = #tpu.dot_dimension_numbers<[1], [0], [0], [1], [0, 0, 1, 1], [], []>} : vector<16x16xbf16>, vector<16x8xbf16>, vector<16x8xf32> -> vector<16x8xf32>
    %94 = tpu.concatenate %33, %53, %73, %93 in 1 : vector<16x8xf32>, vector<16x8xf32>, vector<16x8xf32>, vector<16x8xf32> -> vector<16x32xf32>
    %95 = arith.truncf %94 : vector<16x32xf32> to vector<16x32xbf16>
    %c0_28 = arith.constant 0 : index
    %c0_29 = arith.constant 0 : index
    %c0_30 = arith.constant 0 : index
    %96 = vector.load %arg4[%c0_28, %c0_29, %c0_30] : memref<1x16x32xbf16, #tpu.memory_space<vmem>>, vector<1x16x32xbf16>
    %97 = vector.shape_cast %96 : vector<1x16x32xbf16> to vector<16x32xbf16>
    %98 = vector.shape_cast %95 : vector<16x32xbf16> to vector<1x16x32xbf16>
    tpu.vector_store %arg4[%c0_28, %c0_29, %c0_30], %98 {strides = array<i32>} : memref<1x16x32xbf16, #tpu.memory_space<vmem>>, vector<1x16x32xbf16>,
    return
  }
  func.func @transform_0(%arg0: i32, %arg1: i32) -> (i32, i32, i32) {
    %c0_i32 = arith.constant 0 : i32
    %c0_i32_0 = arith.constant 0 : i32
    return %arg0, %arg1, %c0_i32 : i32, i32, i32
  }
  func.func @transform_1(%arg0: i32, %arg1: i32) -> (i32, i32, i32) {
    %c0_i32 = arith.constant 0 : i32
    %c0_i32_0 = arith.constant 0 : i32
    %c0_i32_1 = arith.constant 0 : i32
    return %arg0, %c0_i32, %c0_i32_0 : i32, i32, i32
  }
  func.func @transform_2(%arg0: i32, %arg1: i32) -> (i32, i32, i32) {
    %c0_i32 = arith.constant 0 : i32
    %c0_i32_0 = arith.constant 0 : i32
    return %arg0, %arg1, %c0_i32 : i32, i32, i32
  }
}

module attributes {stable_mosaic.version = 11 : i64} {
  func.func @_conv1d_kernel(%arg0: i32, %arg1: memref<1x16x32xf32, #tpu.memory_space<vmem>>, %arg2: memref<5x32x32xbf16, #tpu.memory_space<vmem>>, %arg3: memref<1x32xf32, #tpu.memory_space<vmem>>, %arg4: memref<1x32xf32, #tpu.memory_space<vmem>>, %arg5: memref<1x16x32xbf16, #tpu.memory_space<vmem>>) attributes {dimension_semantics = [#tpu.dimension_semantics<parallel>], iteration_bounds = array<i64: 2>, scalar_prefetch = 0 : i64, scratch_operands = 0 : i64, tpu.core_type = #tpu.core_type<tc>, window_params = [{transform_indices = @transform_0, window_bounds = array<i64: 1, 16, 32>}, {pipeline_mode = #tpu.pipeline_mode<synchronous>, transform_indices = @transform_1, window_bounds = array<i64: 5, 32, 32>}, {pipeline_mode = #tpu.pipeline_mode<synchronous>, transform_indices = @transform_2, window_bounds = array<i64: 1, 32>}, {pipeline_mode = #tpu.pipeline_mode<synchronous>, transform_indices = @transform_3, window_bounds = array<i64: 1, 32>}, {transform_indices = @transform_4, window_bounds = array<i64: 1, 16, 32>}]} {
    %c0 = arith.constant 0 : index
    %c0_0 = arith.constant 0 : index
    %c0_1 = arith.constant 0 : index
    %0 = vector.load %arg1[%c0, %c0_0, %c0_1] : memref<1x16x32xf32, #tpu.memory_space<vmem>>, vector<1x16x32xf32>
    %1 = vector.shape_cast %0 : vector<1x16x32xf32> to vector<16x32xf32>
    %2 = arith.truncf %1 : vector<16x32xf32> to vector<16x32xbf16>
    %3 = vector.extract_strided_slice %2 {offsets = [14, 0], sizes = [2, 32], strides = [1, 1]} : vector<16x32xbf16> to vector<2x32xbf16>
    %4 = vector.extract_strided_slice %2 {offsets = [0, 0], sizes = [2, 32], strides = [1, 1]} : vector<16x32xbf16> to vector<2x32xbf16>
    %5 = tpu.concatenate %3, %2, %4 in 0 : vector<2x32xbf16>, vector<16x32xbf16>, vector<2x32xbf16> -> vector<20x32xbf16>
    %6 = vector.extract_strided_slice %5 {offsets = [0, 0], sizes = [16, 32], strides = [1, 1]} : vector<20x32xbf16> to vector<16x32xbf16>
    %c0_2 = arith.constant 0 : index
    %c0_3 = arith.constant 0 : index
    %c0_4 = arith.constant 0 : index
    %7 = vector.load %arg2[%c0_2, %c0_3, %c0_4] : memref<5x32x32xbf16, #tpu.memory_space<vmem>>, vector<1x32x32xbf16>
    %8 = vector.shape_cast %7 : vector<1x32x32xbf16> to vector<32x32xbf16>
    %cst = arith.constant dense<0.000000e+00> : vector<16x32xf32>
    %9 = tpu.matmul %6, %8, %cst {dimension_numbers = #tpu.dot_dimension_numbers<[1], [0], [0], [1], [0, 0, 1, 1], [], []>} : vector<16x32xbf16>, vector<32x32xbf16>, vector<16x32xf32> -> vector<16x32xf32>
    %10 = vector.extract_strided_slice %5 {offsets = [1, 0], sizes = [16, 32], strides = [1, 1]} : vector<20x32xbf16> to vector<16x32xbf16>
    %c1 = arith.constant 1 : index
    %c0_5 = arith.constant 0 : index
    %c0_6 = arith.constant 0 : index
    %11 = vector.load %arg2[%c1, %c0_5, %c0_6] : memref<5x32x32xbf16, #tpu.memory_space<vmem>>, vector<1x32x32xbf16>
    %12 = vector.shape_cast %11 : vector<1x32x32xbf16> to vector<32x32xbf16>
    %cst_7 = arith.constant dense<0.000000e+00> : vector<16x32xf32>
    %13 = tpu.matmul %10, %12, %cst_7 {dimension_numbers = #tpu.dot_dimension_numbers<[1], [0], [0], [1], [0, 0, 1, 1], [], []>} : vector<16x32xbf16>, vector<32x32xbf16>, vector<16x32xf32> -> vector<16x32xf32>
    %14 = arith.addf %9, %13 : vector<16x32xf32>
    %15 = vector.extract_strided_slice %5 {offsets = [2, 0], sizes = [16, 32], strides = [1, 1]} : vector<20x32xbf16> to vector<16x32xbf16>
    %c2 = arith.constant 2 : index
    %c0_8 = arith.constant 0 : index
    %c0_9 = arith.constant 0 : index
    %16 = vector.load %arg2[%c2, %c0_8, %c0_9] : memref<5x32x32xbf16, #tpu.memory_space<vmem>>, vector<1x32x32xbf16>
    %17 = vector.shape_cast %16 : vector<1x32x32xbf16> to vector<32x32xbf16>
    %cst_10 = arith.constant dense<0.000000e+00> : vector<16x32xf32>
    %18 = tpu.matmul %15, %17, %cst_10 {dimension_numbers = #tpu.dot_dimension_numbers<[1], [0], [0], [1], [0, 0, 1, 1], [], []>} : vector<16x32xbf16>, vector<32x32xbf16>, vector<16x32xf32> -> vector<16x32xf32>
    %19 = arith.addf %14, %18 : vector<16x32xf32>
    %20 = vector.extract_strided_slice %5 {offsets = [3, 0], sizes = [16, 32], strides = [1, 1]} : vector<20x32xbf16> to vector<16x32xbf16>
    %c3 = arith.constant 3 : index
    %c0_11 = arith.constant 0 : index
    %c0_12 = arith.constant 0 : index
    %21 = vector.load %arg2[%c3, %c0_11, %c0_12] : memref<5x32x32xbf16, #tpu.memory_space<vmem>>, vector<1x32x32xbf16>
    %22 = vector.shape_cast %21 : vector<1x32x32xbf16> to vector<32x32xbf16>
    %cst_13 = arith.constant dense<0.000000e+00> : vector<16x32xf32>
    %23 = tpu.matmul %20, %22, %cst_13 {dimension_numbers = #tpu.dot_dimension_numbers<[1], [0], [0], [1], [0, 0, 1, 1], [], []>} : vector<16x32xbf16>, vector<32x32xbf16>, vector<16x32xf32> -> vector<16x32xf32>
    %24 = arith.addf %19, %23 : vector<16x32xf32>
    %25 = vector.extract_strided_slice %5 {offsets = [4, 0], sizes = [16, 32], strides = [1, 1]} : vector<20x32xbf16> to vector<16x32xbf16>
    %c4 = arith.constant 4 : index
    %c0_14 = arith.constant 0 : index
    %c0_15 = arith.constant 0 : index
    %26 = vector.load %arg2[%c4, %c0_14, %c0_15] : memref<5x32x32xbf16, #tpu.memory_space<vmem>>, vector<1x32x32xbf16>
    %27 = vector.shape_cast %26 : vector<1x32x32xbf16> to vector<32x32xbf16>
    %cst_16 = arith.constant dense<0.000000e+00> : vector<16x32xf32>
    %28 = tpu.matmul %25, %27, %cst_16 {dimension_numbers = #tpu.dot_dimension_numbers<[1], [0], [0], [1], [0, 0, 1, 1], [], []>} : vector<16x32xbf16>, vector<32x32xbf16>, vector<16x32xf32> -> vector<16x32xf32>
    %29 = arith.addf %24, %28 : vector<16x32xf32>
    %c0_17 = arith.constant 0 : index
    %c0_18 = arith.constant 0 : index
    %30 = vector.load %arg3[%c0_17, %c0_18] : memref<1x32xf32, #tpu.memory_space<vmem>>, vector<1x32xf32>
    %31 = vector.broadcast %30 : vector<1x32xf32> to vector<16x32xf32>
    %32 = arith.mulf %29, %31 : vector<16x32xf32>
    %c0_19 = arith.constant 0 : index
    %c0_20 = arith.constant 0 : index
    %33 = vector.load %arg4[%c0_19, %c0_20] : memref<1x32xf32, #tpu.memory_space<vmem>>, vector<1x32xf32>
    %34 = vector.broadcast %33 : vector<1x32xf32> to vector<16x32xf32>
    %35 = arith.addf %32, %34 : vector<16x32xf32>
    %36 = arith.truncf %35 : vector<16x32xf32> to vector<16x32xbf16>
    %c0_21 = arith.constant 0 : index
    %c0_22 = arith.constant 0 : index
    %c0_23 = arith.constant 0 : index
    %37 = vector.load %arg5[%c0_21, %c0_22, %c0_23] : memref<1x16x32xbf16, #tpu.memory_space<vmem>>, vector<1x16x32xbf16>
    %38 = vector.shape_cast %37 : vector<1x16x32xbf16> to vector<16x32xbf16>
    %39 = vector.shape_cast %36 : vector<16x32xbf16> to vector<1x16x32xbf16>
    tpu.vector_store %arg5[%c0_21, %c0_22, %c0_23], %39 {strides = array<i32>} : memref<1x16x32xbf16, #tpu.memory_space<vmem>>, vector<1x16x32xbf16>,
    return
  }
  func.func @transform_0(%arg0: i32) -> (i32, i32, i32) {
    %c0_i32 = arith.constant 0 : i32
    %c0_i32_0 = arith.constant 0 : i32
    %c0_i32_1 = arith.constant 0 : i32
    return %arg0, %c0_i32, %c0_i32_0 : i32, i32, i32
  }
  func.func @transform_1(%arg0: i32) -> (i32, i32, i32) {
    %c0_i32 = arith.constant 0 : i32
    %c0_i32_0 = arith.constant 0 : i32
    %c0_i32_1 = arith.constant 0 : i32
    %c0_i32_2 = arith.constant 0 : i32
    return %c0_i32, %c0_i32_0, %c0_i32_1 : i32, i32, i32
  }
  func.func @transform_2(%arg0: i32) -> (i32, i32) {
    %c0_i32 = arith.constant 0 : i32
    %c0_i32_0 = arith.constant 0 : i32
    %c0_i32_1 = arith.constant 0 : i32
    return %c0_i32, %c0_i32_0 : i32, i32
  }
  func.func @transform_3(%arg0: i32) -> (i32, i32) {
    %c0_i32 = arith.constant 0 : i32
    %c0_i32_0 = arith.constant 0 : i32
    %c0_i32_1 = arith.constant 0 : i32
    return %c0_i32, %c0_i32_0 : i32, i32
  }
  func.func @transform_4(%arg0: i32) -> (i32, i32, i32) {
    %c0_i32 = arith.constant 0 : i32
    %c0_i32_0 = arith.constant 0 : i32
    %c0_i32_1 = arith.constant 0 : i32
    return %arg0, %c0_i32, %c0_i32_0 : i32, i32, i32
  }
}

module attributes {stable_mosaic.version = 11 : i64} {
  func.func @_attn_kernel(%arg0: i32, %arg1: i32, %arg2: memref<1x16x32xbf16, #tpu.memory_space<vmem>>, %arg3: memref<1x8x64xbf16, #tpu.memory_space<vmem>>, %arg4: memref<1x16x32xbf16, #tpu.memory_space<vmem>>) attributes {dimension_semantics = [#tpu.dimension_semantics<parallel>, #tpu.dimension_semantics<parallel>], iteration_bounds = array<i64: 2, 1>, scalar_prefetch = 0 : i64, scratch_operands = 0 : i64, tpu.core_type = #tpu.core_type<tc>, window_params = [{transform_indices = @transform_0, window_bounds = array<i64: 1, 16, 32>}, {transform_indices = @transform_1, window_bounds = array<i64: 1, 8, 64>}, {transform_indices = @transform_2, window_bounds = array<i64: 1, 16, 32>}]} {
    %c0 = arith.constant 0 : index
    %c0_0 = arith.constant 0 : index
    %c0_1 = arith.constant 0 : index
    %0 = vector.load %arg2[%c0, %c0_0, %c0_1] : memref<1x16x32xbf16, #tpu.memory_space<vmem>>, vector<1x16x32xbf16>
    %1 = vector.shape_cast %0 : vector<1x16x32xbf16> to vector<16x32xbf16>
    %c0_2 = arith.constant 0 : index
    %c0_3 = arith.constant 0 : index
    %c0_4 = arith.constant 0 : index
    %2 = vector.load %arg3[%c0_2, %c0_3, %c0_4] : memref<1x8x64xbf16, #tpu.memory_space<vmem>>, vector<1x8x64xbf16>
    %3 = vector.shape_cast %2 : vector<1x8x64xbf16> to vector<8x64xbf16>
    %4 = vector.extract_strided_slice %3 {offsets = [0, 0], sizes = [8, 32], strides = [1, 1]} : vector<8x64xbf16> to vector<8x32xbf16>
    %5 = vector.extract_strided_slice %3 {offsets = [0, 32], sizes = [8, 32], strides = [1, 1]} : vector<8x64xbf16> to vector<8x32xbf16>
    %6 = vector.extract_strided_slice %1 {offsets = [0, 0], sizes = [16, 8], strides = [1, 1]} : vector<16x32xbf16> to vector<16x8xbf16>
    %7 = vector.extract_strided_slice %4 {offsets = [0, 0], sizes = [8, 8], strides = [1, 1]} : vector<8x32xbf16> to vector<8x8xbf16>
    %8 = vector.extract_strided_slice %5 {offsets = [0, 0], sizes = [8, 8], strides = [1, 1]} : vector<8x32xbf16> to vector<8x8xbf16>
    %cst = arith.constant dense<0.000000e+00> : vector<16x8xf32>
    %9 = tpu.matmul %6, %7, %cst {dimension_numbers = #tpu.dot_dimension_numbers<[1], [1], [0], [0], [0, 0, 1, 0], [], []>} : vector<16x8xbf16>, vector<8x8xbf16>, vector<16x8xf32> -> vector<16x8xf32>
    %cst_5 = arith.constant 0.353553385 : f32
    %10 = vector.broadcast %cst_5 : f32 to vector<16x8xf32>
    %11 = arith.mulf %9, %10 : vector<16x8xf32>
    %cst_6 = arith.constant dense<0xFF800000> : vector<16xf32>
    %12 = vector.multi_reduction <maximumf>, %11, %cst_6 [1] : vector<16x8xf32> to vector<16xf32>
    %13 = vector.shape_cast %12 : vector<16xf32> to vector<16x1xf32>
    %14 = vector.broadcast %13 : vector<16x1xf32> to vector<16x8xf32>
    %15 = arith.subf %11, %14 : vector<16x8xf32>
    %16 = math.exp %15 : vector<16x8xf32>
    %cst_7 = arith.constant dense<0.000000e+00> : vector<16xf32>
    %17 = vector.multi_reduction <add>, %16, %cst_7 [1] : vector<16x8xf32> to vector<16xf32>
    %18 = vector.shape_cast %17 : vector<16xf32> to vector<16x1xf32>
    %19 = tpu.reciprocal %18 {approx = true} : vector<16x1xf32> -> vector<16x1xf32>
    %20 = vector.broadcast %19 : vector<16x1xf32> to vector<16x8xf32>
    %21 = arith.mulf %16, %20 : vector<16x8xf32>
    %22 = arith.truncf %21 : vector<16x8xf32> to vector<16x8xbf16>
    %cst_8 = arith.constant dense<0.000000e+00> : vector<16x8xf32>
    %23 = tpu.matmul %22, %8, %cst_8 {dimension_numbers = #tpu.dot_dimension_numbers<[1], [0], [0], [1], [0, 0, 1, 1], [], []>} : vector<16x8xbf16>, vector<8x8xbf16>, vector<16x8xf32> -> vector<16x8xf32>
    %24 = vector.extract_strided_slice %1 {offsets = [0, 8], sizes = [16, 8], strides = [1, 1]} : vector<16x32xbf16> to vector<16x8xbf16>
    %25 = vector.extract_strided_slice %4 {offsets = [0, 8], sizes = [8, 8], strides = [1, 1]} : vector<8x32xbf16> to vector<8x8xbf16>
    %26 = vector.extract_strided_slice %5 {offsets = [0, 8], sizes = [8, 8], strides = [1, 1]} : vector<8x32xbf16> to vector<8x8xbf16>
    %cst_9 = arith.constant dense<0.000000e+00> : vector<16x8xf32>
    %27 = tpu.matmul %24, %25, %cst_9 {dimension_numbers = #tpu.dot_dimension_numbers<[1], [1], [0], [0], [0, 0, 1, 0], [], []>} : vector<16x8xbf16>, vector<8x8xbf16>, vector<16x8xf32> -> vector<16x8xf32>
    %cst_10 = arith.constant 0.353553385 : f32
    %28 = vector.broadcast %cst_10 : f32 to vector<16x8xf32>
    %29 = arith.mulf %27, %28 : vector<16x8xf32>
    %cst_11 = arith.constant dense<0xFF800000> : vector<16xf32>
    %30 = vector.multi_reduction <maximumf>, %29, %cst_11 [1] : vector<16x8xf32> to vector<16xf32>
    %31 = vector.shape_cast %30 : vector<16xf32> to vector<16x1xf32>
    %32 = vector.broadcast %31 : vector<16x1xf32> to vector<16x8xf32>
    %33 = arith.subf %29, %32 : vector<16x8xf32>
    %34 = math.exp %33 : vector<16x8xf32>
    %cst_12 = arith.constant dense<0.000000e+00> : vector<16xf32>
    %35 = vector.multi_reduction <add>, %34, %cst_12 [1] : vector<16x8xf32> to vector<16xf32>
    %36 = vector.shape_cast %35 : vector<16xf32> to vector<16x1xf32>
    %37 = tpu.reciprocal %36 {approx = true} : vector<16x1xf32> -> vector<16x1xf32>
    %38 = vector.broadcast %37 : vector<16x1xf32> to vector<16x8xf32>
    %39 = arith.mulf %34, %38 : vector<16x8xf32>
    %40 = arith.truncf %39 : vector<16x8xf32> to vector<16x8xbf16>
    %cst_13 = arith.constant dense<0.000000e+00> : vector<16x8xf32>
    %41 = tpu.matmul %40, %26, %cst_13 {dimension_numbers = #tpu.dot_dimension_numbers<[1], [0], [0], [1], [0, 0, 1, 1], [], []>} : vector<16x8xbf16>, vector<8x8xbf16>, vector<16x8xf32> -> vector<16x8xf32>
    %42 = vector.extract_strided_slice %1 {offsets = [0, 16], sizes = [16, 8], strides = [1, 1]} : vector<16x32xbf16> to vector<16x8xbf16>
    %43 = vector.extract_strided_slice %4 {offsets = [0, 16], sizes = [8, 8], strides = [1, 1]} : vector<8x32xbf16> to vector<8x8xbf16>
    %44 = vector.extract_strided_slice %5 {offsets = [0, 16], sizes = [8, 8], strides = [1, 1]} : vector<8x32xbf16> to vector<8x8xbf16>
    %cst_14 = arith.constant dense<0.000000e+00> : vector<16x8xf32>
    %45 = tpu.matmul %42, %43, %cst_14 {dimension_numbers = #tpu.dot_dimension_numbers<[1], [1], [0], [0], [0, 0, 1, 0], [], []>} : vector<16x8xbf16>, vector<8x8xbf16>, vector<16x8xf32> -> vector<16x8xf32>
    %cst_15 = arith.constant 0.353553385 : f32
    %46 = vector.broadcast %cst_15 : f32 to vector<16x8xf32>
    %47 = arith.mulf %45, %46 : vector<16x8xf32>
    %cst_16 = arith.constant dense<0xFF800000> : vector<16xf32>
    %48 = vector.multi_reduction <maximumf>, %47, %cst_16 [1] : vector<16x8xf32> to vector<16xf32>
    %49 = vector.shape_cast %48 : vector<16xf32> to vector<16x1xf32>
    %50 = vector.broadcast %49 : vector<16x1xf32> to vector<16x8xf32>
    %51 = arith.subf %47, %50 : vector<16x8xf32>
    %52 = math.exp %51 : vector<16x8xf32>
    %cst_17 = arith.constant dense<0.000000e+00> : vector<16xf32>
    %53 = vector.multi_reduction <add>, %52, %cst_17 [1] : vector<16x8xf32> to vector<16xf32>
    %54 = vector.shape_cast %53 : vector<16xf32> to vector<16x1xf32>
    %55 = tpu.reciprocal %54 {approx = true} : vector<16x1xf32> -> vector<16x1xf32>
    %56 = vector.broadcast %55 : vector<16x1xf32> to vector<16x8xf32>
    %57 = arith.mulf %52, %56 : vector<16x8xf32>
    %58 = arith.truncf %57 : vector<16x8xf32> to vector<16x8xbf16>
    %cst_18 = arith.constant dense<0.000000e+00> : vector<16x8xf32>
    %59 = tpu.matmul %58, %44, %cst_18 {dimension_numbers = #tpu.dot_dimension_numbers<[1], [0], [0], [1], [0, 0, 1, 1], [], []>} : vector<16x8xbf16>, vector<8x8xbf16>, vector<16x8xf32> -> vector<16x8xf32>
    %60 = vector.extract_strided_slice %1 {offsets = [0, 24], sizes = [16, 8], strides = [1, 1]} : vector<16x32xbf16> to vector<16x8xbf16>
    %61 = vector.extract_strided_slice %4 {offsets = [0, 24], sizes = [8, 8], strides = [1, 1]} : vector<8x32xbf16> to vector<8x8xbf16>
    %62 = vector.extract_strided_slice %5 {offsets = [0, 24], sizes = [8, 8], strides = [1, 1]} : vector<8x32xbf16> to vector<8x8xbf16>
    %cst_19 = arith.constant dense<0.000000e+00> : vector<16x8xf32>
    %63 = tpu.matmul %60, %61, %cst_19 {dimension_numbers = #tpu.dot_dimension_numbers<[1], [1], [0], [0], [0, 0, 1, 0], [], []>} : vector<16x8xbf16>, vector<8x8xbf16>, vector<16x8xf32> -> vector<16x8xf32>
    %cst_20 = arith.constant 0.353553385 : f32
    %64 = vector.broadcast %cst_20 : f32 to vector<16x8xf32>
    %65 = arith.mulf %63, %64 : vector<16x8xf32>
    %cst_21 = arith.constant dense<0xFF800000> : vector<16xf32>
    %66 = vector.multi_reduction <maximumf>, %65, %cst_21 [1] : vector<16x8xf32> to vector<16xf32>
    %67 = vector.shape_cast %66 : vector<16xf32> to vector<16x1xf32>
    %68 = vector.broadcast %67 : vector<16x1xf32> to vector<16x8xf32>
    %69 = arith.subf %65, %68 : vector<16x8xf32>
    %70 = math.exp %69 : vector<16x8xf32>
    %cst_22 = arith.constant dense<0.000000e+00> : vector<16xf32>
    %71 = vector.multi_reduction <add>, %70, %cst_22 [1] : vector<16x8xf32> to vector<16xf32>
    %72 = vector.shape_cast %71 : vector<16xf32> to vector<16x1xf32>
    %73 = tpu.reciprocal %72 {approx = true} : vector<16x1xf32> -> vector<16x1xf32>
    %74 = vector.broadcast %73 : vector<16x1xf32> to vector<16x8xf32>
    %75 = arith.mulf %70, %74 : vector<16x8xf32>
    %76 = arith.truncf %75 : vector<16x8xf32> to vector<16x8xbf16>
    %cst_23 = arith.constant dense<0.000000e+00> : vector<16x8xf32>
    %77 = tpu.matmul %76, %62, %cst_23 {dimension_numbers = #tpu.dot_dimension_numbers<[1], [0], [0], [1], [0, 0, 1, 1], [], []>} : vector<16x8xbf16>, vector<8x8xbf16>, vector<16x8xf32> -> vector<16x8xf32>
    %78 = tpu.concatenate %23, %41, %59, %77 in 1 : vector<16x8xf32>, vector<16x8xf32>, vector<16x8xf32>, vector<16x8xf32> -> vector<16x32xf32>
    %79 = arith.truncf %78 : vector<16x32xf32> to vector<16x32xbf16>
    %c0_24 = arith.constant 0 : index
    %c0_25 = arith.constant 0 : index
    %c0_26 = arith.constant 0 : index
    %80 = vector.load %arg4[%c0_24, %c0_25, %c0_26] : memref<1x16x32xbf16, #tpu.memory_space<vmem>>, vector<1x16x32xbf16>
    %81 = vector.shape_cast %80 : vector<1x16x32xbf16> to vector<16x32xbf16>
    %82 = vector.shape_cast %79 : vector<16x32xbf16> to vector<1x16x32xbf16>
    tpu.vector_store %arg4[%c0_24, %c0_25, %c0_26], %82 {strides = array<i32>} : memref<1x16x32xbf16, #tpu.memory_space<vmem>>, vector<1x16x32xbf16>,
    return
  }
  func.func @transform_0(%arg0: i32, %arg1: i32) -> (i32, i32, i32) {
    %c0_i32 = arith.constant 0 : i32
    %c0_i32_0 = arith.constant 0 : i32
    return %arg0, %arg1, %c0_i32 : i32, i32, i32
  }
  func.func @transform_1(%arg0: i32, %arg1: i32) -> (i32, i32, i32) {
    %c0_i32 = arith.constant 0 : i32
    %c0_i32_0 = arith.constant 0 : i32
    %c0_i32_1 = arith.constant 0 : i32
    return %arg0, %c0_i32, %c0_i32_0 : i32, i32, i32
  }
  func.func @transform_2(%arg0: i32, %arg1: i32) -> (i32, i32, i32) {
    %c0_i32 = arith.constant 0 : i32
    %c0_i32_0 = arith.constant 0 : i32
    return %arg0, %arg1, %c0_i32 : i32, i32, i32
  }
}

module attributes {stable_mosaic.version = 11 : i64} {
  func.func @_layernorm_kernel(%arg0: i32, %arg1: memref<32x32xf32, #tpu.memory_space<vmem>>, %arg2: memref<1x32xf32, #tpu.memory_space<vmem>>, %arg3: memref<1x32xf32, #tpu.memory_space<vmem>>, %arg4: memref<32x32xf32, #tpu.memory_space<vmem>>) attributes {dimension_semantics = [#tpu.dimension_semantics<parallel>], iteration_bounds = array<i64: 1>, scalar_prefetch = 0 : i64, scratch_operands = 0 : i64, tpu.core_type = #tpu.core_type<tc>, window_params = [{transform_indices = @transform_0, window_bounds = array<i64: 32, 32>}, {pipeline_mode = #tpu.pipeline_mode<synchronous>, transform_indices = @transform_1, window_bounds = array<i64: 1, 32>}, {pipeline_mode = #tpu.pipeline_mode<synchronous>, transform_indices = @transform_2, window_bounds = array<i64: 1, 32>}, {transform_indices = @transform_3, window_bounds = array<i64: 32, 32>}]} {
    %c0 = arith.constant 0 : index
    %c0_0 = arith.constant 0 : index
    %0 = vector.load %arg1[%c0, %c0_0] : memref<32x32xf32, #tpu.memory_space<vmem>>, vector<32x32xf32>
    %cst = arith.constant dense<0.000000e+00> : vector<32xf32>
    %1 = vector.multi_reduction <add>, %0, %cst [1] : vector<32x32xf32> to vector<32xf32>
    %2 = vector.shape_cast %1 : vector<32xf32> to vector<32x1xf32>
    %cst_1 = arith.constant 3.200000e+01 : f32
    %3 = vector.broadcast %cst_1 : f32 to vector<32x1xf32>
    %4 = arith.divf %2, %3 : vector<32x1xf32>
    %5 = vector.broadcast %4 : vector<32x1xf32> to vector<32x32xf32>
    %6 = arith.subf %0, %5 : vector<32x32xf32>
    %7 = arith.mulf %6, %6 : vector<32x32xf32>
    %cst_2 = arith.constant dense<0.000000e+00> : vector<32xf32>
    %8 = vector.multi_reduction <add>, %7, %cst_2 [1] : vector<32x32xf32> to vector<32xf32>
    %9 = vector.shape_cast %8 : vector<32xf32> to vector<32x1xf32>
    %cst_3 = arith.constant 3.200000e+01 : f32
    %10 = vector.broadcast %cst_3 : f32 to vector<32x1xf32>
    %11 = arith.divf %9, %10 : vector<32x1xf32>
    %cst_4 = arith.constant 9.99999974E-6 : f32
    %12 = vector.broadcast %cst_4 : f32 to vector<32x1xf32>
    %13 = arith.addf %11, %12 : vector<32x1xf32>
    %14 = math.rsqrt %13 : vector<32x1xf32>
    %15 = vector.broadcast %14 : vector<32x1xf32> to vector<32x32xf32>
    %16 = arith.mulf %6, %15 : vector<32x32xf32>
    %c0_5 = arith.constant 0 : index
    %c0_6 = arith.constant 0 : index
    %17 = vector.load %arg2[%c0_5, %c0_6] : memref<1x32xf32, #tpu.memory_space<vmem>>, vector<1x32xf32>
    %18 = vector.broadcast %17 : vector<1x32xf32> to vector<32x32xf32>
    %19 = arith.mulf %16, %18 : vector<32x32xf32>
    %c0_7 = arith.constant 0 : index
    %c0_8 = arith.constant 0 : index
    %20 = vector.load %arg3[%c0_7, %c0_8] : memref<1x32xf32, #tpu.memory_space<vmem>>, vector<1x32xf32>
    %21 = vector.broadcast %20 : vector<1x32xf32> to vector<32x32xf32>
    %22 = arith.addf %19, %21 : vector<32x32xf32>
    %c0_9 = arith.constant 0 : index
    %c0_10 = arith.constant 0 : index
    %23 = vector.load %arg4[%c0_9, %c0_10] : memref<32x32xf32, #tpu.memory_space<vmem>>, vector<32x32xf32>
    tpu.vector_store %arg4[%c0_9, %c0_10], %22 {strides = array<i32>} : memref<32x32xf32, #tpu.memory_space<vmem>>, vector<32x32xf32>,
    return
  }
  func.func @transform_0(%arg0: i32) -> (i32, i32) {
    %c0_i32 = arith.constant 0 : i32
    %c0_i32_0 = arith.constant 0 : i32
    return %arg0, %c0_i32 : i32, i32
  }
  func.func @transform_1(%arg0: i32) -> (i32, i32) {
    %c0_i32 = arith.constant 0 : i32
    %c0_i32_0 = arith.constant 0 : i32
    %c0_i32_1 = arith.constant 0 : i32
    return %c0_i32, %c0_i32_0 : i32, i32
  }
  func.func @transform_2(%arg0: i32) -> (i32, i32) {
    %c0_i32 = arith.constant 0 : i32
    %c0_i32_0 = arith.constant 0 : i32
    %c0_i32_1 = arith.constant 0 : i32
    return %c0_i32, %c0_i32_0 : i32, i32
  }
  func.func @transform_3(%arg0: i32) -> (i32, i32) {
    %c0_i32 = arith.constant 0 : i32
    %c0_i32_0 = arith.constant 0 : i32
    return %arg0, %c0_i32 : i32, i32
  }
}

module attributes {stable_mosaic.version = 11 : i64} {
  func.func @_matmul_bias_kernel(%arg0: i32, %arg1: memref<32x32xf32, #tpu.memory_space<vmem>>, %arg2: memref<32x4xbf16, #tpu.memory_space<vmem>>, %arg3: memref<1x4xf32, #tpu.memory_space<vmem>>, %arg4: memref<32x4xf32, #tpu.memory_space<vmem>>) attributes {dimension_semantics = [#tpu.dimension_semantics<parallel>], iteration_bounds = array<i64: 1>, scalar_prefetch = 0 : i64, scratch_operands = 0 : i64, tpu.core_type = #tpu.core_type<tc>, window_params = [{transform_indices = @transform_0, window_bounds = array<i64: 32, 32>}, {pipeline_mode = #tpu.pipeline_mode<synchronous>, transform_indices = @transform_1, window_bounds = array<i64: 32, 4>}, {pipeline_mode = #tpu.pipeline_mode<synchronous>, transform_indices = @transform_2, window_bounds = array<i64: 1, 4>}, {transform_indices = @transform_3, window_bounds = array<i64: 32, 4>}]} {
    %c0 = arith.constant 0 : index
    %c0_0 = arith.constant 0 : index
    %0 = vector.load %arg1[%c0, %c0_0] : memref<32x32xf32, #tpu.memory_space<vmem>>, vector<32x32xf32>
    %1 = arith.truncf %0 : vector<32x32xf32> to vector<32x32xbf16>
    %c0_1 = arith.constant 0 : index
    %c0_2 = arith.constant 0 : index
    %2 = vector.load %arg2[%c0_1, %c0_2] : memref<32x4xbf16, #tpu.memory_space<vmem>>, vector<32x4xbf16>
    %cst = arith.constant dense<0.000000e+00> : vector<32x4xf32>
    %3 = tpu.matmul %1, %2, %cst {dimension_numbers = #tpu.dot_dimension_numbers<[1], [0], [0], [1], [0, 0, 1, 1], [], []>} : vector<32x32xbf16>, vector<32x4xbf16>, vector<32x4xf32> -> vector<32x4xf32>
    %c0_3 = arith.constant 0 : index
    %c0_4 = arith.constant 0 : index
    %4 = vector.load %arg3[%c0_3, %c0_4] : memref<1x4xf32, #tpu.memory_space<vmem>>, vector<1x4xf32>
    %5 = vector.broadcast %4 : vector<1x4xf32> to vector<32x4xf32>
    %6 = arith.addf %3, %5 : vector<32x4xf32>
    %c0_5 = arith.constant 0 : index
    %c0_6 = arith.constant 0 : index
    %7 = vector.load %arg4[%c0_5, %c0_6] : memref<32x4xf32, #tpu.memory_space<vmem>>, vector<32x4xf32>
    tpu.vector_store %arg4[%c0_5, %c0_6], %6 {strides = array<i32>} : memref<32x4xf32, #tpu.memory_space<vmem>>, vector<32x4xf32>,
    return
  }
  func.func @transform_0(%arg0: i32) -> (i32, i32) {
    %c0_i32 = arith.constant 0 : i32
    %c0_i32_0 = arith.constant 0 : i32
    return %arg0, %c0_i32 : i32, i32
  }
  func.func @transform_1(%arg0: i32) -> (i32, i32) {
    %c0_i32 = arith.constant 0 : i32
    %c0_i32_0 = arith.constant 0 : i32
    %c0_i32_1 = arith.constant 0 : i32
    return %c0_i32, %c0_i32_0 : i32, i32
  }
  func.func @transform_2(%arg0: i32) -> (i32, i32) {
    %c0_i32 = arith.constant 0 : i32
    %c0_i32_0 = arith.constant 0 : i32
    %c0_i32_1 = arith.constant 0 : i32
    return %c0_i32, %c0_i32_0 : i32, i32
  }
  func.func @transform_3(%arg0: i32) -> (i32, i32) {
    %c0_i32 = arith.constant 0 : i32
    %c0_i32_0 = arith.constant 0 : i32
    return %arg0, %c0_i32 : i32, i32
  }
}

</mosaic_0001>

<bundles_post_ra>
// kernel: informer_forward.32
= control target key start
LH: loop header
LB: loop body
LE: loop exit
PB: predicated region body
PF: predicated region fallthrough
CT: control target
= control target key end

     0   :  { %s562_s15 = smov 0   ;;  %s607_s0 = inlined_call_operand.vmem [shape: f32[2,16,4], index: 0, kind: input, shape index: {}]   ;;  %s608_s1 = inlined_call_operand.vmem [shape: bf16[3,4,32], index: 1, kind: input, shape index: {}]   ;;  %s609_s2 = inlined_call_operand.vmem [shape: f32[1,32], index: 2, kind: input, shape index: {}]   ;;  %s610_s3 = inlined_call_operand.vmem [shape: f32[1,32], index: 3, kind: input, shape index: {}]   ;;  %s611_s4 = inlined_call_operand.vmem [shape: bf16[2,16,32], index: 4, kind: output, shape index: {}]  }
   0x1 LB: > { %s469_s16 = sadd.s32 4294967295, %s533_s15   ;;  %p473_p0 = scmp.ge.s32.totalorder %s533_s15, 1  ;;  %s533_s15 = sphi %s562_s15, %s14_s15  }
   0x2   : > { %p162_p1 = scmp.lt.s32.totalorder %s533_s15, 3 }
   0x4   : > { %p163_p2 = pnand %p473_p0, %p162_p1 }
   0x5   : > { %p188_p3 = scmp.lt.s32.totalorder (!%p163_p2), %s469_s16, 1 }
   0x6   : > { %166 = sbr.rel (%p163_p2) target bundleno = 246 (0xf6), region = 36 }
   0xb   : > { %v478_v0 = vld [vmem:[%s608_s1 + $0x2] sm:$0x3]  ;;  %vm237_vm0 = vcmask 1041408   ;;  %v217_v1 = vld [vmem:[%s608_s1] sm:$0x3]  ;;  %v535_v2 = vmov 0.0  }
   0xc   : > { %499 = vmatprep.subr.bf16.mxu0 %v535_v2  ;;  %v239_v3 = vsel %vm237_vm0, %v478_v0, 0  ;;  %505 = vmatprep.subr.bf16.mxu1 %v535_v2  ;;  %v285_v4 = vsel %vm237_vm0, %v217_v1, 0  ;;  %vm536_vm1 = vmmov 0   ;;  %s613_s16 = smov (!%p188_p3, %s469_s16), 1  ;;  %vm212_vm2 = vcmask 1040384  }
   0xd   : > { %500 = vmatpush3.bf16.msra.mxu0 %v239_v3  ;;  %506 = vmatpush3.bf16.msra.mxu1 %v285_v4  ;;  %s489_s21 = sshll.u32 %s613_s16, 4  ;;  %vm213_vm3 = vsmask.f32 256  ;;  %vm233_vm5 = vcmask 31744   ;;  %v481_v19 = vld [vmem:[%s608_s1 + $0x4] sm:$0x3] }
   0xe   : > { %501 = vmatprep.mubr.msk.bf16.mxu0 %vm536_vm1, %v535_v2  ;;  %507 = vmatprep.mubr.msk.bf16.mxu1 %vm536_vm1, %v535_v2  ;;  %s192_s24 = scalar_lea.vmem %s607_s0, %s489_s21  ;;  %vm214_vm4 = vmand %vm212_vm2, %vm213_vm3  ;;  %vm220_vm6 = vsmask.f32 7424  ;;  %v340_v21 = vsel %vm237_vm0, %v481_v19, 0  ;;  %vm332_vm7 = vcmask 1046528   ;;  %v483_v36 = vld [vmem:[%s609_s2] ss:$0 sm:$0xff] }
   0xf   : > { %511 = vmatprep.subr.bf16.mxu0 %v535_v2  ;;  %v199_v5 = vld [vmem:[%s192_s24] sm:$0xff]  ;;  %v200_v6 = vld [vmem:[%s192_s24 + $0x8] sm:$0xff]  ;;  %s490_s5 = sshll.u32 %s613_s16, 3  ;;  %vm411_vm8 = vcmask 257024  }
  0x10   : > { %v201_v7 = vpack.c.bf16 %v200_v6, %v199_v5  ;;  %v484_v38 = vld [vmem:[%s610_s3] ss:$0 sm:$0xff]  ;;  %s197_s8 = scalar_lea.vmem %s611_s4, %s490_s5 }
  0x12   : > { %v203_v8 = vshrl.u32 %v201_v7, 16  ;;  %v207_v9 = vshll.u32 %v201_v7, 16 }
  0x14   : > { %v205_v10 = vrot.slane %v203_v8, 7 }
  0x16   : > { %v209_v11 = vor.u32 %v207_v9, %v205_v10  ;;  %v216_v12 = vsel %vm214_vm4, %v205_v10, %v207_v9 }
  0x17   : > { %v229_v13 = vshll.u32 %v216_v12, 16  ;;  %v334_v24 = vrot.slane %v216_v12, 1 }
  0x18   : > { %v215_v14 = vsel %vm214_vm4, %v205_v10, %v209_v11 }
  0x19   : > { %v222_v15 = vshrl.u32 %v215_v14, 16  ;;  %v224_v16 = vshll.u32 %v215_v14, 16  ;;  %508 = vmatmul.mubr.msk.bf16.vlgmr.msra.gmra.mxu1 %vm233_vm5, %v215_v14  ;;  %v231_v18 = vrot.slane %v229_v13, 1  ;;  %v333_v23 = vrot.slane %v215_v14, 1 }
  0x1b   : > { %v226_v17 = vrot.slane %v224_v16, 1  ;;  %v335_v25 = vsel %vm332_vm7, %v333_v23, %v334_v24 }
  0x1d   : > { %v227_v20 = vor.u32 %v226_v17, %v222_v15 }
  0x1f   : > { %v232_v22 = vsel %vm220_vm6, %v227_v20, %v231_v18 }
  0x20   : > { %502 = vmatmul.mubr.msk.bf16.vlgmr.msra.gmra.mxu0 %vm233_vm5, %v232_v22 }
  0x21   : > { %512 = vmatpush3.bf16.msra.mxu0 %v340_v21  ;;  %513 = vmatprep.mubr.msk.bf16.mxu0 %vm536_vm1, %v535_v2 }
  0x28   : > { %514 = vmatmul.mubr.msk.bf16.vlgmr.msra.gmra.mxu0 %vm233_vm5, %v335_v25 }
  0xd9   : > { %v321_v26 = vpop.f32.mrf.mxu1 }
  0xdb   : > { %v509_v27 = vpop.f32.mrf.mxu1 }
  0xdd   : > { %v324_v28 = vpop.f32.mrf.mxu1 }
  0xdf   : > { %v510_v29 = vpop.f32.mrf.mxu1 }
  0xe0   : > { %v275_v30 = vpop.f32.mrf.mxu0 }
  0xe1   : > { %v322_v34 = vadd.f32 %v321_v26, %v275_v30 }
  0xe2   : > { %v503_v31 = vpop.f32.mrf.mxu0 }
  0xe4   : > { %v278_v32 = vpop.f32.mrf.mxu0 }
  0xe5   : > { %v325_v40 = vadd.f32 %v324_v28, %v278_v32 }
  0xe6   : > { %v504_v33 = vpop.f32.mrf.mxu0 }
  0xe8   : > { %v376_v35 = vpop.f32.mrf.mxu0 }
  0xe9   : > { %v383_v37 = vadd.f32 %v376_v35, %v322_v34 }
  0xea   : > { %v515_v39 = vpop.f32.mrf.mxu0 }
  0xeb   : > { %v392_v41 = vmul.f32 %v483_v36, %v383_v37 }
  0xec   : > { %v379_v42 = vpop.f32.mrf.mxu0 }
  0xed   : > { %v401_v43 = vadd.f32 %v484_v38, %v392_v41  ;;  %v384_v44 = vadd.f32 %v379_v42, %v325_v40 }
  0xee   : > { %v516_v45 = vpop.f32.mrf.mxu0 }
  0xef   : > { %v491_v46 = vpack.c.bf16 %v401_v43, %v401_v43  ;;  %v393_v47 = vmul.f32 %v483_v36, %v384_v44 }
  0xf1   : > { %412 = vst.msk [vmem:[%s197_s8] sm:$0xf] %vm411_vm8, %v491_v46  ;;  %v402_v48 = vadd.f32 %v484_v38, %v393_v47 }
  0xf3   : > { %v492_v49 = vpack.c.bf16 %v402_v48, %v402_v48 }
  0xf5   : > { %413 = vst.msk [vmem:[%s197_s8 + $0x4] sm:$0xf] %vm411_vm8, %v492_v49 }
  0xf6 PF: > { %s14_s15 = sadd.s32 1, %s533_s15  }
  0xf7   : > { %p11_p4 = scmp.ge.s32.totalorder %s14_s15, 4  }
  0xf9   :  { %13 = sbr.rel (!%p11_p4) target bundleno = 1 (0x1), region = 68 }

// kernel: informer_forward.33
= control target key start
LH: loop header
LB: loop body
LE: loop exit
PB: predicated region body
PF: predicated region fallthrough
CT: control target
= control target key end

     0   :  { %s781_s15 = smov 0   ;;  %s848_s0 = inlined_call_operand.vmem [shape: f32[2,16,32], index: 0, kind: input, shape index: {}]   ;;  %s849_s1 = inlined_call_operand.vmem [shape: bf16[5,32,96], index: 1, kind: input, shape index: {}]   ;;  %s850_s2 = inlined_call_operand.vmem [shape: f32[1,96], index: 2, kind: input, shape index: {}]   ;;  %s851_s3 = inlined_call_operand.vmem [shape: f32[1,96], index: 3, kind: input, shape index: {}]   ;;  %s852_s4 = inlined_call_operand.vmem [shape: bf16[2,16,96], index: 4, kind: output, shape index: {}]  }
   0x1 LB: > { %s621_s16 = sadd.s32 4294967295, %s752_s15   ;;  %p625_p0 = scmp.ge.s32.totalorder %s752_s15, 1  ;;  %s752_s15 = sphi %s781_s15, %s14_s15  }
   0x2   : > { %p162_p1 = scmp.lt.s32.totalorder %s752_s15, 3 }
   0x4   : > { %p163_p2 = pnand %p625_p0, %p162_p1 }
   0x5   : > { %p188_p3 = scmp.lt.s32.totalorder (!%p163_p2), %s621_s16, 1 }
   0x6   : > { %166 = sbr.rel (%p163_p2) target bundleno = 248 (0xf8), region = 36 }
   0xb   : > { %v736_v0 = vld [vmem:[%s849_s1 + $0x18] sm:$0xff]   ;;  %v754_v1 = vmov 0.0   ;;  %v737_v2 = vld [vmem:[%s849_s1 + $0x8] sm:$0xff]   ;;  %v738_v3 = vld [vmem:[%s849_s1 + $0x10] sm:$0xff]   ;;  %vm755_vm0 = vmmov 0   ;;  %s854_s16 = smov (!%p188_p3, %s621_s16), 1 }
   0xc   : > { %686 = vmatprep.subr.bf16.mxu0 %v754_v1  ;;  %694 = vmatprep.subr.bf16.mxu1 %v754_v1  ;;  %v739_v4 = vld [vmem:[%s849_s1] sm:$0xff]   ;;  %s667_s25 = sshll.u32 %s854_s16, 4  ;;  %vm236_vm1 = vcmask 261120   ;;  %v741_v8 = vld [vmem:[%s849_s1 + $0x38] sm:$0xff]   ;;  %v743_v12 = vld [vmem:[%s849_s1 + $0x30] sm:$0xff]   ;;  %s668_s21 = sshll.u32 %s854_s16, 3 }
   0xd   : > { %687 = vmatpush3.bf16.msra.mxu0 %v736_v0  ;;  %690 = vmatprep.mubr.msk.bf16.mxu0 %vm755_vm0, %v754_v1  ;;  %s192_s28 = scalar_lea.vmem %s848_s0, %s667_s25  ;;  %vm216_vm2 = vsmask.f32 7424  ;;  %v740_v17 = vld [vmem:[%s849_s1 + $0x28] sm:$0xff]   ;;  %v742_v20 = vld [vmem:[%s849_s1 + $0x20] sm:$0xff]   ;;  %s197_s24 = scalar_lea.vmem %s852_s4, %s668_s21  ;;  %vm563_vm3 = vcmask 781312  }
   0xe   : > { %695 = vmatpush3.bf16.msra.mxu1 %v737_v2  ;;  %688 = vmatprep.subr.bf16.mxu0 %v754_v1  ;;  %v199_v5 = vld [vmem:[%s192_s28] sm:$0xff]  ;;  %v200_v6 = vld [vmem:[%s192_s28 + $0x8] sm:$0xff] }
   0xf   : > { %696 = vmatprep.subr.bf16.mxu1 %v754_v1  ;;  %698 = vmatprep.mubr.msk.bf16.mxu1 %vm755_vm0, %v754_v1  ;;  %v201_v7 = vpack.c.bf16 %v200_v6, %v199_v5  ;;  %v744_v22 = vld [vmem:[%s849_s1 + $0x48] sm:$0xff]   ;;  %v745_v23 = vld [vmem:[%s849_s1 + $0x40] sm:$0xff]  }
  0x10   : > { %v661_v47 = vld [vmem:[%s850_s2] ss:$0 sm:$0xff] }
  0x11   : > { %689 = vmatpush3.bf16.msra.mxu0 %v738_v3  ;;  %v203_v9 = vrot.slane %v201_v7, 7  ;;  %v662_v49 = vld [vmem:[%s851_s3] ss:$0 sm:$0xff] }
  0x12   : > { %697 = vmatpush3.bf16.msra.mxu1 %v739_v4  ;;  %702 = vmatprep.subr.bf16.mxu0 %v754_v1 }
  0x13   : > { %710 = vmatprep.subr.bf16.mxu1 %v754_v1  ;;  %v217_v10 = vshrl.u32 %v203_v9, 16  ;;  %v219_v11 = vshll.u32 %v203_v9, 16  ;;  %v343_v21 = vrot.slane %v203_v9, 1  ;;  %v477_v24 = vrot.slane %v203_v9, 2 }
  0x15   : > { %699 = vmatmul.mubr.msk.bf16.vlgmr.msra.gmra.mxu1 %vm236_vm1, %v203_v9  ;;  %v221_v13 = vrot.slane %v219_v11, 1  ;;  %v409_v14 = vrot.slane %v217_v10, 1  ;;  %v410_v15 = vrot.slane %v219_v11, 2 }
  0x16   : > { %711 = vmatpush3.bf16.msra.mxu1 %v741_v8  ;;  %714 = vmatprep.mubr.msk.bf16.mxu1 %vm755_vm0, %v754_v1 }
  0x17   : > { %712 = vmatprep.subr.bf16.mxu1 %v754_v1  ;;  %v222_v16 = vor.u32 %v221_v13, %v217_v10  ;;  %v411_v18 = vor.u32 %v410_v15, %v409_v14 }
  0x19   : > { %v223_v19 = vsel %vm216_vm2, %v222_v16, %v221_v13 }
  0x1a   : > { %713 = vmatpush3.bf16.msra.mxu1 %v743_v12  ;;  %691 = vmatmul.mubr.msk.bf16.vlgmr.msra.gmra.mxu0 %vm236_vm1, %v223_v19 }
  0x1b   : > { %703 = vmatpush3.bf16.msra.mxu0 %v740_v17  ;;  %706 = vmatprep.mubr.msk.bf16.mxu0 %vm755_vm0, %v754_v1 }
  0x1c   : > { %704 = vmatprep.subr.bf16.mxu0 %v754_v1 }
  0x1d   : > { %715 = vmatmul.mubr.msk.bf16.vlgmr.msra.gmra.mxu1 %vm236_vm1, %v411_v18 }
  0x1f   : > { %705 = vmatpush3.bf16.msra.mxu0 %v742_v20 }
  0x20   : > { %718 = vmatprep.subr.bf16.mxu0 %v754_v1 }
  0x22   : > { %707 = vmatmul.mubr.msk.bf16.vlgmr.msra.gmra.mxu0 %vm236_vm1, %v343_v21 }
  0x23   : > { %719 = vmatpush3.bf16.msra.mxu0 %v744_v22  ;;  %722 = vmatprep.mubr.msk.bf16.mxu0 %vm755_vm0, %v754_v1 }
  0x24   : > { %720 = vmatprep.subr.bf16.mxu0 %v754_v1 }
  0x27   : > { %721 = vmatpush3.bf16.msra.mxu0 %v745_v23 }
  0x2a   : > { %723 = vmatmul.mubr.msk.bf16.vlgmr.msra.gmra.mxu0 %vm236_vm1, %v477_v24 }
  0xd5   : > { %v329_v25 = vpop.f32.mrf.mxu1 }
  0xd7   : > { %v700_v26 = vpop.f32.mrf.mxu1 }
  0xd9   : > { %v332_v27 = vpop.f32.mrf.mxu1 }
  0xda   : > { %v274_v29 = vpop.f32.mrf.mxu0 }
  0xdb   : > { %v701_v28 = vpop.f32.mrf.mxu1  ;;  %v330_v38 = vadd.f32 %v329_v25, %v274_v29 }
  0xdc   : > { %v692_v30 = vpop.f32.mrf.mxu0 }
  0xdd   : > { %v462_v31 = vpop.f32.mrf.mxu1 }
  0xde   : > { %v277_v32 = vpop.f32.mrf.mxu0 }
  0xdf   : > { %v716_v33 = vpop.f32.mrf.mxu1  ;;  %v333_v42 = vadd.f32 %v332_v27, %v277_v32 }
  0xe0   : > { %v693_v34 = vpop.f32.mrf.mxu0 }
  0xe1   : > { %v465_v35 = vpop.f32.mrf.mxu1 }
  0xe2   : > { %v394_v36 = vpop.f32.mrf.mxu0 }
  0xe3   : > { %v717_v37 = vpop.f32.mrf.mxu1  ;;  %v401_v40 = vadd.f32 %v394_v36, %v330_v38 }
  0xe4   : > { %v708_v39 = vpop.f32.mrf.mxu0 }
  0xe5   : > { %v469_v44 = vadd.f32 %v462_v31, %v401_v40 }
  0xe6   : > { %v397_v41 = vpop.f32.mrf.mxu0 }
  0xe7   : > { %v402_v45 = vadd.f32 %v397_v41, %v333_v42 }
  0xe8   : > { %v709_v43 = vpop.f32.mrf.mxu0 }
  0xe9   : > { %v470_v51 = vadd.f32 %v465_v35, %v402_v45 }
  0xea   : > { %v528_v46 = vpop.f32.mrf.mxu0 }
  0xeb   : > { %v535_v48 = vadd.f32 %v528_v46, %v469_v44 }
  0xec   : > { %v724_v50 = vpop.f32.mrf.mxu0 }
  0xed   : > { %v544_v52 = vmul.f32 %v661_v47, %v535_v48 }
  0xee   : > { %v531_v53 = vpop.f32.mrf.mxu0 }
  0xef   : > { %v553_v54 = vadd.f32 %v662_v49, %v544_v52  ;;  %v536_v55 = vadd.f32 %v531_v53, %v470_v51 }
  0xf0   : > { %v725_v56 = vpop.f32.mrf.mxu0 }
  0xf1   : > { %v669_v57 = vpack.c.bf16 %v553_v54, %v553_v54  ;;  %v545_v58 = vmul.f32 %v661_v47, %v536_v55 }
  0xf3   : > { %564 = vst.msk [vmem:[%s197_s24] sm:$0xf] %vm563_vm3, %v669_v57  ;;  %v554_v59 = vadd.f32 %v662_v49, %v545_v58 }
  0xf5   : > { %v670_v60 = vpack.c.bf16 %v554_v59, %v554_v59 }
  0xf7   : > { %565 = vst.msk [vmem:[%s197_s24 + $0x4] sm:$0xf] %vm563_vm3, %v670_v60 }
  0xf8 PF: > { %s14_s15 = sadd.s32 1, %s752_s15  }
  0xf9   : > { %p11_p4 = scmp.ge.s32.totalorder %s14_s15, 4  }
  0xfb   :  { %13 = sbr.rel (!%p11_p4) target bundleno = 1 (0x1), region = 70 }

// kernel: informer_forward.35
= control target key start
LH: loop header
LB: loop body
LE: loop exit
PB: predicated region body
PF: predicated region fallthrough
CT: control target
= control target key end

     0   :  { %vm52_vm0 = vcmask 261120   ;;  %vm124_vm1 = vcmask 257024   ;;  %s211_s1 = inlined_call_operand.vmem [shape: bf16[32,32], index: 1, kind: input, shape index: {}]   ;;  %s212_s0 = inlined_call_operand.vmem [shape: bf16[32,32], index: 0, kind: input, shape index: {}]   ;;  %s213_s2 = inlined_call_operand.vmem [shape: f32[1,32], index: 2, kind: input, shape index: {}]   ;;  %s214_s3 = inlined_call_operand.vmem [shape: bf16[32,32], index: 3, kind: output, shape index: {}]  }
   0x1   :  { %v160_v0 = vld [vmem:[%s211_s1 + $0x8] sm:$0xff]   ;;  %v161_v1 = vld [vmem:[%s211_s1] sm:$0xff]  }
   0x2   :  { %152 = vmatprep.subr.bf16.mxu0 %v160_v0  ;;  %v162_v2 = vld [vmem:[%s212_s0] sm:$0xff]   ;;  %v163_v3 = vld [vmem:[%s212_s0 + $0x8] sm:$0xff]  }
   0x3   :  { %153 = vmatpush3.bf16.msra.mxu0 %v160_v0  ;;  %156 = vmatprep.mubr.msk.bf16.mxu0 %vm52_vm0, %v162_v2  ;;  %v133_v4 = vld [vmem:[%s213_s2] ss:$0 sm:$0xff] }
   0x4   :  { %154 = vmatprep.subr.bf16.mxu0 %v161_v1 }
   0x7   :  { %155 = vmatpush3.bf16.msra.mxu0 %v161_v1 }
   0xa   :  { %157 = vmatmul.mubr.msk.bf16.vlgmr.msra.gmra.mxu0 %vm52_vm0, %v163_v3 }
  0xca   :  { %v158_v5 = vpop.f32.mrf.mxu0 }
  0xcb   :  { %v102_v6 = vadd.f32 %v158_v5, %v133_v4 }
  0xcc   :  { %v93_v7 = vpop.f32.mrf.mxu0 }
  0xcd   :  { %v146_v8 = vpack.c.bf16 %v102_v6, %v102_v6  ;;  %v94_v9 = vadd.f32 %v133_v4, %v93_v7 }
  0xce   :  { %v159_v10 = vpop.f32.mrf.mxu0 }
  0xcf   :  { %127 = vst.msk [vmem:[%s214_s3 + $0x8] sm:$0xf] %vm124_vm1, %v146_v8  ;;  %v144_v11 = vpack.c.bf16 %v94_v9, %v94_v9  ;;  %v105_v12 = vadd.f32 %v159_v10, %v133_v4 }
  0xd0   :  { %v96_v13 = vpop.f32.mrf.mxu0 }
  0xd1   :  { %125 = vst.msk [vmem:[%s214_s3] sm:$0xf] %vm124_vm1, %v144_v11  ;;  %v147_v14 = vpack.c.bf16 %v105_v12, %v105_v12  ;;  %v97_v15 = vadd.f32 %v133_v4, %v96_v13 }
  0xd3   :  { %128 = vst.msk [vmem:[%s214_s3 + $0xc] sm:$0xf] %vm124_vm1, %v147_v14  ;;  %v145_v16 = vpack.c.bf16 %v97_v15, %v97_v15 }
  0xd5   :  { %126 = vst.msk [vmem:[%s214_s3 + $0x4] sm:$0xf] %vm124_vm1, %v145_v16 }

// kernel: informer_forward.34
= control target key start
LH: loop header
LB: loop body
LE: loop exit
PB: predicated region body
PF: predicated region fallthrough
CT: control target
= control target key end

     0   :  { %s1089_s9 = smov 0   ;;  %s1091_s10 = smov 0   ;;  %s1202_s0 = inlined_call_operand.vmem [shape: bf16[2,16,96], index: 0, kind: input, shape index: {}, may-alias: {0,1}]   ;;  %s1203_s1 = inlined_call_operand.vmem [shape: bf16[2,16,96], index: 1, kind: input, shape index: {}, may-alias: {0,1}]   ;;  %s1204_s2 = inlined_call_operand.vmem [shape: bf16[2,16,32], index: 2, kind: output, shape index: {}]  }
   0x1   :  { %s1093_s11 = smov 0  }
   0x2 LB: > { %s24_s12 = sadd.s32 1, %s1052_s10  ;;  %p855_p0 = scmp.ge.s32.totalorder %s1056_s11, 1  ;;  %s1056_s11 = sphi %s1093_s11, %s12_s11   ;;  %s1052_s10 = sphi %s1091_s10, %s1206_s10   ;;  %s1048_s9 = sphi %s1089_s9, %s1205_s9  }
   0x3   : > { %p26_p1 = scmp.ge.s32.totalorder %s24_s12, 2  ;;  %p143_p2 = scmp.lt.s32.totalorder %s1056_s11, 3 }
   0x5   : > { %s1208_s12 = smov (%p26_p1, %s24_s12), 0  ;;  %p144_p3 = pnand %p855_p0, %p143_p2 }
   0x6   : > { %p179_p4 = scmp.lt.s32.totalorder (!%p144_p3), %s1048_s9, 1  ;;  %s1060_s20 = smov (!%p144_p3), 96  }
   0x7   : > { %147 = sbr.rel (%p144_p3) target bundleno = 1509 (0x5e5), region = 28  ;;  %s1061_s21 = smov (!%p144_p3), 64  }
   0x8   : > { %s1062_s22 = smov (!%p144_p3), 80   ;;  %s1063_s23 = smov (!%p144_p3), 88  }
   0x9   : > { %s1064_s24 = smov (!%p144_p3), 120   ;;  %s1065_s25 = smov (!%p144_p3), 112  }
   0xa   : > { %s1066_s26 = smov (!%p144_p3), 72   ;;  %s1067_s27 = smov (!%p144_p3), 104  }
   0xb   : > { %s1068_s28 = smov (!%p144_p3), 56   ;;  %s1069_s29 = smov (!%p144_p3), 40  }
   0xc   : > { %v1058_v0 = vmov 0.0   ;;  %vm1059_vm0 = vmmov 0   ;;  %s1210_s9 = smov (!%p179_p4, %s1048_s9), 1  ;;  %vm220_vm1 = vcmask 64512   ;;  %vm270_vm2 = vcmask 130048   ;;  %s1070_s30 = smov 48  }
   0xd   : > { %897 = vmatprep.subr.bf16.mxu0 %v1058_v0  ;;  %899 = vmatprep.mubr.msk.bf16.mxu0 %vm1059_vm0, %v1058_v0  ;;  %s1113_s13 = sshll.u32 %s1210_s9, 3  ;;  %s1071_s3 = smov 8   ;;  %vm738_vm3 = vcmask 195584   ;;  %vm749_vm4 = vcmask 257024  }
   0xe   : > { %903 = vmatprep.subr.bf16.mxu1 %v1058_v0  ;;  %905 = vmatprep.mubr.msk.bf16.mxu1 %vm1059_vm0, %v1058_v0  ;;  %s192_s16 = scalar_lea.vmem %s1203_s1, %s1113_s13  ;;  %s186_s19 = scalar_lea.vmem %s1202_s0, %s1113_s13 }
   0xf   : > { %v1119_v1 = vld [vmem:[%s192_s16] sm:$0xff]   ;;  %s1072_s4 = smov 16   ;;  %s1073_s5 = smov 24  }
  0x10   : > { %218 = vrot.lane.b32.xlu0 %v1119_v1, %s1060_s20  ;;  %v1001_v4 = vld [vmem:[%s186_s19] sm:$0xff]   ;;  %s201_s8 = scalar_lea.vmem %s1204_s2, %s1113_s13 }
  0x82   : > { %v219_v2 = vpop.permute.xlu0 %218 }
  0x83   : > { %v225_v3 = vsel %vm220_vm1, %v219_v2, 0 }
  0x84   : > { %898 = vmatpush3.bf16.xpose.msra.mxu0 %v225_v3 }
  0x85   : > { %915 = vmatprep.subr.bf16.mxu0 %v1058_v0 }
  0x8b   : > { %900 = vmatmul.mubr.msk.bf16.vlgmr.msra.gmra.mxu0 %vm220_vm1, %v1001_v4 }
  0x8c   : > { %917 = vmatprep.mubr.msk.bf16.mxu0 %vm1059_vm0, %v1058_v0 }
 0x14b   : > { %v261_v5 = vpop.f32.mrf.mxu0 }
 0x14c   : > { %v268_v6 = vmul.f32 0.35355338, %v261_v5 }
 0x14d   : > { %v901_v7 = vpop.f32.mrf.mxu0 }
 0x14e   : > { %v271_v8 = vsel %vm270_vm2, %v268_v6, -inf }
 0x14f   : > { %272 = vmax.xlane.f32.xlu0 %v271_v8  ;;  %v264_v9 = vpop.f32.mrf.mxu0 }
 0x150   : > { %v269_v10 = vmul.f32 0.35355338, %v264_v9 }
 0x151   : > { %v902_v11 = vpop.f32.mrf.mxu0 }
 0x152   : > { %v274_v12 = vsel %vm270_vm2, %v269_v10, -inf }
 0x153   : > { %275 = vmax.xlane.f32.xlu1 %v274_v12 }
 0x164   : > { %294 = vrot.lane.b32.xlu1 %v1119_v1, %s1061_s21 }
 0x165   : > { %466 = vrot.lane.b32.xlu0 %v1119_v1, %s1062_s22 }
 0x1d8   : > { %v273_v13 = vpop.xlane.xlu0 %272 }
 0x1d9   : > { %v277_v14 = vsub.f32 %v268_v6, %v273_v13 }
 0x1db   : > { %v279_v15 = vmul.f32 1.442695, %v277_v14 }
 0x1dc   : > { %v276_v16 = vpop.xlane.xlu1 %275  ;;  %v467_v34 = vpop.permute.xlu0 %466 }
 0x1dd   : > { %1002 = vpow2.f32 %v279_v15  ;;  %v278_v17 = vsub.f32 %v269_v10, %v276_v16  ;;  %v472_v36 = vsel %vm220_vm1, %v467_v34, 0 }
 0x1df   : > { %v281_v18 = vmul.f32 1.442695, %v278_v17 }
 0x1e0   : > { %v295_v19 = vpop.permute.xlu1 %294 }
 0x1e1   : > { %1004 = vpow2.f32 %v281_v18  ;;  %904 = vmatpush3.bf16.msra.mxu1 %v295_v19 }
 0x1e2   : > { %909 = vmatprep.subr.bf16.mxu1 %v1058_v0 }
 0x1ea   : > { %v1003_v20 = vpop.eup %1002 }
 0x1eb   : > { %v283_v21 = vsel %vm270_vm2, %v1003_v20, 0.0 }
 0x1ec   : > { %284 = vadd.xlane.f32.xlu1 %v283_v21 }
 0x1ee   : > { %v1005_v22 = vpop.eup %1004 }
 0x1ef   : > { %v286_v23 = vsel %vm270_vm2, %v1005_v22, 0.0 }
 0x1f0   : > { %287 = vadd.xlane.f32.xlu1 %v286_v23 }
 0x201   : > { %343 = vrot.lane.b32.xlu1 %v1119_v1, %s1063_s23 }
 0x205   : > { %341 = vrot.lane.b32.xlu1 %v1001_v4, %s1064_s24 }
 0x209   : > { %464 = vrot.lane.b32.xlu1 %v1001_v4, %s1065_s25 }
 0x20d   : > { %589 = vrot.lane.b32.xlu1 %v1119_v1, %s1066_s26 }
 0x211   : > { %587 = vrot.lane.b32.xlu1 %v1001_v4, %s1067_s27 }
 0x275   : > { %v285_v24 = vpop.xlane.xlu1 %284 }
 0x276   : > { %1006 = vrcp.f32 %v285_v24 }
 0x279   : > { %v288_v25 = vpop.xlane.xlu1 %287 }
 0x27a   : > { %1008 = vrcp.f32 %v288_v25 }
 0x27d   : > { %v344_v28 = vpop.permute.xlu1 %343 }
 0x27e   : > { %v349_v31 = vsel %vm220_vm1, %v344_v28, 0 }
 0x281   : > { %v342_v33 = vpop.permute.xlu1 %341 }
 0x283   : > { %v1007_v26 = vpop.eup %1006 }
 0x284   : > { %v291_v29 = vmul.f32 %v1007_v26, %v1003_v20 }
 0x285   : > { %v465_v35 = vpop.permute.xlu1 %464 }
 0x287   : > { %v1009_v27 = vpop.eup %1008 }
 0x288   : > { %v292_v30 = vmul.f32 %v1009_v27, %v1005_v22 }
 0x289   : > { %v590_v37 = vpop.permute.xlu1 %589 }
 0x28a   : > { %v293_v32 = vpack.c.bf16 %v292_v30, %v291_v29  ;;  %v595_v38 = vsel %vm220_vm1, %v590_v37, 0 }
 0x28c   : > { %906 = vmatmul.mubr.msk.bf16.vlgmr.msra.gmra.mxu1 %vm270_vm2, %v293_v32 }
 0x28d   : > { %910 = vmatpush3.bf16.xpose.msra.mxu1 %v349_v31  ;;  %911 = vmatprep.mubr.msk.bf16.mxu1 %vm1059_vm0, %v1058_v0  ;;  %v588_v39 = vpop.permute.xlu1 %587 }
 0x28e   : > { %921 = vmatprep.subr.bf16.mxu1 %v1058_v0 }
 0x294   : > { %912 = vmatmul.mubr.msk.bf16.vlgmr.msra.gmra.mxu1 %vm220_vm1, %v342_v33 }
 0x295   : > { %922 = vmatpush3.bf16.xpose.msra.mxu1 %v472_v36  ;;  %923 = vmatprep.mubr.msk.bf16.mxu1 %vm1059_vm0, %v1058_v0 }
 0x296   : > { %933 = vmatprep.subr.bf16.mxu1 %v1058_v0 }
 0x29c   : > { %924 = vmatmul.mubr.msk.bf16.vlgmr.msra.gmra.mxu1 %vm220_vm1, %v465_v35 }
 0x29d   : > { %934 = vmatpush3.bf16.xpose.msra.mxu1 %v595_v38  ;;  %935 = vmatprep.mubr.msk.bf16.mxu1 %vm1059_vm0, %v1058_v0 }
 0x2a4   : > { %936 = vmatmul.mubr.msk.bf16.vlgmr.msra.gmra.mxu1 %vm220_vm1, %v588_v39 }
 0x34c   : > { %v1155_v40 = vpop.f32.mrf.mxu1 }
 0x34e   : > { %v907_v41 = vpop.f32.mrf.mxu1 }
 0x350   : > { %v1157_v42 = vpop.f32.mrf.mxu1 }
 0x352   : > { %v908_v43 = vpop.f32.mrf.mxu1 }
 0x354   : > { %v385_v44 = vpop.f32.mrf.mxu1 }
 0x355   : > { %v392_v45 = vmul.f32 0.35355338, %v385_v44 }
 0x356   : > { %v913_v46 = vpop.f32.mrf.mxu1 }
 0x357   : > { %v394_v47 = vsel %vm270_vm2, %v392_v45, -inf }
 0x358   : > { %395 = vmax.xlane.f32.xlu1 %v394_v47  ;;  %v388_v48 = vpop.f32.mrf.mxu1 }
 0x359   : > { %v393_v49 = vmul.f32 0.35355338, %v388_v48 }
 0x35a   : > { %v914_v50 = vpop.f32.mrf.mxu1 }
 0x35b   : > { %v397_v51 = vsel %vm270_vm2, %v393_v49, -inf }
 0x35c   : > { %398 = vmax.xlane.f32.xlu0 %v397_v51  ;;  %v508_v52 = vpop.f32.mrf.mxu1 }
 0x35d   : > { %v515_v53 = vmul.f32 0.35355338, %v508_v52 }
 0x35e   : > { %v925_v54 = vpop.f32.mrf.mxu1 }
 0x35f   : > { %v517_v55 = vsel %vm270_vm2, %v515_v53, -inf }
 0x360   : > { %518 = vmax.xlane.f32.xlu1 %v517_v55  ;;  %v511_v56 = vpop.f32.mrf.mxu1 }
 0x361   : > { %v516_v57 = vmul.f32 0.35355338, %v511_v56 }
 0x362   : > { %v926_v58 = vpop.f32.mrf.mxu1 }
 0x363   : > { %v520_v59 = vsel %vm270_vm2, %v516_v57, -inf }
 0x364   : > { %521 = vmax.xlane.f32.xlu0 %v520_v59  ;;  %v631_v60 = vpop.f32.mrf.mxu1 }
 0x365   : > { %v638_v61 = vmul.f32 0.35355338, %v631_v60 }
 0x366   : > { %v937_v62 = vpop.f32.mrf.mxu1 }
 0x367   : > { %v640_v63 = vsel %vm270_vm2, %v638_v61, -inf }
 0x368   : > { %641 = vmax.xlane.f32.xlu1 %v640_v63  ;;  %v634_v2 = vpop.f32.mrf.mxu1 }
 0x369   : > { %v639_v3 = vmul.f32 0.35355338, %v634_v2 }
 0x36a   : > { %v938_v4 = vpop.f32.mrf.mxu1 }
 0x36b   : > { %v643_v5 = vsel %vm270_vm2, %v639_v3, -inf }
 0x36c   : > { %644 = vmax.xlane.f32.xlu0 %v643_v5 }
 0x379   : > { %417 = vrot.lane.b32.xlu1 %v1119_v1, %s1068_s28 }
 0x3e1   : > { %v396_v6 = vpop.xlane.xlu1 %395 }
 0x3e2   : > { %v400_v7 = vsub.f32 %v392_v45, %v396_v6 }
 0x3e4   : > { %v402_v8 = vmul.f32 1.442695, %v400_v7 }
 0x3e5   : > { %v399_v9 = vpop.xlane.xlu0 %398 }
 0x3e6   : > { %1010 = vpow2.f32 %v402_v8  ;;  %v401_v10 = vsub.f32 %v393_v49, %v399_v9 }
 0x3e8   : > { %v404_v11 = vmul.f32 1.442695, %v401_v10 }
 0x3e9   : > { %v519_v12 = vpop.xlane.xlu1 %518 }
 0x3ea   : > { %1012 = vpow2.f32 %v404_v11  ;;  %v523_v13 = vsub.f32 %v515_v53, %v519_v12 }
 0x3ec   : > { %v525_v14 = vmul.f32 1.442695, %v523_v13 }
 0x3ed   : > { %v522_v15 = vpop.xlane.xlu0 %521 }
 0x3ee   : > { %1014 = vpow2.f32 %v525_v14  ;;  %v524_v16 = vsub.f32 %v516_v57, %v522_v15 }
 0x3f0   : > { %v527_v17 = vmul.f32 1.442695, %v524_v16 }
 0x3f1   : > { %v642_v18 = vpop.xlane.xlu1 %641 }
 0x3f2   : > { %1016 = vpow2.f32 %v527_v17  ;;  %v646_v19 = vsub.f32 %v638_v61, %v642_v18 }
 0x3f3   : > { %v1011_v20 = vpop.eup %1010 }
 0x3f4   : > { %v648_v21 = vmul.f32 1.442695, %v646_v19  ;;  %v406_v22 = vsel %vm270_vm2, %v1011_v20, 0.0 }
 0x3f5   : > { %v645_v23 = vpop.xlane.xlu0 %644  ;;  %407 = vadd.xlane.f32.xlu1 %v406_v22  ;;  %v418_v24 = vpop.permute.xlu1 %417 }
 0x3f6   : > { %1018 = vpow2.f32 %v648_v21  ;;  %v647_v25 = vsub.f32 %v639_v3, %v645_v23  ;;  %916 = vmatpush3.bf16.msra.mxu0 %v418_v24 }
 0x3f7   : > { %v1013_v26 = vpop.eup %1012  ;;  %927 = vmatprep.subr.bf16.mxu0 %v1058_v0 }
 0x3f8   : > { %v650_v27 = vmul.f32 1.442695, %v647_v25  ;;  %v409_v28 = vsel %vm270_vm2, %v1013_v26, 0.0 }
 0x3f9   : > { %410 = vadd.xlane.f32.xlu0 %v409_v28 }
 0x3fa   : > { %1020 = vpow2.f32 %v650_v27 }
 0x3fb   : > { %v1015_v29 = vpop.eup %1014 }
 0x3fc   : > { %v529_v30 = vsel %vm270_vm2, %v1015_v29, 0.0 }
 0x3fd   : > { %530 = vadd.xlane.f32.xlu1 %v529_v30 }
 0x3ff   : > { %v1017_v31 = vpop.eup %1016 }
 0x400   : > { %v532_v32 = vsel %vm270_vm2, %v1017_v31, 0.0 }
 0x401   : > { %533 = vadd.xlane.f32.xlu0 %v532_v32 }
 0x403   : > { %v1019_v33 = vpop.eup %1018 }
 0x404   : > { %v652_v34 = vsel %vm270_vm2, %v1019_v33, 0.0 }
 0x405   : > { %653 = vadd.xlane.f32.xlu1 %v652_v34 }
 0x407   : > { %v1021_v35 = vpop.eup %1020 }
 0x408   : > { %v655_v36 = vsel %vm270_vm2, %v1021_v35, 0.0 }
 0x409   : > { %656 = vadd.xlane.f32.xlu0 %v655_v36 }
 0x416   : > { %663 = vrot.lane.b32.xlu1 %v1119_v1, %s1069_s29 }
 0x41f   : > { %540 = vrot.lane.b32.xlu0 %v1119_v1, %s1070_s30 }
 0x47e   : > { %v408_v37 = vpop.xlane.xlu1 %407 }
 0x47f   : > { %1022 = vrcp.f32 %v408_v37 }
 0x482   : > { %v411_v38 = vpop.xlane.xlu0 %410 }
 0x483   : > { %1024 = vrcp.f32 %v411_v38 }
 0x486   : > { %v531_v39 = vpop.xlane.xlu1 %530 }
 0x487   : > { %1026 = vrcp.f32 %v531_v39 }
 0x48a   : > { %v534_v41 = vpop.xlane.xlu0 %533 }
 0x48b   : > { %1028 = vrcp.f32 %v534_v41 }
 0x48c   : > { %v1023_v43 = vpop.eup %1022 }
 0x48d   : > { %v414_v46 = vmul.f32 %v1023_v43, %v1011_v20 }
 0x48e   : > { %v654_v44 = vpop.xlane.xlu1 %653 }
 0x48f   : > { %1030 = vrcp.f32 %v654_v44 }
 0x490   : > { %v1025_v45 = vpop.eup %1024 }
 0x491   : > { %v415_v47 = vmul.f32 %v1025_v45, %v1013_v26 }
 0x492   : > { %v657_v48 = vpop.xlane.xlu0 %656  ;;  %v664_v55 = vpop.permute.xlu1 %663 }
 0x493   : > { %1032 = vrcp.f32 %v657_v48  ;;  %v416_v49 = vpack.c.bf16 %v415_v47, %v414_v46 }
 0x494   : > { %v1027_v1 = vpop.eup %1026 }
 0x495   : > { %918 = vmatmul.mubr.msk.bf16.vlgmr.msra.gmra.mxu0 %vm270_vm2, %v416_v49  ;;  %v537_v52 = vmul.f32 %v1027_v1, %v1015_v29 }
 0x496   : > { %v541_v50 = vpop.permute.xlu0 %540  ;;  %929 = vmatprep.mubr.msk.bf16.mxu0 %vm1059_vm0, %v1058_v0 }
 0x497   : > { %928 = vmatpush3.bf16.msra.mxu0 %v541_v50 }
 0x498   : > { %v1029_v51 = vpop.eup %1028  ;;  %939 = vmatprep.subr.bf16.mxu0 %v1058_v0 }
 0x499   : > { %v538_v53 = vmul.f32 %v1029_v51, %v1017_v31 }
 0x49b   : > { %v539_v54 = vpack.c.bf16 %v538_v53, %v537_v52 }
 0x49c   : > { %v1031_v56 = vpop.eup %1030 }
 0x49d   : > { %930 = vmatmul.mubr.msk.bf16.vlgmr.msra.gmra.mxu0 %vm270_vm2, %v539_v54  ;;  %v660_v58 = vmul.f32 %v1031_v56, %v1019_v33 }
 0x49e   : > { %940 = vmatpush3.bf16.msra.mxu0 %v664_v55  ;;  %941 = vmatprep.mubr.msk.bf16.mxu0 %vm1059_vm0, %v1058_v0 }
 0x4a0   : > { %v1033_v57 = vpop.eup %1032 }
 0x4a1   : > { %v661_v59 = vmul.f32 %v1033_v57, %v1021_v35 }
 0x4a3   : > { %v662_v60 = vpack.c.bf16 %v661_v59, %v660_v58 }
 0x4a5   : > { %942 = vmatmul.mubr.msk.bf16.vlgmr.msra.gmra.mxu0 %vm270_vm2, %v662_v60 }
 0x555   : > { %v457_v61 = vpop.f32.mrf.mxu0 }
 0x557   : > { %v919_v62 = vpop.f32.mrf.mxu0 }
 0x559   : > { %v460_v63 = vpop.f32.mrf.mxu0 }
 0x55a   : > { %v985_v2 = vpack.i.bf16 %v460_v63, %v457_v61 }
 0x55b   : > { %v920_v3 = vpop.f32.mrf.mxu0 }
 0x55c   : > { %986 = vrot.lane.b32.xlu1 %v985_v2, %s1071_s3 }
 0x55d   : > { %v580_v4 = vpop.f32.mrf.mxu0 }
 0x55f   : > { %v931_v5 = vpop.f32.mrf.mxu0 }
 0x561   : > { %v583_v6 = vpop.f32.mrf.mxu0 }
 0x562   : > { %v990_v7 = vpack.i.bf16 %v583_v6, %v580_v4 }
 0x563   : > { %v932_v8 = vpop.f32.mrf.mxu0 }
 0x564   : > { %991 = vrot.lane.b32.xlu0 %v990_v7, %s1072_s4 }
 0x565   : > { %v703_v0 = vpop.f32.mrf.mxu0 }
 0x567   : > { %v943_v9 = vpop.f32.mrf.mxu0 }
 0x569   : > { %v706_v10 = vpop.f32.mrf.mxu0 }
 0x56a   : > { %v995_v11 = vpack.i.bf16 %v706_v10, %v703_v0 }
 0x56b   : > { %v944_v12 = vpop.f32.mrf.mxu0 }
 0x56c   : > { %996 = vrot.lane.b32.xlu1 %v995_v11, %s1073_s5 }
 0x5ce   : > { %v987_v13 = vpop.permute.xlu1 %986 }
 0x5cf   : > { %v989_v15 = vunpack.i.h.bf16 %v987_v13  ;;  %v988_v16 = vunpack.i.l.bf16 %v987_v13 }
 0x5d1   : > { %v735_v20 = vsel %vm220_vm1, %v1157_v42, %v989_v15  ;;  %v734_v21 = vsel %vm220_vm1, %v1155_v40, %v988_v16 }
 0x5d6   : > { %v992_v14 = vpop.permute.xlu0 %991 }
 0x5d7   : > { %v994_v17 = vunpack.i.h.bf16 %v992_v14  ;;  %v993_v18 = vunpack.i.l.bf16 %v992_v14 }
 0x5d9   : > { %v737_v24 = vsel %vm270_vm2, %v735_v20, %v994_v17  ;;  %v736_v25 = vsel %vm270_vm2, %v734_v21, %v993_v18 }
 0x5de   : > { %v997_v19 = vpop.permute.xlu1 %996 }
 0x5df   : > { %v999_v22 = vunpack.i.h.bf16 %v997_v19  ;;  %v998_v23 = vunpack.i.l.bf16 %v997_v19 }
 0x5e1   : > { %v740_v26 = vsel %vm738_vm3, %v737_v24, %v999_v22  ;;  %v739_v27 = vsel %vm738_vm3, %v736_v25, %v998_v23 }
 0x5e2   : > { %v880_v28 = vpack.c.bf16 %v740_v26, %v740_v26  ;;  %v879_v29 = vpack.c.bf16 %v739_v27, %v739_v27 }
 0x5e4   : > { %751 = vst.msk [vmem:[%s201_s8 + $0x4] sm:$0xf] %vm749_vm4, %v880_v28  ;;  %750 = vst.msk [vmem:[%s201_s8] sm:$0xf] %vm749_vm4, %v879_v29 }
 0x5e5 PF: > { %s12_s11 = sadd.s32 1, %s1056_s11   ;;  %s1205_s9 = smov %s1052_s10 }
 0x5e6   : > { %p9_p5 = scmp.ge.s32.totalorder %s12_s11, 4   ;;  %s1206_s10 = smov %s1208_s12 }
 0x5e8   :  { %11 = sbr.rel (!%p9_p5) target bundleno = 2 (0x2), region = 61 }

// kernel: informer_forward.36
= control target key start
LH: loop header
LB: loop body
LE: loop exit
PB: predicated region body
PF: predicated region fallthrough
CT: control target
= control target key end

     0   :  { %vm33_vm0 = vcmask 261120   ;;  %s209_s0 = inlined_call_operand.vmem [shape: f32[32,32], index: 0, kind: input, shape index: {}]   ;;  %s210_s1 = inlined_call_operand.vmem [shape: bf16[32,32], index: 1, kind: input, shape index: {}]   ;;  %s211_s2 = inlined_call_operand.vmem [shape: f32[1,32], index: 2, kind: input, shape index: {}]   ;;  %s212_s3 = inlined_call_operand.vmem [shape: f32[1,32], index: 3, kind: input, shape index: {}]   ;;  %s213_s4 = inlined_call_operand.vmem [shape: f32[32,32], index: 4, kind: output, shape index: {}]  }
   0x1   :  { %v17_v0 = vld [vmem:[%s209_s0] sm:$0xff]  ;;  %v19_v2 = vld [vmem:[%s209_s0 + $0x10] sm:$0xff]  ;;  %v127_v4 = vld [vmem:[%s210_s1 + $0x8] sm:$0xff]  }
   0x2   :  { %v120_v1 = vld [vmem:[%s210_s1] sm:$0xff]   ;;  %v18_v5 = vld [vmem:[%s209_s0 + $0x8] sm:$0xff]  ;;  %v20_v7 = vld [vmem:[%s209_s0 + $0x18] sm:$0xff]  ;;  %v125_v8 = vunpack.c.l.bf16 %v127_v4  ;;  %v126_v9 = vunpack.c.h.bf16 %v127_v4 }
   0x3   :  { %v121_v3 = vunpack.c.l.bf16 %v120_v1  ;;  %v122_v6 = vunpack.c.h.bf16 %v120_v1  ;;  %v117_v51 = vld [vmem:[%s211_s2] ss:$0 sm:$0xff] }
   0x4   :  { %v31_v12 = vadd.f32 %v125_v8, %v19_v2  ;;  %v32_v13 = vadd.f32 %v126_v9, %v20_v7  ;;  %v118_v53 = vld [vmem:[%s212_s3] ss:$0 sm:$0xff] }
   0x5   :  { %v29_v10 = vadd.f32 %v121_v3, %v17_v0  ;;  %v30_v11 = vadd.f32 %v122_v6, %v18_v5 }
   0x6   :  { %v40_v15 = vsel %vm33_vm0, %v31_v12, 0.0  ;;  %v43_v17 = vsel %vm33_vm0, %v32_v13, 0.0 }
   0x7   :  { %v34_v14 = vsel %vm33_vm0, %v29_v10, 0.0  ;;  %41 = vadd.xlane.f32.xlu1 %v40_v15  ;;  %v37_v16 = vsel %vm33_vm0, %v30_v11, 0.0 }
   0x8   :  { %35 = vadd.xlane.f32.xlu0 %v34_v14 }
   0xb   :  { %44 = vadd.xlane.f32.xlu1 %v43_v17 }
   0xc   :  { %38 = vadd.xlane.f32.xlu0 %v37_v16 }
  0x90   :  { %v42_v20 = vpop.xlane.xlu1 %41 }
  0x91   :  { %v36_v18 = vpop.xlane.xlu0 %35  ;;  %v49_v21 = vmul.f32 0.03125, %v42_v20 }
  0x92   :  { %v47_v19 = vmul.f32 0.03125, %v36_v18 }
  0x93   :  { %v53_v23 = vsub.f32 %v31_v12, %v49_v21 }
  0x94   :  { %v51_v22 = vsub.f32 %v29_v10, %v47_v19  ;;  %v45_v26 = vpop.xlane.xlu1 %44 }
  0x95   :  { %v39_v24 = vpop.xlane.xlu0 %38  ;;  %v50_v28 = vmul.f32 0.03125, %v45_v26  ;;  %v57_v29 = vmul.f32 %v53_v23, %v53_v23 }
  0x96   :  { %v48_v25 = vmul.f32 0.03125, %v39_v24  ;;  %v55_v27 = vmul.f32 %v51_v22, %v51_v22 }
  0x97   :  { %v54_v32 = vsub.f32 %v32_v13, %v50_v28  ;;  %v65_v33 = vsel %vm33_vm0, %v57_v29, 0.0 }
  0x98   :  { %v52_v30 = vsub.f32 %v30_v11, %v48_v25  ;;  %v59_v31 = vsel %vm33_vm0, %v55_v27, 0.0 }
  0x99   :  { %60 = vadd.xlane.f32.xlu0 %v59_v31  ;;  %v58_v35 = vmul.f32 %v54_v32, %v54_v32 }
  0x9a   :  { %v56_v34 = vmul.f32 %v52_v30, %v52_v30 }
  0x9b   :  { %v68_v37 = vsel %vm33_vm0, %v58_v35, 0.0 }
  0x9c   :  { %v62_v36 = vsel %vm33_vm0, %v56_v34, 0.0 }
  0x9d   :  { %66 = vadd.xlane.f32.xlu0 %v65_v33  ;;  %63 = vadd.xlane.f32.xlu1 %v62_v36 }
  0xa1   :  { %69 = vadd.xlane.f32.xlu1 %v68_v37 }
 0x122   :  { %v61_v38 = vpop.xlane.xlu0 %60 }
 0x123   :  { %v71_v39 = vmul.f32 0.03125, %v61_v38 }
 0x125   :  { %v75_v40 = vadd.f32 1e-05, %v71_v39 }
 0x126   :  { %v64_v41 = vpop.xlane.xlu1 %63  ;;  %v67_v42 = vpop.xlane.xlu0 %66 }
 0x127   :  { %128 = vrsqrt.f32 %v75_v40  ;;  %v72_v43 = vmul.f32 0.03125, %v64_v41  ;;  %v73_v44 = vmul.f32 0.03125, %v67_v42 }
 0x129   :  { %v76_v45 = vadd.f32 1e-05, %v72_v43  ;;  %v77_v46 = vadd.f32 1e-05, %v73_v44 }
 0x12a   :  { %v70_v47 = vpop.xlane.xlu1 %69 }
 0x12b   :  { %130 = vrsqrt.f32 %v76_v45  ;;  %v74_v48 = vmul.f32 0.03125, %v70_v47 }
 0x12c   :  { %132 = vrsqrt.f32 %v77_v46 }
 0x12d   :  { %v78_v49 = vadd.f32 1e-05, %v74_v48 }
 0x12f   :  { %134 = vrsqrt.f32 %v78_v49 }
 0x134   :  { %v129_v50 = vpop.eup %128 }
 0x135   :  { %v83_v52 = vmul.f32 %v129_v50, %v51_v22 }
 0x137   :  { %v94_v54 = vmul.f32 %v117_v51, %v83_v52 }
 0x138   :  { %v131_v55 = vpop.eup %130 }
 0x139   :  { %v133_v56 = vpop.eup %132  ;;  %v105_v57 = vadd.f32 %v118_v53, %v94_v54  ;;  %v84_v58 = vmul.f32 %v131_v55, %v52_v30 }
 0x13a   :  { %v85_v59 = vmul.f32 %v133_v56, %v53_v23 }
 0x13b   :  { %109 = vst.msk [vmem:[%s213_s4] sm:$0xff] %vm33_vm0, %v105_v57  ;;  %v95_v60 = vmul.f32 %v117_v51, %v84_v58 }
 0x13c   :  { %v135_v61 = vpop.eup %134  ;;  %v96_v62 = vmul.f32 %v117_v51, %v85_v59 }
 0x13d   :  { %v106_v63 = vadd.f32 %v118_v53, %v95_v60  ;;  %v86_v0 = vmul.f32 %v135_v61, %v54_v32 }
 0x13e   :  { %v107_v1 = vadd.f32 %v118_v53, %v96_v62 }
 0x13f   :  { %110 = vst.msk [vmem:[%s213_s4 + $0x8] sm:$0xff] %vm33_vm0, %v106_v63  ;;  %v97_v2 = vmul.f32 %v117_v51, %v86_v0 }
 0x140   :  { %111 = vst.msk [vmem:[%s213_s4 + $0x10] sm:$0xff] %vm33_vm0, %v107_v1 }
 0x141   :  { %v108_v3 = vadd.f32 %v118_v53, %v97_v2 }
 0x143   :  { %112 = vst.msk [vmem:[%s213_s4 + $0x18] sm:$0xff] %vm33_vm0, %v108_v3 }

// kernel: informer_forward.37
= control target key start
LH: loop header
LB: loop body
LE: loop exit
PB: predicated region body
PF: predicated region fallthrough
CT: control target
= control target key end

     0   :  { %vm44_vm0 = vcmask 261120   ;;  %vm152_vm1 = vcmask 257024   ;;  %s253_s1 = inlined_call_operand.vmem [shape: bf16[32,32], index: 1, kind: input, shape index: {}]   ;;  %s254_s0 = inlined_call_operand.vmem [shape: f32[32,32], index: 0, kind: input, shape index: {}]   ;;  %s255_s2 = inlined_call_operand.vmem [shape: f32[1,32], index: 2, kind: input, shape index: {}]   ;;  %s256_s3 = inlined_call_operand.vmem [shape: bf16[32,32], index: 3, kind: output, shape index: {}]  }
   0x1   :  { %v186_v0 = vld [vmem:[%s253_s1 + $0x8] sm:$0xff]   ;;  %v187_v1 = vld [vmem:[%s253_s1] sm:$0xff]   ;;  %v17_v5 = vld [vmem:[%s254_s0 + $0x10] sm:$0xff] }
   0x2   :  { %178 = vmatprep.subr.bf16.mxu0 %v186_v0  ;;  %v15_v2 = vld [vmem:[%s254_s0] sm:$0xff]  ;;  %v16_v3 = vld [vmem:[%s254_s0 + $0x8] sm:$0xff]  ;;  %v18_v6 = vld [vmem:[%s254_s0 + $0x18] sm:$0xff] }
   0x3   :  { %179 = vmatpush3.bf16.msra.mxu0 %v186_v0  ;;  %v19_v4 = vpack.c.bf16 %v16_v3, %v15_v2  ;;  %v20_v7 = vpack.c.bf16 %v18_v6, %v17_v5  ;;  %v161_v8 = vld [vmem:[%s255_s2] ss:$0 sm:$0xff] }
   0x4   :  { %180 = vmatprep.subr.bf16.mxu0 %v187_v1 }
   0x5   :  { %182 = vmatprep.mubr.msk.bf16.mxu0 %vm44_vm0, %v19_v4 }
   0x7   :  { %181 = vmatpush3.bf16.msra.mxu0 %v187_v1 }
   0xa   :  { %183 = vmatmul.mubr.msk.bf16.vlgmr.msra.gmra.mxu0 %vm44_vm0, %v20_v7 }
  0xca   :  { %v184_v9 = vpop.f32.mrf.mxu0 }
  0xcb   :  { %v94_v10 = vadd.f32 %v184_v9, %v161_v8 }
  0xcc   :  { %v85_v11 = vpop.f32.mrf.mxu0 }
  0xcd   :  { %v106_v12 = vmul.f32 0.044715, %v94_v10  ;;  %v86_v13 = vadd.f32 %v161_v8, %v85_v11  ;;  %v102_v38 = vmul.f32 0.5, %v94_v10 }
  0xce   :  { %v185_v14 = vpop.f32.mrf.mxu0 }
  0xcf   :  { %v110_v15 = vmul.f32 %v106_v12, %v94_v10  ;;  %v104_v16 = vmul.f32 0.044715, %v86_v13  ;;  %v97_v17 = vadd.f32 %v185_v14, %v161_v8  ;;  %v100_v42 = vmul.f32 0.5, %v86_v13 }
  0xd0   :  { %v88_v18 = vpop.f32.mrf.mxu0 }
  0xd1   :  { %v114_v19 = vmul.f32 %v110_v15, %v94_v10  ;;  %v108_v20 = vmul.f32 %v104_v16, %v86_v13  ;;  %v107_v21 = vmul.f32 0.044715, %v97_v17  ;;  %v89_v22 = vadd.f32 %v161_v8, %v88_v18 }
  0xd2   :  { %v103_v47 = vmul.f32 0.5, %v97_v17 }
  0xd3   :  { %v118_v23 = vadd.f32 %v114_v19, %v94_v10  ;;  %v112_v24 = vmul.f32 %v108_v20, %v86_v13  ;;  %v111_v25 = vmul.f32 %v107_v21, %v97_v17  ;;  %v105_v26 = vmul.f32 0.044715, %v89_v22 }
  0xd4   :  { %v101_v52 = vmul.f32 0.5, %v89_v22 }
  0xd5   :  { %v122_v27 = vmul.f32 0.7978846, %v118_v23  ;;  %v116_v28 = vadd.f32 %v112_v24, %v86_v13  ;;  %v115_v29 = vmul.f32 %v111_v25, %v97_v17  ;;  %v109_v30 = vmul.f32 %v105_v26, %v89_v22 }
  0xd7   :  { %188 = vtanh.f32 %v122_v27  ;;  %v120_v31 = vmul.f32 0.7978846, %v116_v28  ;;  %v119_v32 = vadd.f32 %v115_v29, %v97_v17  ;;  %v113_v33 = vmul.f32 %v109_v30, %v89_v22 }
  0xd9   :  { %190 = vtanh.f32 %v120_v31  ;;  %v123_v34 = vmul.f32 0.7978846, %v119_v32  ;;  %v117_v35 = vadd.f32 %v113_v33, %v89_v22 }
  0xdb   :  { %192 = vtanh.f32 %v123_v34  ;;  %v121_v36 = vmul.f32 0.7978846, %v117_v35 }
  0xdd   :  { %194 = vtanh.f32 %v121_v36 }
  0xe4   :  { %v189_v37 = vpop.eup %188 }
  0xe5   :  { %v130_v39 = vadd.f32 1.0, %v189_v37 }
  0xe6   :  { %v191_v40 = vpop.eup %190 }
  0xe7   :  { %v134_v41 = vmul.f32 %v130_v39, %v102_v38  ;;  %v128_v43 = vadd.f32 1.0, %v191_v40 }
  0xe8   :  { %v193_v44 = vpop.eup %192 }
  0xe9   :  { %v172_v45 = vpack.c.bf16 %v134_v41, %v134_v41  ;;  %v132_v46 = vmul.f32 %v128_v43, %v100_v42  ;;  %v131_v48 = vadd.f32 1.0, %v193_v44 }
  0xea   :  { %v195_v49 = vpop.eup %194 }
  0xeb   :  { %155 = vst.msk [vmem:[%s256_s3 + $0x8] sm:$0xf] %vm152_vm1, %v172_v45  ;;  %v170_v50 = vpack.c.bf16 %v132_v46, %v132_v46  ;;  %v135_v51 = vmul.f32 %v131_v48, %v103_v47  ;;  %v129_v53 = vadd.f32 1.0, %v195_v49 }
  0xed   :  { %153 = vst.msk [vmem:[%s256_s3] sm:$0xf] %vm152_vm1, %v170_v50  ;;  %v173_v54 = vpack.c.bf16 %v135_v51, %v135_v51  ;;  %v133_v55 = vmul.f32 %v129_v53, %v101_v52 }
  0xef   :  { %156 = vst.msk [vmem:[%s256_s3 + $0xc] sm:$0xf] %vm152_vm1, %v173_v54  ;;  %v171_v56 = vpack.c.bf16 %v133_v55, %v133_v55 }
  0xf1   :  { %154 = vst.msk [vmem:[%s256_s3 + $0x4] sm:$0xf] %vm152_vm1, %v171_v56 }

// kernel: informer_forward.41
= control target key start
LH: loop header
LB: loop body
LE: loop exit
PB: predicated region body
PF: predicated region fallthrough
CT: control target
= control target key end

     0   :  { %s743_s15 = smov 0   ;;  %s810_s0 = inlined_call_operand.vmem [shape: f32[2,8,32], index: 0, kind: input, shape index: {}]   ;;  %s811_s1 = inlined_call_operand.vmem [shape: bf16[5,32,96], index: 1, kind: input, shape index: {}]   ;;  %s812_s2 = inlined_call_operand.vmem [shape: f32[1,96], index: 2, kind: input, shape index: {}]   ;;  %s813_s3 = inlined_call_operand.vmem [shape: f32[1,96], index: 3, kind: input, shape index: {}]   ;;  %s814_s4 = inlined_call_operand.vmem [shape: bf16[2,8,96], index: 4, kind: output, shape index: {}]  }
   0x1 LB: > { %s591_s16 = sadd.s32 4294967295, %s714_s15   ;;  %p595_p0 = scmp.ge.s32.totalorder %s714_s15, 1  ;;  %s714_s15 = sphi %s743_s15, %s14_s15  }
   0x2   : > { %p161_p1 = scmp.lt.s32.totalorder %s714_s15, 3 }
   0x4   : > { %p162_p2 = pnand %p595_p0, %p161_p1 }
   0x5   : > { %p185_p3 = scmp.lt.s32.totalorder (!%p162_p2), %s591_s16, 1 }
   0x6   : > { %165 = sbr.rel (%p162_p2) target bundleno = 245 (0xf5), region = 36 }
   0xb   : > { %v698_v0 = vld [vmem:[%s811_s1 + $0x18] sm:$0xff]   ;;  %v716_v1 = vmov 0.0   ;;  %v699_v2 = vld [vmem:[%s811_s1 + $0x8] sm:$0xff]   ;;  %v700_v3 = vld [vmem:[%s811_s1 + $0x10] sm:$0xff]   ;;  %vm717_vm0 = vmmov 0   ;;  %s816_s16 = smov (!%p185_p3, %s591_s16), 1 }
   0xc   : > { %648 = vmatprep.subr.bf16.mxu0 %v716_v1  ;;  %656 = vmatprep.subr.bf16.mxu1 %v716_v1  ;;  %v701_v4 = vld [vmem:[%s811_s1] sm:$0xff]   ;;  %s596_s25 = sshll.u32 %s816_s16, 3  ;;  %vm199_vm1 = vcmask 1040384   ;;  %vm203_vm2 = vcmask 1044480   ;;  %vm232_vm3 = vcmask 261120   ;;  %v703_v9 = vld [vmem:[%s811_s1 + $0x38] sm:$0xff]  }
   0xd   : > { %649 = vmatpush3.bf16.msra.mxu0 %v698_v0  ;;  %652 = vmatprep.mubr.msk.bf16.mxu0 %vm717_vm0, %v716_v1  ;;  %s188_s28 = scalar_lea.vmem %s810_s0, %s596_s25  ;;  %v705_v14 = vld [vmem:[%s811_s1 + $0x30] sm:$0xff]   ;;  %v702_v18 = vld [vmem:[%s811_s1 + $0x28] sm:$0xff]   ;;  %v704_v21 = vld [vmem:[%s811_s1 + $0x20] sm:$0xff]   ;;  %s597_s21 = sshll.u32 %s816_s16, 2  ;;  %vm536_vm4 = vcmask 781312  }
   0xe   : > { %657 = vmatpush3.bf16.msra.mxu1 %v699_v2  ;;  %650 = vmatprep.subr.bf16.mxu0 %v716_v1  ;;  %v194_v5 = vld [vmem:[%s188_s28] sm:$0xff]  ;;  %v706_v23 = vld [vmem:[%s811_s1 + $0x48] sm:$0xff]   ;;  %s192_s24 = scalar_lea.vmem %s814_s4, %s597_s21 }
   0xf   : > { %658 = vmatprep.subr.bf16.mxu1 %v716_v1  ;;  %660 = vmatprep.mubr.msk.bf16.mxu1 %vm717_vm0, %v716_v1  ;;  %v195_v6 = vpack.c.bf16 %v194_v5, %v194_v5  ;;  %v707_v24 = vld [vmem:[%s811_s1 + $0x40] sm:$0xff]  }
  0x10   : > { %v629_v46 = vld [vmem:[%s812_s2] ss:$0 sm:$0xff] }
  0x11   : > { %651 = vmatpush3.bf16.msra.mxu0 %v700_v3  ;;  %v197_v7 = vrot.slane %v195_v6, 3  ;;  %v198_v8 = vrot.slane %v195_v6, 7  ;;  %v630_v48 = vld [vmem:[%s813_s3] ss:$0 sm:$0xff] }
  0x12   : > { %659 = vmatpush3.bf16.msra.mxu1 %v701_v4  ;;  %664 = vmatprep.subr.bf16.mxu0 %v716_v1 }
  0x13   : > { %672 = vmatprep.subr.bf16.mxu1 %v716_v1  ;;  %v202_v10 = vsel %vm199_vm1, %v197_v7, %v198_v8 }
  0x14   : > { %v204_v11 = vsel %vm203_vm2, %v202_v10, %v197_v7 }
  0x15   : > { %v214_v12 = vshrl.u32 %v204_v11, 16  ;;  %v216_v13 = vshll.u32 %v204_v11, 16  ;;  %661 = vmatmul.mubr.msk.bf16.vlgmr.msra.gmra.mxu1 %vm232_vm3, %v204_v11  ;;  %v336_v22 = vrot.slane %v204_v11, 1  ;;  %v462_v25 = vrot.slane %v204_v11, 2 }
  0x16   : > { %673 = vmatpush3.bf16.msra.mxu1 %v703_v9  ;;  %676 = vmatprep.mubr.msk.bf16.mxu1 %vm717_vm0, %v716_v1 }
  0x17   : > { %v218_v15 = vrot.slane %v216_v13, 1  ;;  %v398_v16 = vrot.slane %v214_v12, 1  ;;  %v399_v17 = vrot.slane %v216_v13, 2  ;;  %674 = vmatprep.subr.bf16.mxu1 %v716_v1 }
  0x19   : > { %v219_v19 = vor.u32 %v218_v15, %v214_v12  ;;  %v400_v20 = vor.u32 %v399_v17, %v398_v16 }
  0x1a   : > { %675 = vmatpush3.bf16.msra.mxu1 %v705_v14 }
  0x1b   : > { %653 = vmatmul.mubr.msk.bf16.vlgmr.msra.gmra.mxu0 %vm232_vm3, %v219_v19 }
  0x1c   : > { %665 = vmatpush3.bf16.msra.mxu0 %v702_v18  ;;  %668 = vmatprep.mubr.msk.bf16.mxu0 %vm717_vm0, %v716_v1 }
  0x1d   : > { %666 = vmatprep.subr.bf16.mxu0 %v716_v1  ;;  %677 = vmatmul.mubr.msk.bf16.vlgmr.msra.gmra.mxu1 %vm232_vm3, %v400_v20 }
  0x20   : > { %667 = vmatpush3.bf16.msra.mxu0 %v704_v21 }
  0x21   : > { %680 = vmatprep.subr.bf16.mxu0 %v716_v1 }
  0x23   : > { %669 = vmatmul.mubr.msk.bf16.vlgmr.msra.gmra.mxu0 %vm232_vm3, %v336_v22 }
  0x24   : > { %681 = vmatpush3.bf16.msra.mxu0 %v706_v23  ;;  %684 = vmatprep.mubr.msk.bf16.mxu0 %vm717_vm0, %v716_v1 }
  0x25   : > { %682 = vmatprep.subr.bf16.mxu0 %v716_v1 }
  0x28   : > { %683 = vmatpush3.bf16.msra.mxu0 %v707_v24 }
  0x2b   : > { %685 = vmatmul.mubr.msk.bf16.vlgmr.msra.gmra.mxu0 %vm232_vm3, %v462_v25 }
  0xd5   : > { %v324_v26 = vpop.f32.mrf.mxu1 }
  0xd7   : > { %v662_v27 = vpop.f32.mrf.mxu1 }
  0xd9   : > { %v327_v28 = vpop.f32.mrf.mxu1 }
  0xdb   : > { %v270_v29 = vpop.f32.mrf.mxu0  ;;  %v663_v30 = vpop.f32.mrf.mxu1 }
  0xdc   : > { %v325_v39 = vadd.f32 %v324_v26, %v270_v29 }
  0xdd   : > { %v654_v31 = vpop.f32.mrf.mxu0  ;;  %v450_v32 = vpop.f32.mrf.mxu1 }
  0xdf   : > { %v273_v33 = vpop.f32.mrf.mxu0  ;;  %v678_v34 = vpop.f32.mrf.mxu1 }
  0xe1   : > { %v655_v35 = vpop.f32.mrf.mxu0  ;;  %v453_v36 = vpop.f32.mrf.mxu1 }
  0xe3   : > { %v386_v37 = vpop.f32.mrf.mxu0  ;;  %v679_v38 = vpop.f32.mrf.mxu1 }
  0xe4   : > { %v392_v41 = vadd.f32 %v386_v37, %v325_v39 }
  0xe5   : > { %v670_v40 = vpop.f32.mrf.mxu0 }
  0xe6   : > { %v456_v44 = vadd.f32 %v450_v32, %v392_v41 }
  0xe7   : > { %v389_v42 = vpop.f32.mrf.mxu0 }
  0xe9   : > { %v671_v43 = vpop.f32.mrf.mxu0 }
  0xeb   : > { %v512_v45 = vpop.f32.mrf.mxu0 }
  0xec   : > { %v518_v47 = vadd.f32 %v512_v45, %v456_v44 }
  0xed   : > { %v686_v49 = vpop.f32.mrf.mxu0 }
  0xee   : > { %v526_v50 = vmul.f32 %v629_v46, %v518_v47 }
  0xef   : > { %v515_v51 = vpop.f32.mrf.mxu0 }
  0xf0   : > { %v534_v52 = vadd.f32 %v630_v48, %v526_v50 }
  0xf1   : > { %v687_v53 = vpop.f32.mrf.mxu0 }
  0xf2   : > { %v535_v54 = vpack.c.bf16 %v534_v52, %v534_v52 }
  0xf4   : > { %537 = vst.msk [vmem:[%s192_s24] sm:$0xf] %vm536_vm4, %v535_v54 }
  0xf5 PF: > { %s14_s15 = sadd.s32 1, %s714_s15  }
  0xf6   : > { %p11_p4 = scmp.ge.s32.totalorder %s14_s15, 4  }
  0xf8   :  { %13 = sbr.rel (!%p11_p4) target bundleno = 1 (0x1), region = 70 }

// kernel: informer_forward.40
= control target key start
LH: loop header
LB: loop body
LE: loop exit
PB: predicated region body
PF: predicated region fallthrough
CT: control target
= control target key end

     0   :  { %s736_s15 = smov 0   ;;  %s808_s0 = inlined_call_operand.vmem [shape: f32[2,16,32], index: 0, kind: input, shape index: {}]   ;;  %s809_s1 = inlined_call_operand.vmem [shape: bf16[3,32,32], index: 1, kind: input, shape index: {}]   ;;  %s810_s2 = inlined_call_operand.vmem [shape: f32[1,32], index: 2, kind: input, shape index: {}]   ;;  %s811_s3 = inlined_call_operand.vmem [shape: f32[1,32], index: 3, kind: input, shape index: {}]   ;;  %s812_s4 = inlined_call_operand.vmem [shape: f32[2,8,32], index: 4, kind: output, shape index: {}]  }
   0x1 LB: > { %s604_s16 = sadd.s32 4294967295, %s707_s15   ;;  %p608_p0 = scmp.ge.s32.totalorder %s707_s15, 1  ;;  %s707_s15 = sphi %s736_s15, %s14_s15  }
   0x2   : > { %p162_p1 = scmp.lt.s32.totalorder %s707_s15, 3 }
   0x4   : > { %p163_p2 = pnand %p608_p0, %p162_p1 }
   0x5   : > { %p187_p3 = scmp.lt.s32.totalorder (!%p163_p2), %s604_s16, 1 }
   0x6   : > { %166 = sbr.rel (%p163_p2) target bundleno = 468 (0x1d4), region = 36 }
   0xb   : > { %v691_v0 = vld [vmem:[%s809_s1 + $0x18] sm:$0xff]   ;;  %v709_v1 = vmov 0.0   ;;  %v692_v2 = vld [vmem:[%s809_s1 + $0x8] sm:$0xff]   ;;  %v693_v3 = vld [vmem:[%s809_s1 + $0x10] sm:$0xff]   ;;  %vm710_vm0 = vmmov 0   ;;  %s814_s16 = smov (!%p187_p3, %s604_s16), 1  ;;  %v468_v53 = vlaneseq }
   0xc   : > { %650 = vmatprep.subr.bf16.mxu0 %v709_v1  ;;  %658 = vmatprep.subr.bf16.mxu1 %v709_v1  ;;  %v694_v4 = vld [vmem:[%s809_s1] sm:$0xff]   ;;  %s637_s25 = sshll.u32 %s814_s16, 4  ;;  %vm210_vm1 = vcmask 1040384   ;;  %vm211_vm2 = vsmask.f32 256  ;;  %vm249_vm4 = vcmask 261120  }
   0xd   : > { %651 = vmatpush3.bf16.msra.mxu0 %v691_v0  ;;  %654 = vmatprep.mubr.msk.bf16.mxu0 %vm710_vm0, %v709_v1  ;;  %s191_s28 = scalar_lea.vmem %s808_s0, %s637_s25  ;;  %vm212_vm3 = vmand %vm210_vm1, %vm211_vm2  ;;  %vm224_vm5 = vsmask.f32 7424  ;;  %v695_v20 = vld [vmem:[%s809_s1 + $0x28] sm:$0xff]   ;;  %v696_v22 = vld [vmem:[%s809_s1 + $0x20] sm:$0xff]   ;;  %vm356_vm6 = vcmask 1046528   ;;  %v469_v57 = vshrl.u32 %v468_v53, 7 }
   0xe   : > { %659 = vmatpush3.bf16.msra.mxu1 %v692_v2  ;;  %652 = vmatprep.subr.bf16.mxu0 %v709_v1  ;;  %v197_v5 = vld [vmem:[%s191_s28] sm:$0xff]  ;;  %v198_v6 = vld [vmem:[%s191_s28 + $0x8] sm:$0xff]  ;;  %v471_v63 = vand.u32 127, %v468_v53  ;;  %vm476_vm10 = vcmask 130048   ;;  %s611_s11 = sshll.u32 %s814_s16, 3 }
   0xf   : > { %660 = vmatprep.subr.bf16.mxu1 %v709_v1  ;;  %662 = vmatprep.mubr.msk.bf16.mxu1 %vm710_vm0, %v709_v1  ;;  %v199_v7 = vpack.c.bf16 %v198_v6, %v197_v5  ;;  %v629_v36 = vld [vmem:[%s810_s2] ss:$0 sm:$0xff]  ;;  %v472_v0 = vmul.u32 2, %v469_v57  ;;  %s195_s14 = scalar_lea.vmem %s812_s4, %s611_s11 }
  0x10   : > { %v630_v38 = vld [vmem:[%s811_s3] ss:$0 sm:$0xff] }
  0x11   : > { %653 = vmatpush3.bf16.msra.mxu0 %v693_v3  ;;  %v201_v8 = vshrl.u32 %v199_v7, 16  ;;  %v205_v9 = vshll.u32 %v199_v7, 16  ;;  %vm473_vm9 = vcmp.eq.s32.totalorder %v471_v63, %v472_v0 }
  0x12   : > { %661 = vmatpush3.bf16.msra.mxu1 %v694_v4  ;;  %666 = vmatprep.subr.bf16.mxu0 %v709_v1 }
  0x13   : > { %674 = vmatprep.subr.mxu1 %v709_v1  ;;  %v203_v10 = vrot.slane %v201_v8, 7 }
  0x15   : > { %v207_v11 = vor.u32 %v205_v9, %v203_v10  ;;  %v214_v12 = vsel %vm212_vm3, %v203_v10, %v205_v9 }
  0x16   : > { %v233_v13 = vshll.u32 %v214_v12, 16  ;;  %v358_v24 = vrot.slane %v214_v12, 1 }
  0x17   : > { %v213_v14 = vsel %vm212_vm3, %v203_v10, %v207_v11  ;;  %v633_v11 = vsel %vm473_vm9, 1.0, %v709_v1 }
  0x18   : > { %v226_v15 = vshrl.u32 %v213_v14, 16  ;;  %v228_v16 = vshll.u32 %v213_v14, 16  ;;  %663 = vmatmul.mubr.msk.bf16.vlgmr.msra.gmra.mxu1 %vm249_vm4, %v213_v14  ;;  %v235_v18 = vrot.slane %v233_v13, 1  ;;  %v357_v23 = vrot.slane %v213_v14, 1 }
  0x19   : > { %678 = vmatprep.mubr.msk.f32.mxu1 %vm710_vm0, %v709_v1 }
  0x1a   : > { %v230_v17 = vrot.slane %v228_v16, 1  ;;  %v359_v25 = vsel %vm356_vm6, %v357_v23, %v358_v24 }
  0x1c   : > { %v231_v19 = vor.u32 %v230_v17, %v226_v15 }
  0x1e   : > { %v236_v21 = vsel %vm224_vm5, %v231_v19, %v235_v18 }
  0x1f   : > { %655 = vmatmul.mubr.msk.bf16.vlgmr.msra.gmra.mxu0 %vm249_vm4, %v236_v21 }
  0x20   : > { %667 = vmatpush3.bf16.msra.mxu0 %v695_v20  ;;  %670 = vmatprep.mubr.msk.bf16.mxu0 %vm710_vm0, %v709_v1 }
  0x21   : > { %668 = vmatprep.subr.bf16.mxu0 %v709_v1 }
  0x24   : > { %669 = vmatpush3.bf16.msra.mxu0 %v696_v22 }
  0x27   : > { %671 = vmatmul.mubr.msk.bf16.vlgmr.msra.gmra.mxu0 %vm249_vm4, %v359_v25 }
  0xd8   : > { %v342_v26 = vpop.f32.mrf.mxu1 }
  0xda   : > { %v664_v27 = vpop.f32.mrf.mxu1 }
  0xdc   : > { %v345_v28 = vpop.f32.mrf.mxu1 }
  0xde   : > { %v665_v29 = vpop.f32.mrf.mxu1 }
  0xdf   : > { %v287_v30 = vpop.f32.mrf.mxu0 }
  0xe0   : > { %v343_v34 = vadd.f32 %v342_v26, %v287_v30 }
  0xe1   : > { %v656_v31 = vpop.f32.mrf.mxu0 }
  0xe3   : > { %v290_v32 = vpop.f32.mrf.mxu0 }
  0xe4   : > { %v346_v40 = vadd.f32 %v345_v28, %v290_v32 }
  0xe5   : > { %v657_v33 = vpop.f32.mrf.mxu0 }
  0xe7   : > { %v409_v35 = vpop.f32.mrf.mxu0 }
  0xe8   : > { %v416_v37 = vadd.f32 %v409_v35, %v343_v34 }
  0xe9   : > { %v672_v39 = vpop.f32.mrf.mxu0 }
  0xea   : > { %v425_v41 = vmul.f32 %v629_v36, %v416_v37 }
  0xeb   : > { %v412_v42 = vpop.f32.mrf.mxu0 }
  0xec   : > { %v434_v43 = vadd.f32 %v630_v38, %v425_v41  ;;  %v417_v44 = vadd.f32 %v412_v42, %v346_v40 }
  0xed   : > { %v673_v45 = vpop.f32.mrf.mxu0 }
  0xee   : > { %v438_v46 = vmin.f32 %v434_v43, 0.0  ;;  %v426_v47 = vmul.f32 %v629_v36, %v417_v44  ;;  %vm436_vm7 = vcmp.gt.f32.partialorder %v434_v43, 0.0 }
  0xf0   : > { %v440_v48 = vmul.f32 1.442695, %v438_v46  ;;  %v435_v49 = vadd.f32 %v630_v38, %v426_v47 }
  0xf2   : > { %697 = vpow2.f32 %v440_v48  ;;  %v439_v50 = vmin.f32 %v435_v49, 0.0  ;;  %vm437_vm8 = vcmp.gt.f32.partialorder %v435_v49, 0.0 }
  0xf4   : > { %v442_v51 = vmul.f32 1.442695, %v439_v50 }
  0xf6   : > { %699 = vpow2.f32 %v442_v51 }
  0xff   : > { %v698_v52 = vpop.eup %697 }
 0x100   : > { %v631_v54 = vadd.f32 -1.0, %v698_v52 }
 0x102   : > { %v446_v55 = vsel %vm436_vm7, %v434_v43, %v631_v54 }
 0x103   : > { %v700_v56 = vpop.eup %699  ;;  %v451_v59 = vrot.slane %v446_v55, 7  ;;  %v458_v2 = vrot.slane %v446_v55, 1 }
 0x104   : > { %v632_v58 = vadd.f32 -1.0, %v700_v56 }
 0x105   : > { %v456_v4 = vsel %vm210_vm1, -1e+30, %v451_v59 }
 0x106   : > { %v447_v60 = vsel %vm437_vm8, %v435_v49, %v632_v58  ;;  %v464_v9 = vmax.f32 %v456_v4, %v446_v55 }
 0x107   : > { %v452_v61 = vrot.slane %v447_v60, 7  ;;  %v459_v62 = vrot.slane %v447_v60, 1 }
 0x109   : > { %v453_v3 = vsel %vm210_vm1, %v451_v59, %v452_v61  ;;  %v463_v6 = vsel %vm356_vm6, %v459_v62, -1e+30  ;;  %v460_v7 = vsel %vm356_vm6, %v458_v2, %v459_v62 }
 0x10a   : > { %v465_v5 = vmax.f32 %v453_v3, %v447_v60  ;;  %v466_v10 = vmax.f32 %v464_v9, %v460_v7 }
 0x10c   : > { %v467_v8 = vmax.f32 %v465_v5, %v463_v6 }
 0x10e   : > { %675 = vmatpush3.msra.mxu1 %v467_v8 }
 0x10f   : > { %676 = vmatprep.subr.mxu1 %v709_v1 }
 0x110   : > { %677 = vmatpush3.msra.mxu1 %v466_v10 }
 0x111   : > { %679 = vmatmul.mubr.msk.f32.vlgmr.msra.gmra.mxu1 %vm476_vm10, %v633_v11 }
 0x1d1   : > { %v546_v12 = vpop.f32.mrf.mxu1 }
 0x1d2   : > { %550 = vst.msk [vmem:[%s195_s14] sm:$0xff] %vm249_vm4, %v546_v12 }
 0x1d3   : > { %v680_v13 = vpop.f32.mrf.mxu1 }
 0x1d4 PF: > { %s14_s15 = sadd.s32 1, %s707_s15  }
 0x1d5   : > { %p11_p4 = scmp.ge.s32.totalorder %s14_s15, 4  }
 0x1d7   :  { %13 = sbr.rel (!%p11_p4) target bundleno = 1 (0x1), region = 68 }

// kernel: informer_forward.42
= control target key start
LH: loop header
LB: loop body
LE: loop exit
PB: predicated region body
PF: predicated region fallthrough
CT: control target
= control target key end

     0   :  { %s943_s9 = smov 0   ;;  %s945_s10 = smov 0   ;;  %s1046_s0 = inlined_call_operand.vmem [shape: bf16[2,8,96], index: 0, kind: input, shape index: {}, may-alias: {0,1}]   ;;  %s1047_s1 = inlined_call_operand.vmem [shape: bf16[2,8,96], index: 1, kind: input, shape index: {}, may-alias: {0,1}]   ;;  %s1048_s2 = inlined_call_operand.vmem [shape: bf16[2,8,32], index: 2, kind: output, shape index: {}]  }
   0x1   :  { %s947_s11 = smov 0  }
   0x2 LB: > { %s24_s12 = sadd.s32 1, %s906_s10  ;;  %p750_p0 = scmp.ge.s32.totalorder %s910_s11, 1  ;;  %s910_s11 = sphi %s947_s11, %s12_s11   ;;  %s906_s10 = sphi %s945_s10, %s1050_s10   ;;  %s902_s9 = sphi %s943_s9, %s1049_s9  }
   0x3   : > { %p26_p1 = scmp.ge.s32.totalorder %s24_s12, 2  ;;  %p139_p2 = scmp.lt.s32.totalorder %s910_s11, 3 }
   0x5   : > { %s1052_s12 = smov (%p26_p1, %s24_s12), 0  ;;  %p140_p3 = pnand %p750_p0, %p139_p2 }
   0x6   : > { %p169_p4 = scmp.lt.s32.totalorder (!%p140_p3), %s902_s9, 1  ;;  %s914_s17 = smov (!%p140_p3), 96  }
   0x7   : > { %143 = sbr.rel (%p140_p3) target bundleno = 1538 (0x602), region = 28  ;;  %s915_s21 = smov (!%p140_p3), 64  }
   0x8   : > { %s916_s22 = smov (!%p140_p3), 88   ;;  %s917_s23 = smov (!%p140_p3), 72  }
   0x9   : > { %s918_s24 = smov (!%p140_p3), 120   ;;  %s919_s25 = smov (!%p140_p3), 80  }
   0xa   : > { %s920_s26 = smov (!%p140_p3), 112   ;;  %s921_s27 = smov (!%p140_p3), 104  }
   0xb   : > { %s922_s28 = smov (!%p140_p3), 56   ;;  %s923_s29 = smov (!%p140_p3), 48  }
   0xc   : > { %v912_v0 = vmov 0.0   ;;  %vm913_vm0 = vmmov 0   ;;  %s1054_s9 = smov (!%p169_p4, %s902_s9), 1  ;;  %vm195_vm1 = vcmask 64512   ;;  %vm260_vm2 = vcmask 1043456   ;;  %s924_s30 = smov 40  }
   0xd   : > { %782 = vmatprep.subr.bf16.mxu0 %v912_v0  ;;  %784 = vmatprep.mubr.msk.bf16.mxu0 %vm913_vm0, %v912_v0  ;;  %s967_s13 = sshll.u32 %s1054_s9, 2  ;;  %s925_s3 = smov 8   ;;  %vm653_vm3 = vcmask 130048   ;;  %vm655_vm4 = vcmask 195584   ;;  %vm658_vm5 = vcmask 257024  }
   0xe   : > { %788 = vmatprep.subr.bf16.mxu1 %v912_v0  ;;  %790 = vmatprep.mubr.msk.bf16.mxu1 %vm913_vm0, %v912_v0  ;;  %s179_s16 = scalar_lea.vmem %s1047_s1, %s967_s13  ;;  %s175_s20 = scalar_lea.vmem %s1046_s0, %s967_s13 }
   0xf   : > { %v973_v1 = vld [vmem:[%s179_s16] ss:$0 sps:$4 sm:$0xff]   ;;  %s926_s4 = smov 16   ;;  %s927_s5 = smov 24  }
  0x10   : > { %193 = vrot.lane.b32.xlu0 %v973_v1, %s914_s17  ;;  %v188_v4 = vld [vmem:[%s175_s20] sm:$0xf]  ;;  %255 = vrot.lane.b32.xlu1 %v973_v1, %s915_s21  ;;  %s186_s8 = scalar_lea.vmem %s1048_s2, %s967_s13 }
  0x11   : > { %v757_v18 = vcombine.low %v188_v4, %v188_v4 }
  0x14   : > { %309 = vrot.lane.b32.xlu1 %v973_v1, %s916_s22 }
  0x82   : > { %v194_v2 = vpop.permute.xlu0 %193  ;;  %v256_v11 = vpop.permute.xlu1 %255 }
  0x83   : > { %v200_v3 = vsel %vm195_vm1, %v194_v2, 0  ;;  %v262_v12 = vsel %vm260_vm2, %v256_v11, 0 }
  0x84   : > { %783 = vmatpush3.bf16.xpose.msra.mxu0 %v200_v3  ;;  %789 = vmatpush3.bf16.msra.mxu1 %v262_v12 }
  0x85   : > { %800 = vmatprep.subr.bf16.mxu0 %v912_v0  ;;  %794 = vmatprep.subr.bf16.mxu1 %v912_v0 }
  0x86   : > { %v310_v19 = vpop.permute.xlu1 %309 }
  0x87   : > { %v315_v25 = vsel %vm195_vm1, %v310_v19, 0 }
  0x8b   : > { %785 = vmatmul.mubr.msk.bf16.vlgmr.msra.gmra.mxu0 %vm195_vm1, %v188_v4 }
  0x8c   : > { %802 = vmatprep.mubr.msk.bf16.mxu0 %vm913_vm0, %v912_v0 }
 0x14b   : > { %v236_v5 = vpop.f32.mrf.mxu0 }
 0x14c   : > { %v242_v6 = vmul.f32 0.35355338, %v236_v5 }
 0x14d   : > { %v786_v7 = vpop.f32.mrf.mxu0 }
 0x14e   : > { %v243_v8 = vsel %vm195_vm1, %v242_v6, -inf }
 0x14f   : > { %244 = vmax.xlane.f32.xlu0 %v243_v8  ;;  %v239_v9 = vpop.f32.mrf.mxu0 }
 0x151   : > { %v787_v10 = vpop.f32.mrf.mxu0 }
 0x165   : > { %531 = vrot.lane.b32.xlu0 %v973_v1, %s917_s23 }
 0x1d8   : > { %v245_v13 = vpop.xlane.xlu0 %244 }
 0x1d9   : > { %v246_v14 = vsub.f32 %v242_v6, %v245_v13 }
 0x1db   : > { %v247_v15 = vmul.f32 1.442695, %v246_v14 }
 0x1dc   : > { %v532_v28 = vpop.permute.xlu0 %531 }
 0x1dd   : > { %872 = vpow2.f32 %v247_v15  ;;  %v537_v30 = vsel %vm195_vm1, %v532_v28, 0 }
 0x1ea   : > { %v873_v16 = vpop.eup %872 }
 0x1eb   : > { %v249_v17 = vsel %vm195_vm1, %v873_v16, 0.0 }
 0x1ec   : > { %250 = vadd.xlane.f32.xlu1 %v249_v17 }
 0x1fd   : > { %307 = vrot.lane.b32.xlu1 %v757_v18, %s918_s24 }
 0x201   : > { %420 = vrot.lane.b32.xlu1 %v973_v1, %s919_s25 }
 0x205   : > { %418 = vrot.lane.b32.xlu1 %v757_v18, %s920_s26 }
 0x209   : > { %529 = vrot.lane.b32.xlu1 %v757_v18, %s921_s27 }
 0x275   : > { %v251_v20 = vpop.xlane.xlu1 %250 }
 0x276   : > { %874 = vrcp.f32 %v251_v20 }
 0x279   : > { %v308_v23 = vpop.permute.xlu1 %307 }
 0x27d   : > { %v421_v26 = vpop.permute.xlu1 %420 }
 0x27e   : > { %v426_v27 = vsel %vm195_vm1, %v421_v26, 0 }
 0x281   : > { %v419_v29 = vpop.permute.xlu1 %418 }
 0x283   : > { %v875_v21 = vpop.eup %874 }
 0x284   : > { %v253_v22 = vmul.f32 %v875_v21, %v873_v16 }
 0x285   : > { %v530_v31 = vpop.permute.xlu1 %529 }
 0x286   : > { %v254_v24 = vpack.c.bf16 %v253_v22, %v253_v22 }
 0x288   : > { %791 = vmatmul.mubr.msk.bf16.vlgmr.msra.gmra.mxu1 %vm195_vm1, %v254_v24 }
 0x289   : > { %795 = vmatpush3.bf16.xpose.msra.mxu1 %v315_v25  ;;  %796 = vmatprep.mubr.msk.bf16.mxu1 %vm913_vm0, %v912_v0 }
 0x28a   : > { %806 = vmatprep.subr.bf16.mxu1 %v912_v0 }
 0x290   : > { %797 = vmatmul.mubr.msk.bf16.vlgmr.msra.gmra.mxu1 %vm195_vm1, %v308_v23 }
 0x291   : > { %807 = vmatpush3.bf16.xpose.msra.mxu1 %v426_v27  ;;  %808 = vmatprep.mubr.msk.bf16.mxu1 %vm913_vm0, %v912_v0 }
 0x292   : > { %818 = vmatprep.subr.bf16.mxu1 %v912_v0 }
 0x298   : > { %809 = vmatmul.mubr.msk.bf16.vlgmr.msra.gmra.mxu1 %vm195_vm1, %v419_v29 }
 0x299   : > { %819 = vmatpush3.bf16.xpose.msra.mxu1 %v537_v30  ;;  %820 = vmatprep.mubr.msk.bf16.mxu1 %vm913_vm0, %v912_v0 }
 0x2a0   : > { %821 = vmatmul.mubr.msk.bf16.vlgmr.msra.gmra.mxu1 %vm195_vm1, %v530_v31 }
 0x348   : > { %v1008_v32 = vpop.f32.mrf.mxu1 }
 0x34a   : > { %v792_v33 = vpop.f32.mrf.mxu1 }
 0x34c   : > { %v301_v34 = vpop.f32.mrf.mxu1 }
 0x34e   : > { %v793_v35 = vpop.f32.mrf.mxu1 }
 0x350   : > { %v351_v36 = vpop.f32.mrf.mxu1 }
 0x351   : > { %v357_v37 = vmul.f32 0.35355338, %v351_v36 }
 0x352   : > { %v798_v38 = vpop.f32.mrf.mxu1 }
 0x353   : > { %v358_v39 = vsel %vm195_vm1, %v357_v37, -inf }
 0x354   : > { %359 = vmax.xlane.f32.xlu1 %v358_v39  ;;  %v354_v40 = vpop.f32.mrf.mxu1 }
 0x356   : > { %v799_v41 = vpop.f32.mrf.mxu1 }
 0x358   : > { %v462_v42 = vpop.f32.mrf.mxu1 }
 0x359   : > { %v468_v43 = vmul.f32 0.35355338, %v462_v42 }
 0x35a   : > { %v810_v44 = vpop.f32.mrf.mxu1 }
 0x35b   : > { %v469_v45 = vsel %vm195_vm1, %v468_v43, -inf }
 0x35c   : > { %470 = vmax.xlane.f32.xlu0 %v469_v45  ;;  %v465_v46 = vpop.f32.mrf.mxu1 }
 0x35e   : > { %v811_v47 = vpop.f32.mrf.mxu1 }
 0x360   : > { %v573_v48 = vpop.f32.mrf.mxu1 }
 0x361   : > { %v579_v49 = vmul.f32 0.35355338, %v573_v48 }
 0x362   : > { %v822_v50 = vpop.f32.mrf.mxu1 }
 0x363   : > { %v580_v51 = vsel %vm195_vm1, %v579_v49, -inf }
 0x364   : > { %581 = vmax.xlane.f32.xlu1 %v580_v51  ;;  %v576_v52 = vpop.f32.mrf.mxu1 }
 0x366   : > { %v823_v53 = vpop.f32.mrf.mxu1 }
 0x3dd   : > { %v360_v54 = vpop.xlane.xlu1 %359 }
 0x3de   : > { %v361_v55 = vsub.f32 %v357_v37, %v360_v54 }
 0x3e0   : > { %v362_v56 = vmul.f32 1.442695, %v361_v55 }
 0x3e2   : > { %876 = vpow2.f32 %v362_v56 }
 0x3e5   : > { %v471_v2 = vpop.xlane.xlu0 %470 }
 0x3e6   : > { %v472_v3 = vsub.f32 %v468_v43, %v471_v2 }
 0x3e8   : > { %v473_v4 = vmul.f32 1.442695, %v472_v3 }
 0x3ed   : > { %v582_v57 = vpop.xlane.xlu1 %581 }
 0x3ee   : > { %v583_v58 = vsub.f32 %v579_v49, %v582_v57 }
 0x3ef   : > { %v877_v59 = vpop.eup %876 }
 0x3f0   : > { %v584_v60 = vmul.f32 1.442695, %v583_v58  ;;  %v364_v61 = vsel %vm195_vm1, %v877_v59, 0.0 }
 0x3f1   : > { %365 = vadd.xlane.f32.xlu1 %v364_v61 }
 0x3f2   : > { %878 = vpow2.f32 %v584_v60 }
 0x3f3   : > { %880 = vpow2.f32 %v473_v4 }
 0x3ff   : > { %v879_v62 = vpop.eup %878 }
 0x400   : > { %v586_v63 = vsel %vm195_vm1, %v879_v62, 0.0  ;;  %v881_v5 = vpop.eup %880 }
 0x401   : > { %587 = vadd.xlane.f32.xlu0 %v586_v63  ;;  %v475_v6 = vsel %vm195_vm1, %v881_v5, 0.0 }
 0x402   : > { %370 = vrot.lane.b32.xlu1 %v973_v1, %s922_s28 }
 0x417   : > { %481 = vrot.lane.b32.xlu0 %v973_v1, %s923_s29 }
 0x426   : > { %476 = vadd.xlane.f32.xlu1 %v475_v6 }
 0x437   : > { %592 = vrot.lane.b32.xlu1 %v973_v1, %s924_s30 }
 0x47a   : > { %v366_v7 = vpop.xlane.xlu1 %365 }
 0x47b   : > { %882 = vrcp.f32 %v366_v7 }
 0x47e   : > { %v371_v8 = vpop.permute.xlu1 %370 }
 0x47f   : > { %v376_v9 = vsel %vm260_vm2, %v371_v8, 0 }
 0x480   : > { %801 = vmatpush3.bf16.msra.mxu0 %v376_v9 }
 0x481   : > { %812 = vmatprep.subr.bf16.mxu0 %v912_v0 }
 0x488   : > { %v883_v10 = vpop.eup %882 }
 0x489   : > { %v368_v11 = vmul.f32 %v883_v10, %v877_v59 }
 0x48a   : > { %v588_v12 = vpop.xlane.xlu0 %587 }
 0x48b   : > { %v369_v13 = vpack.c.bf16 %v368_v11, %v368_v11 }
 0x48d   : > { %803 = vmatmul.mubr.msk.bf16.vlgmr.msra.gmra.mxu0 %vm195_vm1, %v369_v13 }
 0x48e   : > { %v482_v14 = vpop.permute.xlu0 %481  ;;  %814 = vmatprep.mubr.msk.bf16.mxu0 %vm913_vm0, %v912_v0 }
 0x48f   : > { %v487_v1 = vsel %vm260_vm2, %v482_v14, 0 }
 0x490   : > { %813 = vmatpush3.bf16.msra.mxu0 %v487_v1 }
 0x491   : > { %824 = vmatprep.subr.bf16.mxu0 %v912_v0 }
 0x4af   : > { %v477_v15 = vpop.xlane.xlu1 %476 }
 0x4b0   : > { %884 = vrcp.f32 %v477_v15 }
 0x4b1   : > { %886 = vrcp.f32 %v588_v12 }
 0x4b3   : > { %v593_v17 = vpop.permute.xlu1 %592 }
 0x4b4   : > { %v598_v19 = vsel %vm260_vm2, %v593_v17, 0 }
 0x4bd   : > { %v885_v16 = vpop.eup %884 }
 0x4be   : > { %v479_v18 = vmul.f32 %v885_v16, %v881_v5  ;;  %v887_v21 = vpop.eup %886 }
 0x4bf   : > { %v590_v22 = vmul.f32 %v887_v21, %v879_v62 }
 0x4c0   : > { %v480_v20 = vpack.c.bf16 %v479_v18, %v479_v18 }
 0x4c1   : > { %v591_v23 = vpack.c.bf16 %v590_v22, %v590_v22 }
 0x4c2   : > { %815 = vmatmul.mubr.msk.bf16.vlgmr.msra.gmra.mxu0 %vm195_vm1, %v480_v20 }
 0x4c3   : > { %825 = vmatpush3.bf16.msra.mxu0 %v598_v19  ;;  %826 = vmatprep.mubr.msk.bf16.mxu0 %vm913_vm0, %v912_v0 }
 0x4ca   : > { %827 = vmatmul.mubr.msk.bf16.vlgmr.msra.gmra.mxu0 %vm195_vm1, %v591_v23 }
 0x54d   : > { %v412_v24 = vpop.f32.mrf.mxu0 }
 0x54e   : > { %641 = vrot.lane.b32.xlu1 %v412_v24, %s925_s3 }
 0x54f   : > { %v804_v25 = vpop.f32.mrf.mxu0 }
 0x551   : > { %v415_v26 = vpop.f32.mrf.mxu0 }
 0x553   : > { %v805_v27 = vpop.f32.mrf.mxu0 }
 0x582   : > { %v523_v28 = vpop.f32.mrf.mxu0 }
 0x583   : > { %645 = vrot.lane.b32.xlu0 %v523_v28, %s926_s4 }
 0x584   : > { %v816_v29 = vpop.f32.mrf.mxu0 }
 0x586   : > { %v526_v30 = vpop.f32.mrf.mxu0 }
 0x588   : > { %v817_v31 = vpop.f32.mrf.mxu0 }
 0x58a   : > { %v634_v33 = vpop.f32.mrf.mxu0 }
 0x58b   : > { %649 = vrot.lane.b32.xlu1 %v634_v33, %s927_s5 }
 0x58c   : > { %v828_v0 = vpop.f32.mrf.mxu0 }
 0x58e   : > { %v637_v34 = vpop.f32.mrf.mxu0 }
 0x590   : > { %v829_v35 = vpop.f32.mrf.mxu0 }
 0x5c0   : > { %v642_v36 = vpop.permute.xlu1 %641 }
 0x5c1   : > { %v652_v38 = vsel %vm195_vm1, %v1008_v32, %v642_v36 }
 0x5f5   : > { %v646_v37 = vpop.permute.xlu0 %645 }
 0x5f6   : > { %v654_v39 = vsel %vm653_vm3, %v652_v38, %v646_v37 }
 0x5fd   : > { %v650_v40 = vpop.permute.xlu1 %649 }
 0x5fe   : > { %v656_v41 = vsel %vm655_vm4, %v654_v39, %v650_v40 }
 0x5ff   : > { %v657_v42 = vpack.c.bf16 %v656_v41, %v656_v41 }
 0x601   : > { %659 = vst.msk [vmem:[%s186_s8] sm:$0xf] %vm658_vm5, %v657_v42 }
 0x602 PF: > { %s12_s11 = sadd.s32 1, %s910_s11   ;;  %s1049_s9 = smov %s906_s10 }
 0x603   : > { %p9_p5 = scmp.ge.s32.totalorder %s12_s11, 4   ;;  %s1050_s10 = smov %s1052_s12 }
 0x605   :  { %11 = sbr.rel (!%p9_p5) target bundleno = 2 (0x2), region = 61 }

// kernel: informer_forward.43
= control target key start
LH: loop header
LB: loop body
LE: loop exit
PB: predicated region body
PF: predicated region fallthrough
CT: control target
= control target key end

     0   :  { %v130_v0 = vmov 0.0   ;;  %vm131_vm0 = vmmov 0   ;;  %vm45_vm1 = vcmask 261120   ;;  %vm98_vm2 = vcmask 257024   ;;  %s170_s1 = inlined_call_operand.vmem [shape: bf16[32,32], index: 1, kind: input, shape index: {}]   ;;  %s171_s0 = inlined_call_operand.vmem [shape: bf16[16,32], index: 0, kind: input, shape index: {}]   ;;  %s172_s2 = inlined_call_operand.vmem [shape: f32[1,32], index: 2, kind: input, shape index: {}]   ;;  %s173_s3 = inlined_call_operand.vmem [shape: bf16[16,32], index: 3, kind: output, shape index: {}]  }
   0x1   :  { %117 = vmatprep.subr.bf16.mxu0 %v130_v0  ;;  %v127_v1 = vld [vmem:[%s170_s1 + $0x8] sm:$0xff]   ;;  %121 = vmatprep.mubr.msk.bf16.mxu0 %vm131_vm0, %v130_v0  ;;  %v128_v2 = vld [vmem:[%s170_s1] sm:$0xff]  }
   0x2   :  { %118 = vmatpush3.bf16.msra.mxu0 %v127_v1  ;;  %v129_v3 = vld [vmem:[%s171_s0] sm:$0xff]  }
   0x3   :  { %119 = vmatprep.subr.bf16.mxu0 %v130_v0  ;;  %v105_v4 = vld [vmem:[%s172_s2] ss:$0 sm:$0xff] }
   0x6   :  { %120 = vmatpush3.bf16.msra.mxu0 %v128_v2 }
   0x9   :  { %122 = vmatmul.mubr.msk.bf16.vlgmr.msra.gmra.mxu0 %vm45_vm1, %v129_v3 }
  0xc9   :  { %v83_v5 = vpop.f32.mrf.mxu0 }
  0xca   :  { %v84_v6 = vadd.f32 %v105_v4, %v83_v5 }
  0xcb   :  { %v123_v7 = vpop.f32.mrf.mxu0 }
  0xcc   :  { %v112_v8 = vpack.c.bf16 %v84_v6, %v84_v6 }
  0xcd   :  { %v86_v9 = vpop.f32.mrf.mxu0 }
  0xce   :  { %99 = vst.msk [vmem:[%s173_s3] sm:$0xf] %vm98_vm2, %v112_v8  ;;  %v87_v10 = vadd.f32 %v105_v4, %v86_v9 }
  0xcf   :  { %v124_v11 = vpop.f32.mrf.mxu0 }
  0xd0   :  { %v113_v12 = vpack.c.bf16 %v87_v10, %v87_v10 }
  0xd2   :  { %100 = vst.msk [vmem:[%s173_s3 + $0x4] sm:$0xf] %vm98_vm2, %v113_v12 }

// kernel: informer_forward.44
= control target key start
LH: loop header
LB: loop body
LE: loop exit
PB: predicated region body
PF: predicated region fallthrough
CT: control target
= control target key end

     0   :  { %vm25_vm0 = vcmask 261120   ;;  %s139_s0 = inlined_call_operand.vmem [shape: f32[16,32], index: 0, kind: input, shape index: {}]   ;;  %s140_s1 = inlined_call_operand.vmem [shape: bf16[16,32], index: 1, kind: input, shape index: {}]   ;;  %s141_s2 = inlined_call_operand.vmem [shape: f32[1,32], index: 2, kind: input, shape index: {}]   ;;  %s142_s3 = inlined_call_operand.vmem [shape: f32[1,32], index: 3, kind: input, shape index: {}]   ;;  %s143_s4 = inlined_call_operand.vmem [shape: f32[16,32], index: 4, kind: output, shape index: {}]  }
   0x1   :  { %v17_v0 = vld [vmem:[%s139_s0] sm:$0xff]  ;;  %v18_v2 = vld [vmem:[%s139_s0 + $0x8] sm:$0xff] }
   0x2   :  { %v80_v1 = vld [vmem:[%s140_s1] sm:$0xff]  }
   0x3   :  { %v81_v3 = vunpack.c.l.bf16 %v80_v1  ;;  %v82_v4 = vunpack.c.h.bf16 %v80_v1  ;;  %v77_v26 = vld [vmem:[%s141_s2] ss:$0 sm:$0xff] }
   0x4   :  { %v78_v28 = vld [vmem:[%s142_s3] ss:$0 sm:$0xff] }
   0x5   :  { %v23_v5 = vadd.f32 %v81_v3, %v17_v0  ;;  %v24_v6 = vadd.f32 %v82_v4, %v18_v2 }
   0x7   :  { %v26_v7 = vsel %vm25_vm0, %v23_v5, 0.0  ;;  %v29_v8 = vsel %vm25_vm0, %v24_v6, 0.0 }
   0x8   :  { %27 = vadd.xlane.f32.xlu0 %v26_v7 }
   0xc   :  { %30 = vadd.xlane.f32.xlu0 %v29_v8 }
  0x91   :  { %v28_v9 = vpop.xlane.xlu0 %27 }
  0x92   :  { %v33_v10 = vmul.f32 0.03125, %v28_v9 }
  0x94   :  { %v35_v11 = vsub.f32 %v23_v5, %v33_v10 }
  0x95   :  { %v31_v12 = vpop.xlane.xlu0 %30 }
  0x96   :  { %v34_v13 = vmul.f32 0.03125, %v31_v12  ;;  %v37_v14 = vmul.f32 %v35_v11, %v35_v11 }
  0x98   :  { %v36_v15 = vsub.f32 %v24_v6, %v34_v13  ;;  %v39_v16 = vsel %vm25_vm0, %v37_v14, 0.0 }
  0x99   :  { %40 = vadd.xlane.f32.xlu1 %v39_v16 }
  0x9a   :  { %v38_v17 = vmul.f32 %v36_v15, %v36_v15 }
  0x9c   :  { %v42_v18 = vsel %vm25_vm0, %v38_v17, 0.0 }
  0x9d   :  { %43 = vadd.xlane.f32.xlu1 %v42_v18 }
 0x122   :  { %v41_v19 = vpop.xlane.xlu1 %40 }
 0x123   :  { %v45_v20 = vmul.f32 0.03125, %v41_v19 }
 0x125   :  { %v47_v21 = vadd.f32 1e-05, %v45_v20 }
 0x126   :  { %v44_v22 = vpop.xlane.xlu1 %43 }
 0x127   :  { %83 = vrsqrt.f32 %v47_v21  ;;  %v46_v23 = vmul.f32 0.03125, %v44_v22 }
 0x129   :  { %v48_v24 = vadd.f32 1e-05, %v46_v23 }
 0x12b   :  { %85 = vrsqrt.f32 %v48_v24 }
 0x134   :  { %v84_v25 = vpop.eup %83 }
 0x135   :  { %v51_v27 = vmul.f32 %v84_v25, %v35_v11 }
 0x137   :  { %v60_v29 = vmul.f32 %v77_v26, %v51_v27 }
 0x138   :  { %v86_v30 = vpop.eup %85 }
 0x139   :  { %v69_v31 = vadd.f32 %v78_v28, %v60_v29  ;;  %v52_v32 = vmul.f32 %v86_v30, %v36_v15 }
 0x13b   :  { %71 = vst.msk [vmem:[%s143_s4] sm:$0xff] %vm25_vm0, %v69_v31  ;;  %v61_v33 = vmul.f32 %v77_v26, %v52_v32 }
 0x13d   :  { %v70_v34 = vadd.f32 %v78_v28, %v61_v33 }
 0x13f   :  { %72 = vst.msk [vmem:[%s143_s4 + $0x8] sm:$0xff] %vm25_vm0, %v70_v34 }

// kernel: informer_forward.45
= control target key start
LH: loop header
LB: loop body
LE: loop exit
PB: predicated region body
PF: predicated region fallthrough
CT: control target
= control target key end

     0   :  { %v146_v0 = vmov 0.0   ;;  %vm147_vm0 = vmmov 0   ;;  %vm41_vm1 = vcmask 261120   ;;  %vm112_vm2 = vcmask 257024   ;;  %s189_s1 = inlined_call_operand.vmem [shape: bf16[32,32], index: 1, kind: input, shape index: {}]   ;;  %s190_s0 = inlined_call_operand.vmem [shape: f32[16,32], index: 0, kind: input, shape index: {}]   ;;  %s191_s2 = inlined_call_operand.vmem [shape: f32[1,32], index: 2, kind: input, shape index: {}]   ;;  %s192_s3 = inlined_call_operand.vmem [shape: bf16[16,32], index: 3, kind: output, shape index: {}]  }
   0x1   :  { %130 = vmatprep.subr.bf16.mxu0 %v146_v0  ;;  %v140_v1 = vld [vmem:[%s189_s1 + $0x8] sm:$0xff]   ;;  %134 = vmatprep.mubr.msk.bf16.mxu0 %vm147_vm0, %v146_v0  ;;  %v141_v2 = vld [vmem:[%s189_s1] sm:$0xff]  }
   0x2   :  { %131 = vmatpush3.bf16.msra.mxu0 %v140_v1  ;;  %v15_v3 = vld [vmem:[%s190_s0] sm:$0xff]  ;;  %v16_v4 = vld [vmem:[%s190_s0 + $0x8] sm:$0xff] }
   0x3   :  { %132 = vmatprep.subr.bf16.mxu0 %v146_v0  ;;  %v17_v5 = vpack.c.bf16 %v16_v4, %v15_v3  ;;  %v119_v6 = vld [vmem:[%s191_s2] ss:$0 sm:$0xff] }
   0x6   :  { %133 = vmatpush3.bf16.msra.mxu0 %v141_v2 }
   0x9   :  { %135 = vmatmul.mubr.msk.bf16.vlgmr.msra.gmra.mxu0 %vm41_vm1, %v17_v5 }
  0xc9   :  { %v79_v7 = vpop.f32.mrf.mxu0 }
  0xca   :  { %v80_v8 = vadd.f32 %v119_v6, %v79_v7 }
  0xcb   :  { %v136_v9 = vpop.f32.mrf.mxu0 }
  0xcc   :  { %v88_v10 = vmul.f32 0.044715, %v80_v8  ;;  %v86_v24 = vmul.f32 0.5, %v80_v8 }
  0xcd   :  { %v82_v11 = vpop.f32.mrf.mxu0 }
  0xce   :  { %v90_v12 = vmul.f32 %v88_v10, %v80_v8  ;;  %v83_v13 = vadd.f32 %v119_v6, %v82_v11 }
  0xcf   :  { %v137_v14 = vpop.f32.mrf.mxu0 }
  0xd0   :  { %v92_v15 = vmul.f32 %v90_v12, %v80_v8  ;;  %v89_v16 = vmul.f32 0.044715, %v83_v13  ;;  %v87_v29 = vmul.f32 0.5, %v83_v13 }
  0xd2   :  { %v94_v17 = vadd.f32 %v92_v15, %v80_v8  ;;  %v91_v18 = vmul.f32 %v89_v16, %v83_v13 }
  0xd4   :  { %v96_v19 = vmul.f32 0.7978846, %v94_v17  ;;  %v93_v20 = vmul.f32 %v91_v18, %v83_v13 }
  0xd6   :  { %142 = vtanh.f32 %v96_v19  ;;  %v95_v21 = vadd.f32 %v93_v20, %v83_v13 }
  0xd8   :  { %v97_v22 = vmul.f32 0.7978846, %v95_v21 }
  0xda   :  { %144 = vtanh.f32 %v97_v22 }
  0xe3   :  { %v143_v23 = vpop.eup %142 }
  0xe4   :  { %v100_v25 = vadd.f32 1.0, %v143_v23 }
  0xe6   :  { %v102_v26 = vmul.f32 %v100_v25, %v86_v24 }
  0xe7   :  { %v145_v27 = vpop.eup %144 }
  0xe8   :  { %v125_v28 = vpack.c.bf16 %v102_v26, %v102_v26  ;;  %v101_v30 = vadd.f32 1.0, %v145_v27 }
  0xea   :  { %113 = vst.msk [vmem:[%s192_s3] sm:$0xf] %vm112_vm2, %v125_v28  ;;  %v103_v31 = vmul.f32 %v101_v30, %v87_v29 }
  0xec   :  { %v126_v32 = vpack.c.bf16 %v103_v31, %v103_v31 }
  0xee   :  { %114 = vst.msk [vmem:[%s192_s3 + $0x4] sm:$0xf] %vm112_vm2, %v126_v32 }

// kernel: informer_forward.48
= control target key start
LH: loop header
LB: loop body
LE: loop exit
PB: predicated region body
PF: predicated region fallthrough
CT: control target
= control target key end

     0   :  { %vm16_vm0 = vcmask 261120   ;;  %s118_s0 = inlined_call_operand.vmem [shape: f32[16,32], index: 0, kind: input, shape index: {}]   ;;  %s119_s1 = inlined_call_operand.vmem [shape: f32[1,32], index: 1, kind: input, shape index: {}]   ;;  %s120_s2 = inlined_call_operand.vmem [shape: f32[1,32], index: 2, kind: input, shape index: {}]   ;;  %s121_s3 = inlined_call_operand.vmem [shape: f32[16,32], index: 3, kind: output, shape index: {}]  }
   0x1   :  { %v14_v0 = vld [vmem:[%s118_s0] sm:$0xff]  ;;  %v15_v1 = vld [vmem:[%s118_s0 + $0x8] sm:$0xff] }
   0x2   :  { %v17_v2 = vsel %vm16_vm0, %v14_v0, 0.0  ;;  %v20_v3 = vsel %vm16_vm0, %v15_v1, 0.0  ;;  %v68_v21 = vld [vmem:[%s119_s1] ss:$0 sm:$0xff] }
   0x3   :  { %18 = vadd.xlane.f32.xlu0 %v17_v2  ;;  %v69_v23 = vld [vmem:[%s120_s2] ss:$0 sm:$0xff] }
   0x7   :  { %21 = vadd.xlane.f32.xlu0 %v20_v3 }
  0x8c   :  { %v19_v4 = vpop.xlane.xlu0 %18 }
  0x8d   :  { %v24_v5 = vmul.f32 0.03125, %v19_v4 }
  0x8f   :  { %v26_v6 = vsub.f32 %v14_v0, %v24_v5 }
  0x90   :  { %v22_v7 = vpop.xlane.xlu0 %21 }
  0x91   :  { %v25_v8 = vmul.f32 0.03125, %v22_v7  ;;  %v28_v9 = vmul.f32 %v26_v6, %v26_v6 }
  0x93   :  { %v27_v10 = vsub.f32 %v15_v1, %v25_v8  ;;  %v30_v11 = vsel %vm16_vm0, %v28_v9, 0.0 }
  0x94   :  { %31 = vadd.xlane.f32.xlu1 %v30_v11 }
  0x95   :  { %v29_v12 = vmul.f32 %v27_v10, %v27_v10 }
  0x97   :  { %v33_v13 = vsel %vm16_vm0, %v29_v12, 0.0 }
  0x98   :  { %34 = vadd.xlane.f32.xlu1 %v33_v13 }
 0x11d   :  { %v32_v14 = vpop.xlane.xlu1 %31 }
 0x11e   :  { %v36_v15 = vmul.f32 0.03125, %v32_v14 }
 0x120   :  { %v38_v16 = vadd.f32 1e-05, %v36_v15 }
 0x121   :  { %v35_v17 = vpop.xlane.xlu1 %34 }
 0x122   :  { %70 = vrsqrt.f32 %v38_v16  ;;  %v37_v18 = vmul.f32 0.03125, %v35_v17 }
 0x124   :  { %v39_v19 = vadd.f32 1e-05, %v37_v18 }
 0x126   :  { %72 = vrsqrt.f32 %v39_v19 }
 0x12f   :  { %v71_v20 = vpop.eup %70 }
 0x130   :  { %v42_v22 = vmul.f32 %v71_v20, %v26_v6 }
 0x132   :  { %v51_v24 = vmul.f32 %v68_v21, %v42_v22 }
 0x133   :  { %v73_v25 = vpop.eup %72 }
 0x134   :  { %v60_v26 = vadd.f32 %v69_v23, %v51_v24  ;;  %v43_v27 = vmul.f32 %v73_v25, %v27_v10 }
 0x136   :  { %62 = vst.msk [vmem:[%s121_s3] sm:$0xff] %vm16_vm0, %v60_v26  ;;  %v52_v28 = vmul.f32 %v68_v21, %v43_v27 }
 0x138   :  { %v61_v29 = vadd.f32 %v69_v23, %v52_v28 }
 0x13a   :  { %63 = vst.msk [vmem:[%s121_s3 + $0x8] sm:$0xff] %vm16_vm0, %v61_v29 }

// kernel: informer_forward.55
= control target key start
LH: loop header
LB: loop body
LE: loop exit
PB: predicated region body
PF: predicated region fallthrough
CT: control target
= control target key end

     0   :  { %s743_s15 = smov 0   ;;  %s810_s0 = inlined_call_operand.vmem [shape: f32[2,8,32], index: 0, kind: input, shape index: {}]   ;;  %s811_s1 = inlined_call_operand.vmem [shape: bf16[5,32,64], index: 1, kind: input, shape index: {}]   ;;  %s812_s2 = inlined_call_operand.vmem [shape: f32[1,64], index: 2, kind: input, shape index: {}]   ;;  %s813_s3 = inlined_call_operand.vmem [shape: f32[1,64], index: 3, kind: input, shape index: {}]   ;;  %s814_s4 = inlined_call_operand.vmem [shape: bf16[2,8,64], index: 4, kind: output, shape index: {}]  }
   0x1 LB: > { %s591_s16 = sadd.s32 4294967295, %s714_s15   ;;  %p595_p0 = scmp.ge.s32.totalorder %s714_s15, 1  ;;  %s714_s15 = sphi %s743_s15, %s14_s15  }
   0x2   : > { %p161_p1 = scmp.lt.s32.totalorder %s714_s15, 3 }
   0x4   : > { %p162_p2 = pnand %p595_p0, %p161_p1 }
   0x5   : > { %p185_p3 = scmp.lt.s32.totalorder (!%p162_p2), %s591_s16, 1 }
   0x6   : > { %165 = sbr.rel (%p162_p2) target bundleno = 245 (0xf5), region = 36 }
   0xb   : > { %v698_v0 = vld [vmem:[%s811_s1 + $0x18] sm:$0xff]   ;;  %v716_v1 = vmov 0.0   ;;  %v699_v2 = vld [vmem:[%s811_s1 + $0x8] sm:$0xff]   ;;  %v700_v3 = vld [vmem:[%s811_s1 + $0x10] sm:$0xff]   ;;  %vm717_vm0 = vmmov 0   ;;  %s816_s16 = smov (!%p185_p3, %s591_s16), 1 }
   0xc   : > { %648 = vmatprep.subr.bf16.mxu0 %v716_v1  ;;  %656 = vmatprep.subr.bf16.mxu1 %v716_v1  ;;  %v701_v4 = vld [vmem:[%s811_s1] sm:$0xff]   ;;  %s596_s25 = sshll.u32 %s816_s16, 3  ;;  %vm199_vm1 = vcmask 1040384   ;;  %vm203_vm2 = vcmask 1044480   ;;  %vm232_vm3 = vcmask 261120   ;;  %v703_v9 = vld [vmem:[%s811_s1 + $0x38] sm:$0xff]  }
   0xd   : > { %649 = vmatpush3.bf16.msra.mxu0 %v698_v0  ;;  %652 = vmatprep.mubr.msk.bf16.mxu0 %vm717_vm0, %v716_v1  ;;  %s188_s28 = scalar_lea.vmem %s810_s0, %s596_s25  ;;  %v705_v14 = vld [vmem:[%s811_s1 + $0x30] sm:$0xff]   ;;  %v702_v18 = vld [vmem:[%s811_s1 + $0x28] sm:$0xff]   ;;  %v704_v21 = vld [vmem:[%s811_s1 + $0x20] sm:$0xff]   ;;  %s597_s21 = sshll.u32 %s816_s16, 2  ;;  %vm536_vm4 = vcmask 519168  }
   0xe   : > { %657 = vmatpush3.bf16.msra.mxu1 %v699_v2  ;;  %650 = vmatprep.subr.bf16.mxu0 %v716_v1  ;;  %v194_v5 = vld [vmem:[%s188_s28] sm:$0xff]  ;;  %v706_v23 = vld [vmem:[%s811_s1 + $0x48] sm:$0xff]   ;;  %s192_s24 = scalar_lea.vmem %s814_s4, %s597_s21 }
   0xf   : > { %658 = vmatprep.subr.bf16.mxu1 %v716_v1  ;;  %660 = vmatprep.mubr.msk.bf16.mxu1 %vm717_vm0, %v716_v1  ;;  %v195_v6 = vpack.c.bf16 %v194_v5, %v194_v5  ;;  %v707_v24 = vld [vmem:[%s811_s1 + $0x40] sm:$0xff]  }
  0x10   : > { %v629_v46 = vld [vmem:[%s812_s2] ss:$0 sm:$0xff] }
  0x11   : > { %651 = vmatpush3.bf16.msra.mxu0 %v700_v3  ;;  %v197_v7 = vrot.slane %v195_v6, 3  ;;  %v198_v8 = vrot.slane %v195_v6, 7  ;;  %v630_v48 = vld [vmem:[%s813_s3] ss:$0 sm:$0xff] }
  0x12   : > { %659 = vmatpush3.bf16.msra.mxu1 %v701_v4  ;;  %664 = vmatprep.subr.bf16.mxu0 %v716_v1 }
  0x13   : > { %672 = vmatprep.subr.bf16.mxu1 %v716_v1  ;;  %v202_v10 = vsel %vm199_vm1, %v197_v7, %v198_v8 }
  0x14   : > { %v204_v11 = vsel %vm203_vm2, %v202_v10, %v197_v7 }
  0x15   : > { %v214_v12 = vshrl.u32 %v204_v11, 16  ;;  %v216_v13 = vshll.u32 %v204_v11, 16  ;;  %661 = vmatmul.mubr.msk.bf16.vlgmr.msra.gmra.mxu1 %vm232_vm3, %v204_v11  ;;  %v336_v22 = vrot.slane %v204_v11, 1  ;;  %v462_v25 = vrot.slane %v204_v11, 2 }
  0x16   : > { %673 = vmatpush3.bf16.msra.mxu1 %v703_v9  ;;  %676 = vmatprep.mubr.msk.bf16.mxu1 %vm717_vm0, %v716_v1 }
  0x17   : > { %v218_v15 = vrot.slane %v216_v13, 1  ;;  %v398_v16 = vrot.slane %v214_v12, 1  ;;  %v399_v17 = vrot.slane %v216_v13, 2  ;;  %674 = vmatprep.subr.bf16.mxu1 %v716_v1 }
  0x19   : > { %v219_v19 = vor.u32 %v218_v15, %v214_v12  ;;  %v400_v20 = vor.u32 %v399_v17, %v398_v16 }
  0x1a   : > { %675 = vmatpush3.bf16.msra.mxu1 %v705_v14 }
  0x1b   : > { %653 = vmatmul.mubr.msk.bf16.vlgmr.msra.gmra.mxu0 %vm232_vm3, %v219_v19 }
  0x1c   : > { %665 = vmatpush3.bf16.msra.mxu0 %v702_v18  ;;  %668 = vmatprep.mubr.msk.bf16.mxu0 %vm717_vm0, %v716_v1 }
  0x1d   : > { %666 = vmatprep.subr.bf16.mxu0 %v716_v1  ;;  %677 = vmatmul.mubr.msk.bf16.vlgmr.msra.gmra.mxu1 %vm232_vm3, %v400_v20 }
  0x20   : > { %667 = vmatpush3.bf16.msra.mxu0 %v704_v21 }
  0x21   : > { %680 = vmatprep.subr.bf16.mxu0 %v716_v1 }
  0x23   : > { %669 = vmatmul.mubr.msk.bf16.vlgmr.msra.gmra.mxu0 %vm232_vm3, %v336_v22 }
  0x24   : > { %681 = vmatpush3.bf16.msra.mxu0 %v706_v23  ;;  %684 = vmatprep.mubr.msk.bf16.mxu0 %vm717_vm0, %v716_v1 }
  0x25   : > { %682 = vmatprep.subr.bf16.mxu0 %v716_v1 }
  0x28   : > { %683 = vmatpush3.bf16.msra.mxu0 %v707_v24 }
  0x2b   : > { %685 = vmatmul.mubr.msk.bf16.vlgmr.msra.gmra.mxu0 %vm232_vm3, %v462_v25 }
  0xd5   : > { %v324_v26 = vpop.f32.mrf.mxu1 }
  0xd7   : > { %v662_v27 = vpop.f32.mrf.mxu1 }
  0xd9   : > { %v327_v28 = vpop.f32.mrf.mxu1 }
  0xdb   : > { %v270_v29 = vpop.f32.mrf.mxu0  ;;  %v663_v30 = vpop.f32.mrf.mxu1 }
  0xdc   : > { %v325_v39 = vadd.f32 %v324_v26, %v270_v29 }
  0xdd   : > { %v654_v31 = vpop.f32.mrf.mxu0  ;;  %v450_v32 = vpop.f32.mrf.mxu1 }
  0xdf   : > { %v273_v33 = vpop.f32.mrf.mxu0  ;;  %v678_v34 = vpop.f32.mrf.mxu1 }
  0xe1   : > { %v655_v35 = vpop.f32.mrf.mxu0  ;;  %v453_v36 = vpop.f32.mrf.mxu1 }
  0xe3   : > { %v386_v37 = vpop.f32.mrf.mxu0  ;;  %v679_v38 = vpop.f32.mrf.mxu1 }
  0xe4   : > { %v392_v41 = vadd.f32 %v386_v37, %v325_v39 }
  0xe5   : > { %v670_v40 = vpop.f32.mrf.mxu0 }
  0xe6   : > { %v456_v44 = vadd.f32 %v450_v32, %v392_v41 }
  0xe7   : > { %v389_v42 = vpop.f32.mrf.mxu0 }
  0xe9   : > { %v671_v43 = vpop.f32.mrf.mxu0 }
  0xeb   : > { %v512_v45 = vpop.f32.mrf.mxu0 }
  0xec   : > { %v518_v47 = vadd.f32 %v512_v45, %v456_v44 }
  0xed   : > { %v686_v49 = vpop.f32.mrf.mxu0 }
  0xee   : > { %v526_v50 = vmul.f32 %v629_v46, %v518_v47 }
  0xef   : > { %v515_v51 = vpop.f32.mrf.mxu0 }
  0xf0   : > { %v534_v52 = vadd.f32 %v630_v48, %v526_v50 }
  0xf1   : > { %v687_v53 = vpop.f32.mrf.mxu0 }
  0xf2   : > { %v535_v54 = vpack.c.bf16 %v534_v52, %v534_v52 }
  0xf4   : > { %537 = vst.msk [vmem:[%s192_s24] sm:$0xf] %vm536_vm4, %v535_v54 }
  0xf5 PF: > { %s14_s15 = sadd.s32 1, %s714_s15  }
  0xf6   : > { %p11_p4 = scmp.ge.s32.totalorder %s14_s15, 4  }
  0xf8   :  { %13 = sbr.rel (!%p11_p4) target bundleno = 1 (0x1), region = 70 }

// kernel: informer_forward.51
= control target key start
LH: loop header
LB: loop body
LE: loop exit
PB: predicated region body
PF: predicated region fallthrough
CT: control target
= control target key end

     0   :  { %s1108_s9 = smov 0   ;;  %s1110_s10 = smov 0   ;;  %s1256_s0 = inlined_call_operand.vmem [shape: bf16[2,16,96], index: 0, kind: input, shape index: {}, may-alias: {0,1}]   ;;  %s1257_s1 = inlined_call_operand.vmem [shape: bf16[2,16,96], index: 1, kind: input, shape index: {}, may-alias: {0,1}]   ;;  %s1258_s2 = inlined_call_operand.vmem [shape: bf16[2,16,32], index: 2, kind: output, shape index: {}]  }
   0x1   :  { %s1112_s11 = smov 0  }
   0x2 LB: > { %s24_s12 = sadd.s32 1, %s1071_s10  ;;  %p874_p0 = scmp.ge.s32.totalorder %s1075_s11, 1  ;;  %s1075_s11 = sphi %s1112_s11, %s12_s11   ;;  %s1071_s10 = sphi %s1110_s10, %s1260_s10   ;;  %s1067_s9 = sphi %s1108_s9, %s1259_s9  }
   0x3   : > { %p26_p1 = scmp.ge.s32.totalorder %s24_s12, 2  ;;  %p143_p2 = scmp.lt.s32.totalorder %s1075_s11, 3 }
   0x5   : > { %s1262_s12 = smov (%p26_p1, %s24_s12), 0  ;;  %p144_p3 = pnand %p874_p0, %p143_p2 }
   0x6   : > { %p179_p4 = scmp.lt.s32.totalorder (!%p144_p3), %s1067_s9, 1  ;;  %s1079_s20 = smov (!%p144_p3), 96  }
   0x7   : > { %147 = sbr.rel (%p144_p3) target bundleno = 1511 (0x5e7), region = 28  ;;  %s1080_s21 = smov (!%p144_p3), 64  }
   0x8   : > { %s1081_s22 = smov (!%p144_p3), 80   ;;  %s1082_s23 = smov (!%p144_p3), 88  }
   0x9   : > { %s1083_s24 = smov (!%p144_p3), 120   ;;  %s1084_s25 = smov (!%p144_p3), 112  }
   0xa   : > { %s1085_s26 = smov (!%p144_p3), 72   ;;  %s1086_s27 = smov (!%p144_p3), 104  }
   0xb   : > { %s1087_s28 = smov (!%p144_p3), 56   ;;  %s1088_s29 = smov (!%p144_p3), 40  }
   0xc   : > { %v1077_v0 = vmov 0.0   ;;  %vm1078_vm0 = vmmov 0   ;;  %s1264_s9 = smov (!%p179_p4, %s1067_s9), 1  ;;  %vm231_vm1 = vcmask 64512   ;;  %v209_v5 = vlaneseq  ;;  %s1089_s30 = smov 48  }
   0xd   : > { %916 = vmatprep.subr.bf16.mxu0 %v1077_v0  ;;  %918 = vmatprep.mubr.msk.bf16.mxu0 %vm1078_vm0, %v1077_v0  ;;  %s1132_s13 = sshll.u32 %s1264_s9, 3  ;;  %vm283_vm3 = vcmask 130048   ;;  %s1090_s3 = smov 8   ;;  %vm757_vm5 = vcmask 195584   ;;  %vm768_vm6 = vcmask 257024  }
   0xe   : > { %922 = vmatprep.subr.bf16.mxu1 %v1077_v0  ;;  %924 = vmatprep.mubr.msk.bf16.mxu1 %vm1078_vm0, %v1077_v0  ;;  %s192_s16 = scalar_lea.vmem %s1257_s1, %s1132_s13  ;;  %s186_s19 = scalar_lea.vmem %s1256_s0, %s1132_s13  ;;  %v1150_v6 = vshrl.u32 %v209_v5, 7  ;;  %v1152_v7 = vand.u32 127, %v209_v5 }
   0xf   : > { %v1138_v1 = vld [vmem:[%s192_s16] sm:$0xff]   ;;  %s1091_s4 = smov 16   ;;  %s1092_s5 = smov 24  }
  0x10   : > { %229 = vrot.lane.b32.xlu0 %v1138_v1, %s1079_s20  ;;  %v1020_v4 = vld [vmem:[%s186_s19] sm:$0xff]   ;;  %vm217_vm2 = vcmp.le.s32.totalorder %v1152_v7, %v1150_v6  ;;  %v1157_v9 = vadd.s32 8, %v1150_v6  ;;  %s201_s8 = scalar_lea.vmem %s1258_s2, %s1132_s13 }
  0x12   : > { %vm218_vm4 = vcmp.le.s32.totalorder %v1152_v7, %v1157_v9 }
  0x82   : > { %v230_v2 = vpop.permute.xlu0 %229 }
  0x83   : > { %v236_v3 = vsel %vm231_vm1, %v230_v2, 0 }
  0x84   : > { %917 = vmatpush3.bf16.xpose.msra.mxu0 %v236_v3 }
  0x85   : > { %934 = vmatprep.subr.bf16.mxu0 %v1077_v0 }
  0x8b   : > { %919 = vmatmul.mubr.msk.bf16.vlgmr.msra.gmra.mxu0 %vm231_vm1, %v1020_v4 }
  0x8c   : > { %936 = vmatprep.mubr.msk.bf16.mxu0 %vm1078_vm0, %v1077_v0 }
 0x14b   : > { %v272_v8 = vpop.f32.mrf.mxu0 }
 0x14c   : > { %v279_v10 = vmul.f32 0.35355338, %v272_v8 }
 0x14d   : > { %v920_v11 = vpop.f32.mrf.mxu0 }
 0x14e   : > { %v281_v12 = vsel %vm217_vm2, %v279_v10, -1e+30 }
 0x14f   : > { %v275_v13 = vpop.f32.mrf.mxu0  ;;  %v284_v14 = vsel %vm283_vm3, %v281_v12, -inf }
 0x150   : > { %v280_v15 = vmul.f32 0.35355338, %v275_v13  ;;  %285 = vmax.xlane.f32.xlu0 %v284_v14 }
 0x151   : > { %v921_v16 = vpop.f32.mrf.mxu0 }
 0x152   : > { %v282_v17 = vsel %vm218_vm4, %v280_v15, -1e+30 }
 0x153   : > { %v287_v18 = vsel %vm283_vm3, %v282_v17, -inf }
 0x154   : > { %288 = vmax.xlane.f32.xlu1 %v287_v18 }
 0x165   : > { %307 = vrot.lane.b32.xlu1 %v1138_v1, %s1080_s21 }
 0x166   : > { %481 = vrot.lane.b32.xlu0 %v1138_v1, %s1081_s22 }
 0x1d9   : > { %v286_v19 = vpop.xlane.xlu0 %285 }
 0x1da   : > { %v290_v20 = vsub.f32 %v281_v12, %v286_v19 }
 0x1dc   : > { %v292_v21 = vmul.f32 1.442695, %v290_v20 }
 0x1dd   : > { %v289_v22 = vpop.xlane.xlu1 %288  ;;  %v482_v40 = vpop.permute.xlu0 %481 }
 0x1de   : > { %1021 = vpow2.f32 %v292_v21  ;;  %v291_v23 = vsub.f32 %v282_v17, %v289_v22  ;;  %v487_v42 = vsel %vm231_vm1, %v482_v40, 0 }
 0x1e0   : > { %v294_v24 = vmul.f32 1.442695, %v291_v23 }
 0x1e1   : > { %v308_v25 = vpop.permute.xlu1 %307 }
 0x1e2   : > { %1023 = vpow2.f32 %v294_v24  ;;  %923 = vmatpush3.bf16.msra.mxu1 %v308_v25 }
 0x1e3   : > { %928 = vmatprep.subr.bf16.mxu1 %v1077_v0 }
 0x1eb   : > { %v1022_v26 = vpop.eup %1021 }
 0x1ec   : > { %v296_v27 = vsel %vm283_vm3, %v1022_v26, 0.0 }
 0x1ed   : > { %297 = vadd.xlane.f32.xlu1 %v296_v27 }
 0x1ef   : > { %v1024_v28 = vpop.eup %1023 }
 0x1f0   : > { %v299_v29 = vsel %vm283_vm3, %v1024_v28, 0.0 }
 0x1f1   : > { %300 = vadd.xlane.f32.xlu1 %v299_v29 }
 0x202   : > { %356 = vrot.lane.b32.xlu1 %v1138_v1, %s1082_s23 }
 0x206   : > { %354 = vrot.lane.b32.xlu1 %v1020_v4, %s1083_s24 }
 0x20a   : > { %479 = vrot.lane.b32.xlu1 %v1020_v4, %s1084_s25 }
 0x20e   : > { %606 = vrot.lane.b32.xlu1 %v1138_v1, %s1085_s26 }
 0x212   : > { %604 = vrot.lane.b32.xlu1 %v1020_v4, %s1086_s27 }
 0x276   : > { %v298_v30 = vpop.xlane.xlu1 %297 }
 0x277   : > { %1025 = vrcp.f32 %v298_v30 }
 0x27a   : > { %v301_v31 = vpop.xlane.xlu1 %300 }
 0x27b   : > { %1027 = vrcp.f32 %v301_v31 }
 0x27e   : > { %v357_v34 = vpop.permute.xlu1 %356 }
 0x27f   : > { %v362_v37 = vsel %vm231_vm1, %v357_v34, 0 }
 0x282   : > { %v355_v39 = vpop.permute.xlu1 %354 }
 0x284   : > { %v1026_v32 = vpop.eup %1025 }
 0x285   : > { %v304_v35 = vmul.f32 %v1026_v32, %v1022_v26 }
 0x286   : > { %v480_v41 = vpop.permute.xlu1 %479 }
 0x288   : > { %v1028_v33 = vpop.eup %1027 }
 0x289   : > { %v305_v36 = vmul.f32 %v1028_v33, %v1024_v28 }
 0x28a   : > { %v607_v43 = vpop.permute.xlu1 %606 }
 0x28b   : > { %v306_v38 = vpack.c.bf16 %v305_v36, %v304_v35  ;;  %v612_v44 = vsel %vm231_vm1, %v607_v43, 0 }
 0x28d   : > { %925 = vmatmul.mubr.msk.bf16.vlgmr.msra.gmra.mxu1 %vm283_vm3, %v306_v38 }
 0x28e   : > { %929 = vmatpush3.bf16.xpose.msra.mxu1 %v362_v37  ;;  %930 = vmatprep.mubr.msk.bf16.mxu1 %vm1078_vm0, %v1077_v0  ;;  %v605_v45 = vpop.permute.xlu1 %604 }
 0x28f   : > { %940 = vmatprep.subr.bf16.mxu1 %v1077_v0 }
 0x295   : > { %931 = vmatmul.mubr.msk.bf16.vlgmr.msra.gmra.mxu1 %vm231_vm1, %v355_v39 }
 0x296   : > { %941 = vmatpush3.bf16.xpose.msra.mxu1 %v487_v42  ;;  %942 = vmatprep.mubr.msk.bf16.mxu1 %vm1078_vm0, %v1077_v0 }
 0x297   : > { %952 = vmatprep.subr.bf16.mxu1 %v1077_v0 }
 0x29d   : > { %943 = vmatmul.mubr.msk.bf16.vlgmr.msra.gmra.mxu1 %vm231_vm1, %v480_v41 }
 0x29e   : > { %953 = vmatpush3.bf16.xpose.msra.mxu1 %v612_v44  ;;  %954 = vmatprep.mubr.msk.bf16.mxu1 %vm1078_vm0, %v1077_v0 }
 0x2a5   : > { %955 = vmatmul.mubr.msk.bf16.vlgmr.msra.gmra.mxu1 %vm231_vm1, %v605_v45 }
 0x34d   : > { %v1191_v46 = vpop.f32.mrf.mxu1 }
 0x34f   : > { %v926_v47 = vpop.f32.mrf.mxu1 }
 0x351   : > { %v1193_v48 = vpop.f32.mrf.mxu1 }
 0x353   : > { %v927_v49 = vpop.f32.mrf.mxu1 }
 0x355   : > { %v398_v50 = vpop.f32.mrf.mxu1 }
 0x356   : > { %v405_v51 = vmul.f32 0.35355338, %v398_v50 }
 0x357   : > { %v932_v52 = vpop.f32.mrf.mxu1 }
 0x358   : > { %v407_v53 = vsel %vm217_vm2, %v405_v51, -1e+30 }
 0x359   : > { %v401_v54 = vpop.f32.mrf.mxu1  ;;  %v409_v55 = vsel %vm283_vm3, %v407_v53, -inf }
 0x35a   : > { %v406_v56 = vmul.f32 0.35355338, %v401_v54  ;;  %410 = vmax.xlane.f32.xlu1 %v409_v55 }
 0x35b   : > { %v933_v57 = vpop.f32.mrf.mxu1 }
 0x35c   : > { %v408_v58 = vsel %vm218_vm4, %v406_v56, -1e+30 }
 0x35d   : > { %v523_v59 = vpop.f32.mrf.mxu1  ;;  %v412_v60 = vsel %vm283_vm3, %v408_v58, -inf }
 0x35e   : > { %v530_v61 = vmul.f32 0.35355338, %v523_v59  ;;  %413 = vmax.xlane.f32.xlu0 %v412_v60 }
 0x35f   : > { %v944_v62 = vpop.f32.mrf.mxu1 }
 0x360   : > { %v532_v63 = vsel %vm217_vm2, %v530_v61, -1e+30 }
 0x361   : > { %v526_v2 = vpop.f32.mrf.mxu1  ;;  %v534_v3 = vsel %vm283_vm3, %v532_v63, -inf }
 0x362   : > { %v531_v4 = vmul.f32 0.35355338, %v526_v2  ;;  %535 = vmax.xlane.f32.xlu1 %v534_v3 }
 0x363   : > { %v945_v5 = vpop.f32.mrf.mxu1 }
 0x364   : > { %v533_v8 = vsel %vm218_vm4, %v531_v4, -1e+30 }
 0x365   : > { %v648_v10 = vpop.f32.mrf.mxu1  ;;  %v537_v11 = vsel %vm283_vm3, %v533_v8, -inf }
 0x366   : > { %v655_v12 = vmul.f32 0.35355338, %v648_v10  ;;  %538 = vmax.xlane.f32.xlu0 %v537_v11 }
 0x367   : > { %v956_v13 = vpop.f32.mrf.mxu1 }
 0x368   : > { %v657_v14 = vsel %vm217_vm2, %v655_v12, -1e+30 }
 0x369   : > { %v651_v15 = vpop.f32.mrf.mxu1  ;;  %v659_v16 = vsel %vm283_vm3, %v657_v14, -inf }
 0x36a   : > { %v656_v17 = vmul.f32 0.35355338, %v651_v15  ;;  %660 = vmax.xlane.f32.xlu1 %v659_v16 }
 0x36b   : > { %v957_v18 = vpop.f32.mrf.mxu1 }
 0x36c   : > { %v658_v19 = vsel %vm218_vm4, %v656_v17, -1e+30 }
 0x36d   : > { %v662_v20 = vsel %vm283_vm3, %v658_v19, -inf }
 0x36e   : > { %663 = vmax.xlane.f32.xlu0 %v662_v20 }
 0x37b   : > { %432 = vrot.lane.b32.xlu1 %v1138_v1, %s1087_s28 }
 0x3e3   : > { %v411_v21 = vpop.xlane.xlu1 %410 }
 0x3e4   : > { %v415_v22 = vsub.f32 %v407_v53, %v411_v21 }
 0x3e6   : > { %v417_v6 = vmul.f32 1.442695, %v415_v22 }
 0x3e7   : > { %v414_v23 = vpop.xlane.xlu0 %413 }
 0x3e8   : > { %1029 = vpow2.f32 %v417_v6  ;;  %v416_v24 = vsub.f32 %v408_v58, %v414_v23 }
 0x3ea   : > { %v419_v25 = vmul.f32 1.442695, %v416_v24 }
 0x3eb   : > { %v536_v26 = vpop.xlane.xlu1 %535 }
 0x3ec   : > { %1031 = vpow2.f32 %v419_v25  ;;  %v540_v27 = vsub.f32 %v532_v63, %v536_v26 }
 0x3ee   : > { %v542_v28 = vmul.f32 1.442695, %v540_v27 }
 0x3ef   : > { %v539_v29 = vpop.xlane.xlu0 %538 }
 0x3f0   : > { %1033 = vpow2.f32 %v542_v28  ;;  %v541_v7 = vsub.f32 %v533_v8, %v539_v29 }
 0x3f2   : > { %v544_v9 = vmul.f32 1.442695, %v541_v7 }
 0x3f3   : > { %v661_v30 = vpop.xlane.xlu1 %660 }
 0x3f4   : > { %1035 = vpow2.f32 %v544_v9  ;;  %v665_v31 = vsub.f32 %v657_v14, %v661_v30 }
 0x3f5   : > { %v1030_v32 = vpop.eup %1029 }
 0x3f6   : > { %v667_v33 = vmul.f32 1.442695, %v665_v31  ;;  %v421_v34 = vsel %vm283_vm3, %v1030_v32, 0.0 }
 0x3f7   : > { %v664_v35 = vpop.xlane.xlu0 %663  ;;  %422 = vadd.xlane.f32.xlu1 %v421_v34  ;;  %v433_v36 = vpop.permute.xlu1 %432 }
 0x3f8   : > { %1037 = vpow2.f32 %v667_v33  ;;  %v666_v37 = vsub.f32 %v658_v19, %v664_v35  ;;  %935 = vmatpush3.bf16.msra.mxu0 %v433_v36 }
 0x3f9   : > { %v1032_v38 = vpop.eup %1031  ;;  %946 = vmatprep.subr.bf16.mxu0 %v1077_v0 }
 0x3fa   : > { %v669_v39 = vmul.f32 1.442695, %v666_v37  ;;  %v424_v40 = vsel %vm283_vm3, %v1032_v38, 0.0 }
 0x3fb   : > { %425 = vadd.xlane.f32.xlu0 %v424_v40 }
 0x3fc   : > { %1039 = vpow2.f32 %v669_v39 }
 0x3fd   : > { %v1034_v41 = vpop.eup %1033 }
 0x3fe   : > { %v546_v42 = vsel %vm283_vm3, %v1034_v41, 0.0 }
 0x3ff   : > { %547 = vadd.xlane.f32.xlu1 %v546_v42 }
 0x401   : > { %v1036_v43 = vpop.eup %1035 }
 0x402   : > { %v549_v44 = vsel %vm283_vm3, %v1036_v43, 0.0 }
 0x403   : > { %550 = vadd.xlane.f32.xlu0 %v549_v44 }
 0x405   : > { %v1038_v45 = vpop.eup %1037 }
 0x406   : > { %v671_v47 = vsel %vm283_vm3, %v1038_v45, 0.0 }
 0x407   : > { %672 = vadd.xlane.f32.xlu1 %v671_v47 }
 0x409   : > { %v1040_v49 = vpop.eup %1039 }
 0x40a   : > { %v674_v50 = vsel %vm283_vm3, %v1040_v49, 0.0 }
 0x40b   : > { %675 = vadd.xlane.f32.xlu0 %v674_v50 }
 0x418   : > { %682 = vrot.lane.b32.xlu1 %v1138_v1, %s1088_s29 }
 0x421   : > { %557 = vrot.lane.b32.xlu0 %v1138_v1, %s1089_s30 }
 0x480   : > { %v423_v51 = vpop.xlane.xlu1 %422 }
 0x481   : > { %1041 = vrcp.f32 %v423_v51 }
 0x484   : > { %v426_v52 = vpop.xlane.xlu0 %425 }
 0x485   : > { %1043 = vrcp.f32 %v426_v52 }
 0x488   : > { %v548_v53 = vpop.xlane.xlu1 %547 }
 0x489   : > { %1045 = vrcp.f32 %v548_v53 }
 0x48c   : > { %v551_v54 = vpop.xlane.xlu0 %550 }
 0x48d   : > { %1047 = vrcp.f32 %v551_v54 }
 0x48e   : > { %v1042_v55 = vpop.eup %1041 }
 0x48f   : > { %v429_v58 = vmul.f32 %v1042_v55, %v1030_v32 }
 0x490   : > { %v673_v56 = vpop.xlane.xlu1 %672 }
 0x491   : > { %1049 = vrcp.f32 %v673_v56 }
 0x492   : > { %v1044_v57 = vpop.eup %1043 }
 0x493   : > { %v430_v59 = vmul.f32 %v1044_v57, %v1032_v38 }
 0x494   : > { %v676_v60 = vpop.xlane.xlu0 %675  ;;  %v683_v5 = vpop.permute.xlu1 %682 }
 0x495   : > { %1051 = vrcp.f32 %v676_v60  ;;  %v431_v61 = vpack.c.bf16 %v430_v59, %v429_v58 }
 0x496   : > { %v1046_v1 = vpop.eup %1045 }
 0x497   : > { %937 = vmatmul.mubr.msk.bf16.vlgmr.msra.gmra.mxu0 %vm283_vm3, %v431_v61  ;;  %v554_v2 = vmul.f32 %v1046_v1, %v1034_v41 }
 0x498   : > { %v558_v62 = vpop.permute.xlu0 %557  ;;  %948 = vmatprep.mubr.msk.bf16.mxu0 %vm1078_vm0, %v1077_v0 }
 0x499   : > { %947 = vmatpush3.bf16.msra.mxu0 %v558_v62 }
 0x49a   : > { %v1048_v63 = vpop.eup %1047  ;;  %958 = vmatprep.subr.bf16.mxu0 %v1077_v0 }
 0x49b   : > { %v555_v3 = vmul.f32 %v1048_v63, %v1036_v43 }
 0x49d   : > { %v556_v4 = vpack.c.bf16 %v555_v3, %v554_v2 }
 0x49e   : > { %v1050_v8 = vpop.eup %1049 }
 0x49f   : > { %949 = vmatmul.mubr.msk.bf16.vlgmr.msra.gmra.mxu0 %vm283_vm3, %v556_v4  ;;  %v679_v11 = vmul.f32 %v1050_v8, %v1038_v45 }
 0x4a0   : > { %959 = vmatpush3.bf16.msra.mxu0 %v683_v5  ;;  %960 = vmatprep.mubr.msk.bf16.mxu0 %vm1078_vm0, %v1077_v0 }
 0x4a2   : > { %v1052_v10 = vpop.eup %1051 }
 0x4a3   : > { %v680_v12 = vmul.f32 %v1052_v10, %v1040_v49 }
 0x4a5   : > { %v681_v13 = vpack.c.bf16 %v680_v12, %v679_v11 }
 0x4a7   : > { %961 = vmatmul.mubr.msk.bf16.vlgmr.msra.gmra.mxu0 %vm283_vm3, %v681_v13 }
 0x557   : > { %v472_v14 = vpop.f32.mrf.mxu0 }
 0x559   : > { %v938_v15 = vpop.f32.mrf.mxu0 }
 0x55b   : > { %v475_v16 = vpop.f32.mrf.mxu0 }
 0x55c   : > { %v1004_v17 = vpack.i.bf16 %v475_v16, %v472_v14 }
 0x55d   : > { %v939_v18 = vpop.f32.mrf.mxu0 }
 0x55e   : > { %1005 = vrot.lane.b32.xlu1 %v1004_v17, %s1090_s3 }
 0x55f   : > { %v597_v19 = vpop.f32.mrf.mxu0 }
 0x561   : > { %v950_v20 = vpop.f32.mrf.mxu0 }
 0x563   : > { %v600_v21 = vpop.f32.mrf.mxu0 }
 0x564   : > { %v1009_v22 = vpack.i.bf16 %v600_v21, %v597_v19 }
 0x565   : > { %v951_v6 = vpop.f32.mrf.mxu0 }
 0x566   : > { %1010 = vrot.lane.b32.xlu0 %v1009_v22, %s1091_s4 }
 0x567   : > { %v722_v0 = vpop.f32.mrf.mxu0 }
 0x569   : > { %v962_v23 = vpop.f32.mrf.mxu0 }
 0x56b   : > { %v725_v24 = vpop.f32.mrf.mxu0 }
 0x56c   : > { %v1014_v25 = vpack.i.bf16 %v725_v24, %v722_v0 }
 0x56d   : > { %v963_v26 = vpop.f32.mrf.mxu0 }
 0x56e   : > { %1015 = vrot.lane.b32.xlu1 %v1014_v25, %s1092_s5 }
 0x5d0   : > { %v1006_v27 = vpop.permute.xlu1 %1005 }
 0x5d1   : > { %v1008_v29 = vunpack.i.h.bf16 %v1006_v27  ;;  %v1007_v7 = vunpack.i.l.bf16 %v1006_v27 }
 0x5d3   : > { %v754_v32 = vsel %vm231_vm1, %v1193_v48, %v1008_v29  ;;  %v753_v33 = vsel %vm231_vm1, %v1191_v46, %v1007_v7 }
 0x5d8   : > { %v1011_v28 = vpop.permute.xlu0 %1010 }
 0x5d9   : > { %v1013_v9 = vunpack.i.h.bf16 %v1011_v28  ;;  %v1012_v30 = vunpack.i.l.bf16 %v1011_v28 }
 0x5db   : > { %v756_v36 = vsel %vm283_vm3, %v754_v32, %v1013_v9  ;;  %v755_v37 = vsel %vm283_vm3, %v753_v33, %v1012_v30 }
 0x5e0   : > { %v1016_v31 = vpop.permute.xlu1 %1015 }
 0x5e1   : > { %v1018_v34 = vunpack.i.h.bf16 %v1016_v31  ;;  %v1017_v35 = vunpack.i.l.bf16 %v1016_v31 }
 0x5e3   : > { %v759_v38 = vsel %vm757_vm5, %v756_v36, %v1018_v34  ;;  %v758_v39 = vsel %vm757_vm5, %v755_v37, %v1017_v35 }
 0x5e4   : > { %v899_v40 = vpack.c.bf16 %v759_v38, %v759_v38  ;;  %v898_v41 = vpack.c.bf16 %v758_v39, %v758_v39 }
 0x5e6   : > { %770 = vst.msk [vmem:[%s201_s8 + $0x4] sm:$0xf] %vm768_vm6, %v899_v40  ;;  %769 = vst.msk [vmem:[%s201_s8] sm:$0xf] %vm768_vm6, %v898_v41 }
 0x5e7 PF: > { %s12_s11 = sadd.s32 1, %s1075_s11   ;;  %s1259_s9 = smov %s1071_s10 }
 0x5e8   : > { %p9_p5 = scmp.ge.s32.totalorder %s12_s11, 4   ;;  %s1260_s10 = smov %s1262_s12 }
 0x5ea   :  { %11 = sbr.rel (!%p9_p5) target bundleno = 2 (0x2), region = 61 }

// kernel: informer_forward.54
= control target key start
LH: loop header
LB: loop body
LE: loop exit
PB: predicated region body
PF: predicated region fallthrough
CT: control target
= control target key end

     0   :  { %s781_s15 = smov 0   ;;  %s848_s0 = inlined_call_operand.vmem [shape: f32[2,16,32], index: 0, kind: input, shape index: {}]   ;;  %s849_s1 = inlined_call_operand.vmem [shape: bf16[5,32,32], index: 1, kind: input, shape index: {}]   ;;  %s850_s2 = inlined_call_operand.vmem [shape: f32[1,32], index: 2, kind: input, shape index: {}]   ;;  %s851_s3 = inlined_call_operand.vmem [shape: f32[1,32], index: 3, kind: input, shape index: {}]   ;;  %s852_s4 = inlined_call_operand.vmem [shape: bf16[2,16,32], index: 4, kind: output, shape index: {}]  }
   0x1 LB: > { %s621_s16 = sadd.s32 4294967295, %s752_s15   ;;  %p625_p0 = scmp.ge.s32.totalorder %s752_s15, 1  ;;  %s752_s15 = sphi %s781_s15, %s14_s15  }
   0x2   : > { %p162_p1 = scmp.lt.s32.totalorder %s752_s15, 3 }
   0x4   : > { %p163_p2 = pnand %p625_p0, %p162_p1 }
   0x5   : > { %p188_p3 = scmp.lt.s32.totalorder (!%p163_p2), %s621_s16, 1 }
   0x6   : > { %166 = sbr.rel (%p163_p2) target bundleno = 248 (0xf8), region = 36 }
   0xb   : > { %v736_v0 = vld [vmem:[%s849_s1 + $0x18] sm:$0xff]   ;;  %v754_v1 = vmov 0.0   ;;  %v737_v2 = vld [vmem:[%s849_s1 + $0x8] sm:$0xff]   ;;  %v738_v3 = vld [vmem:[%s849_s1 + $0x10] sm:$0xff]   ;;  %vm755_vm0 = vmmov 0   ;;  %s854_s16 = smov (!%p188_p3, %s621_s16), 1 }
   0xc   : > { %686 = vmatprep.subr.bf16.mxu0 %v754_v1  ;;  %694 = vmatprep.subr.bf16.mxu1 %v754_v1  ;;  %v739_v4 = vld [vmem:[%s849_s1] sm:$0xff]   ;;  %s667_s25 = sshll.u32 %s854_s16, 4  ;;  %vm236_vm1 = vcmask 261120   ;;  %v741_v8 = vld [vmem:[%s849_s1 + $0x38] sm:$0xff]   ;;  %v743_v12 = vld [vmem:[%s849_s1 + $0x30] sm:$0xff]   ;;  %s668_s21 = sshll.u32 %s854_s16, 3 }
   0xd   : > { %687 = vmatpush3.bf16.msra.mxu0 %v736_v0  ;;  %690 = vmatprep.mubr.msk.bf16.mxu0 %vm755_vm0, %v754_v1  ;;  %s192_s28 = scalar_lea.vmem %s848_s0, %s667_s25  ;;  %vm216_vm2 = vsmask.f32 7424  ;;  %v740_v17 = vld [vmem:[%s849_s1 + $0x28] sm:$0xff]   ;;  %v742_v20 = vld [vmem:[%s849_s1 + $0x20] sm:$0xff]   ;;  %s197_s24 = scalar_lea.vmem %s852_s4, %s668_s21  ;;  %vm563_vm3 = vcmask 257024  }
   0xe   : > { %695 = vmatpush3.bf16.msra.mxu1 %v737_v2  ;;  %688 = vmatprep.subr.bf16.mxu0 %v754_v1  ;;  %v199_v5 = vld [vmem:[%s192_s28] sm:$0xff]  ;;  %v200_v6 = vld [vmem:[%s192_s28 + $0x8] sm:$0xff] }
   0xf   : > { %696 = vmatprep.subr.bf16.mxu1 %v754_v1  ;;  %698 = vmatprep.mubr.msk.bf16.mxu1 %vm755_vm0, %v754_v1  ;;  %v201_v7 = vpack.c.bf16 %v200_v6, %v199_v5  ;;  %v744_v22 = vld [vmem:[%s849_s1 + $0x48] sm:$0xff]   ;;  %v745_v23 = vld [vmem:[%s849_s1 + $0x40] sm:$0xff]  }
  0x10   : > { %v661_v47 = vld [vmem:[%s850_s2] ss:$0 sm:$0xff] }
  0x11   : > { %689 = vmatpush3.bf16.msra.mxu0 %v738_v3  ;;  %v203_v9 = vrot.slane %v201_v7, 7  ;;  %v662_v49 = vld [vmem:[%s851_s3] ss:$0 sm:$0xff] }
  0x12   : > { %697 = vmatpush3.bf16.msra.mxu1 %v739_v4  ;;  %702 = vmatprep.subr.bf16.mxu0 %v754_v1 }
  0x13   : > { %710 = vmatprep.subr.bf16.mxu1 %v754_v1  ;;  %v217_v10 = vshrl.u32 %v203_v9, 16  ;;  %v219_v11 = vshll.u32 %v203_v9, 16  ;;  %v343_v21 = vrot.slane %v203_v9, 1  ;;  %v477_v24 = vrot.slane %v203_v9, 2 }
  0x15   : > { %699 = vmatmul.mubr.msk.bf16.vlgmr.msra.gmra.mxu1 %vm236_vm1, %v203_v9  ;;  %v221_v13 = vrot.slane %v219_v11, 1  ;;  %v409_v14 = vrot.slane %v217_v10, 1  ;;  %v410_v15 = vrot.slane %v219_v11, 2 }
  0x16   : > { %711 = vmatpush3.bf16.msra.mxu1 %v741_v8  ;;  %714 = vmatprep.mubr.msk.bf16.mxu1 %vm755_vm0, %v754_v1 }
  0x17   : > { %712 = vmatprep.subr.bf16.mxu1 %v754_v1  ;;  %v222_v16 = vor.u32 %v221_v13, %v217_v10  ;;  %v411_v18 = vor.u32 %v410_v15, %v409_v14 }
  0x19   : > { %v223_v19 = vsel %vm216_vm2, %v222_v16, %v221_v13 }
  0x1a   : > { %713 = vmatpush3.bf16.msra.mxu1 %v743_v12  ;;  %691 = vmatmul.mubr.msk.bf16.vlgmr.msra.gmra.mxu0 %vm236_vm1, %v223_v19 }
  0x1b   : > { %703 = vmatpush3.bf16.msra.mxu0 %v740_v17  ;;  %706 = vmatprep.mubr.msk.bf16.mxu0 %vm755_vm0, %v754_v1 }
  0x1c   : > { %704 = vmatprep.subr.bf16.mxu0 %v754_v1 }
  0x1d   : > { %715 = vmatmul.mubr.msk.bf16.vlgmr.msra.gmra.mxu1 %vm236_vm1, %v411_v18 }
  0x1f   : > { %705 = vmatpush3.bf16.msra.mxu0 %v742_v20 }
  0x20   : > { %718 = vmatprep.subr.bf16.mxu0 %v754_v1 }
  0x22   : > { %707 = vmatmul.mubr.msk.bf16.vlgmr.msra.gmra.mxu0 %vm236_vm1, %v343_v21 }
  0x23   : > { %719 = vmatpush3.bf16.msra.mxu0 %v744_v22  ;;  %722 = vmatprep.mubr.msk.bf16.mxu0 %vm755_vm0, %v754_v1 }
  0x24   : > { %720 = vmatprep.subr.bf16.mxu0 %v754_v1 }
  0x27   : > { %721 = vmatpush3.bf16.msra.mxu0 %v745_v23 }
  0x2a   : > { %723 = vmatmul.mubr.msk.bf16.vlgmr.msra.gmra.mxu0 %vm236_vm1, %v477_v24 }
  0xd5   : > { %v329_v25 = vpop.f32.mrf.mxu1 }
  0xd7   : > { %v700_v26 = vpop.f32.mrf.mxu1 }
  0xd9   : > { %v332_v27 = vpop.f32.mrf.mxu1 }
  0xda   : > { %v274_v29 = vpop.f32.mrf.mxu0 }
  0xdb   : > { %v701_v28 = vpop.f32.mrf.mxu1  ;;  %v330_v38 = vadd.f32 %v329_v25, %v274_v29 }
  0xdc   : > { %v692_v30 = vpop.f32.mrf.mxu0 }
  0xdd   : > { %v462_v31 = vpop.f32.mrf.mxu1 }
  0xde   : > { %v277_v32 = vpop.f32.mrf.mxu0 }
  0xdf   : > { %v716_v33 = vpop.f32.mrf.mxu1  ;;  %v333_v42 = vadd.f32 %v332_v27, %v277_v32 }
  0xe0   : > { %v693_v34 = vpop.f32.mrf.mxu0 }
  0xe1   : > { %v465_v35 = vpop.f32.mrf.mxu1 }
  0xe2   : > { %v394_v36 = vpop.f32.mrf.mxu0 }
  0xe3   : > { %v717_v37 = vpop.f32.mrf.mxu1  ;;  %v401_v40 = vadd.f32 %v394_v36, %v330_v38 }
  0xe4   : > { %v708_v39 = vpop.f32.mrf.mxu0 }
  0xe5   : > { %v469_v44 = vadd.f32 %v462_v31, %v401_v40 }
  0xe6   : > { %v397_v41 = vpop.f32.mrf.mxu0 }
  0xe7   : > { %v402_v45 = vadd.f32 %v397_v41, %v333_v42 }
  0xe8   : > { %v709_v43 = vpop.f32.mrf.mxu0 }
  0xe9   : > { %v470_v51 = vadd.f32 %v465_v35, %v402_v45 }
  0xea   : > { %v528_v46 = vpop.f32.mrf.mxu0 }
  0xeb   : > { %v535_v48 = vadd.f32 %v528_v46, %v469_v44 }
  0xec   : > { %v724_v50 = vpop.f32.mrf.mxu0 }
  0xed   : > { %v544_v52 = vmul.f32 %v661_v47, %v535_v48 }
  0xee   : > { %v531_v53 = vpop.f32.mrf.mxu0 }
  0xef   : > { %v553_v54 = vadd.f32 %v662_v49, %v544_v52  ;;  %v536_v55 = vadd.f32 %v531_v53, %v470_v51 }
  0xf0   : > { %v725_v56 = vpop.f32.mrf.mxu0 }
  0xf1   : > { %v669_v57 = vpack.c.bf16 %v553_v54, %v553_v54  ;;  %v545_v58 = vmul.f32 %v661_v47, %v536_v55 }
  0xf3   : > { %564 = vst.msk [vmem:[%s197_s24] sm:$0xf] %vm563_vm3, %v669_v57  ;;  %v554_v59 = vadd.f32 %v662_v49, %v545_v58 }
  0xf5   : > { %v670_v60 = vpack.c.bf16 %v554_v59, %v554_v59 }
  0xf7   : > { %565 = vst.msk [vmem:[%s197_s24 + $0x4] sm:$0xf] %vm563_vm3, %v670_v60 }
  0xf8 PF: > { %s14_s15 = sadd.s32 1, %s752_s15  }
  0xf9   : > { %p11_p4 = scmp.ge.s32.totalorder %s14_s15, 4  }
  0xfb   :  { %13 = sbr.rel (!%p11_p4) target bundleno = 1 (0x1), region = 70 }

// kernel: informer_forward.56
= control target key start
LH: loop header
LB: loop body
LE: loop exit
PB: predicated region body
PF: predicated region fallthrough
CT: control target
= control target key end

     0   :  { %s1080_s9 = smov 0   ;;  %s1082_s10 = smov 0   ;;  %s1199_s0 = inlined_call_operand.vmem [shape: bf16[2,16,32], index: 0, kind: input, shape index: {}]   ;;  %s1200_s1 = inlined_call_operand.vmem [shape: bf16[2,8,64], index: 1, kind: input, shape index: {}]   ;;  %s1201_s2 = inlined_call_operand.vmem [shape: bf16[2,16,32], index: 2, kind: output, shape index: {}]  }
   0x1   :  { %s1084_s11 = smov 0  }
   0x2 LB: > { %s24_s12 = sadd.s32 1, %s1047_s10  ;;  %p856_p0 = scmp.ge.s32.totalorder %s1051_s11, 1  ;;  %s1051_s11 = sphi %s1084_s11, %s12_s11   ;;  %s1047_s10 = sphi %s1082_s10, %s1203_s10   ;;  %s1043_s9 = sphi %s1080_s9, %s1202_s9  }
   0x3   : > { %p26_p1 = scmp.ge.s32.totalorder %s24_s12, 2  ;;  %p142_p2 = scmp.lt.s32.totalorder %s1051_s11, 3 }
   0x5   : > { %s1205_s12 = smov (%p26_p1, %s24_s12), 0  ;;  %p143_p3 = pnand %p856_p0, %p142_p2 }
   0x6   : > { %p177_p4 = scmp.lt.s32.totalorder (!%p143_p3), %s1043_s9, 1  ;;  %s1055_s21 = smov (!%p143_p3), 120  }
   0x7   : > { %146 = sbr.rel (%p143_p3) target bundleno = 1394 (0x572), region = 28  ;;  %s1056_s22 = smov (!%p143_p3), 96  }
   0x8   : > { %s1057_s23 = smov (!%p143_p3), 112   ;;  %s1058_s24 = smov (!%p143_p3), 104  }
   0x9   : > { %s1059_s25 = smov (!%p143_p3), 88   ;;  %s1060_s26 = smov (!%p143_p3), 72  }
   0xa   : > { %s1061_s27 = smov (!%p143_p3), 80   ;;  %s1062_s28 = smov (!%p143_p3), 8  }
   0xb   : > { %s1063_s29 = smov (!%p143_p3), 16   ;;  %s1064_s30 = smov (!%p143_p3), 24  }
   0xc   : > { %v1053_v0 = vmov 0.0   ;;  %vm1054_vm0 = vmmov 0   ;;  %s1207_s9 = smov (!%p177_p4, %s1043_s9), 1  ;;  %vm209_vm1 = vcmask 64512   ;;  %vm290_vm2 = vcmask 1043456  }
   0xd   : > { %896 = vmatprep.subr.bf16.mxu0 %v1053_v0  ;;  %898 = vmatprep.mubr.msk.bf16.mxu0 %vm1054_vm0, %v1053_v0  ;;  %s876_s13 = sshll.u32 %s1207_s9, 3  ;;  %s859_s14 = sshll.u32 %s1207_s9, 2  ;;  %vm736_vm3 = vcmask 130048   ;;  %vm739_vm4 = vcmask 195584   ;;  %vm750_vm5 = vcmask 257024  }
   0xe   : > { %902 = vmatprep.subr.bf16.mxu1 %v1053_v0  ;;  %904 = vmatprep.mubr.msk.bf16.mxu1 %vm1054_vm0, %v1053_v0  ;;  %s184_s17 = scalar_lea.vmem %s1199_s0, %s876_s13  ;;  %s189_s20 = scalar_lea.vmem %s1200_s1, %s859_s14 }
   0xf   : > { %v203_v1 = vld [vmem:[%s189_s20] sm:$0xf]  ;;  %s198_s5 = scalar_lea.vmem %s1201_s2, %s876_s13 }
  0x10   : > { %v214_v2 = vsel %vm209_vm1, %v203_v1, 0  ;;  %v996_v3 = vld [vmem:[%s184_s17] sm:$0xff]   ;;  %v1121_v4 = vcombine.low %v203_v1, %v203_v1 }
  0x11   : > { %897 = vmatpush3.bf16.xpose.msra.mxu0 %v214_v2 }
  0x12   : > { %914 = vmatprep.subr.bf16.mxu0 %v1053_v0  ;;  %337 = vrot.lane.b32.xlu1 %v1121_v4, %s1055_s21 }
  0x18   : > { %899 = vmatmul.mubr.msk.bf16.vlgmr.msra.gmra.mxu0 %vm209_vm1, %v996_v3 }
  0x19   : > { %916 = vmatprep.mubr.msk.bf16.mxu0 %vm1054_vm0, %v1053_v0 }
  0x84   : > { %v338_v25 = vpop.permute.xlu1 %337 }
  0x85   : > { %v343_v34 = vsel %vm209_vm1, %v338_v25, 0 }
  0xd8   : > { %v250_v5 = vpop.f32.mrf.mxu0 }
  0xd9   : > { %v257_v6 = vmul.f32 0.35355338, %v250_v5 }
  0xda   : > { %v900_v7 = vpop.f32.mrf.mxu0 }
  0xdb   : > { %v259_v8 = vsel %vm209_vm1, %v257_v6, -inf }
  0xdc   : > { %260 = vmax.xlane.f32.xlu0 %v259_v8  ;;  %v253_v9 = vpop.f32.mrf.mxu0 }
  0xdd   : > { %v258_v10 = vmul.f32 0.35355338, %v253_v9 }
  0xde   : > { %v901_v11 = vpop.f32.mrf.mxu0 }
  0xdf   : > { %v262_v12 = vsel %vm209_vm1, %v258_v10, -inf }
  0xe0   : > { %263 = vmax.xlane.f32.xlu0 %v262_v12 }
  0xf6   : > { %285 = vrot.lane.b32.xlu0 %v1121_v4, %s1056_s22 }
  0xfa   : > { %460 = vrot.lane.b32.xlu0 %v996_v3, %s1057_s23 }
  0xfe   : > { %585 = vrot.lane.b32.xlu0 %v996_v3, %s1058_s24 }
 0x165   : > { %v261_v13 = vpop.xlane.xlu0 %260 }
 0x166   : > { %v265_v14 = vsub.f32 %v257_v6, %v261_v13 }
 0x168   : > { %v267_v15 = vmul.f32 1.442695, %v265_v14 }
 0x169   : > { %v264_v16 = vpop.xlane.xlu0 %263 }
 0x16a   : > { %997 = vpow2.f32 %v267_v15  ;;  %v266_v17 = vsub.f32 %v258_v10, %v264_v16 }
 0x16c   : > { %v269_v18 = vmul.f32 1.442695, %v266_v17 }
 0x16d   : > { %v286_v23 = vpop.permute.xlu0 %285 }
 0x16e   : > { %999 = vpow2.f32 %v269_v18  ;;  %v292_v24 = vsel %vm290_vm2, %v286_v23, 0 }
 0x16f   : > { %903 = vmatpush3.bf16.msra.mxu1 %v292_v24 }
 0x170   : > { %908 = vmatprep.subr.bf16.mxu1 %v1053_v0 }
 0x171   : > { %v461_v38 = vpop.permute.xlu0 %460 }
 0x175   : > { %v586_v40 = vpop.permute.xlu0 %585 }
 0x177   : > { %v998_v19 = vpop.eup %997 }
 0x178   : > { %v271_v20 = vsel %vm209_vm1, %v998_v19, 0.0 }
 0x179   : > { %272 = vadd.xlane.f32.xlu1 %v271_v20 }
 0x17b   : > { %v1000_v21 = vpop.eup %999 }
 0x17c   : > { %v274_v22 = vsel %vm209_vm1, %v1000_v21, 0.0 }
 0x17d   : > { %275 = vadd.xlane.f32.xlu1 %v274_v22 }
 0x18e   : > { %335 = vrot.lane.b32.xlu1 %v996_v3, %s1055_s21 }
 0x192   : > { %462 = vrot.lane.b32.xlu1 %v1121_v4, %s1057_s23 }
 0x196   : > { %587 = vrot.lane.b32.xlu1 %v1121_v4, %s1058_s24 }
 0x202   : > { %v273_v26 = vpop.xlane.xlu1 %272 }
 0x203   : > { %1001 = vrcp.f32 %v273_v26 }
 0x206   : > { %v276_v27 = vpop.xlane.xlu1 %275 }
 0x207   : > { %1003 = vrcp.f32 %v276_v27 }
 0x20a   : > { %v336_v32 = vpop.permute.xlu1 %335 }
 0x20e   : > { %v463_v35 = vpop.permute.xlu1 %462 }
 0x20f   : > { %v468_v36 = vsel %vm209_vm1, %v463_v35, 0 }
 0x210   : > { %v1002_v28 = vpop.eup %1001 }
 0x211   : > { %v279_v30 = vmul.f32 %v1002_v28, %v998_v19 }
 0x212   : > { %v588_v37 = vpop.permute.xlu1 %587 }
 0x213   : > { %v593_v39 = vsel %vm209_vm1, %v588_v37, 0 }
 0x214   : > { %v1004_v29 = vpop.eup %1003 }
 0x215   : > { %v280_v31 = vmul.f32 %v1004_v29, %v1000_v21 }
 0x217   : > { %v281_v33 = vpack.c.bf16 %v280_v31, %v279_v30 }
 0x219   : > { %905 = vmatmul.mubr.msk.bf16.vlgmr.msra.gmra.mxu1 %vm209_vm1, %v281_v33 }
 0x21a   : > { %909 = vmatpush3.bf16.xpose.msra.mxu1 %v343_v34  ;;  %910 = vmatprep.mubr.msk.bf16.mxu1 %vm1054_vm0, %v1053_v0 }
 0x21b   : > { %920 = vmatprep.subr.bf16.mxu1 %v1053_v0 }
 0x221   : > { %911 = vmatmul.mubr.msk.bf16.vlgmr.msra.gmra.mxu1 %vm209_vm1, %v336_v32 }
 0x222   : > { %921 = vmatpush3.bf16.xpose.msra.mxu1 %v468_v36  ;;  %922 = vmatprep.mubr.msk.bf16.mxu1 %vm1054_vm0, %v1053_v0 }
 0x223   : > { %932 = vmatprep.subr.bf16.mxu1 %v1053_v0 }
 0x229   : > { %923 = vmatmul.mubr.msk.bf16.vlgmr.msra.gmra.mxu1 %vm209_vm1, %v461_v38 }
 0x22a   : > { %933 = vmatpush3.bf16.xpose.msra.mxu1 %v593_v39  ;;  %934 = vmatprep.mubr.msk.bf16.mxu1 %vm1054_vm0, %v1053_v0 }
 0x231   : > { %935 = vmatmul.mubr.msk.bf16.vlgmr.msra.gmra.mxu1 %vm209_vm1, %v586_v40 }
 0x2d9   : > { %v1150_v41 = vpop.f32.mrf.mxu1 }
 0x2db   : > { %v906_v42 = vpop.f32.mrf.mxu1 }
 0x2dd   : > { %v1152_v43 = vpop.f32.mrf.mxu1 }
 0x2df   : > { %v907_v44 = vpop.f32.mrf.mxu1 }
 0x2e1   : > { %v379_v45 = vpop.f32.mrf.mxu1 }
 0x2e2   : > { %v386_v46 = vmul.f32 0.35355338, %v379_v45 }
 0x2e3   : > { %v912_v47 = vpop.f32.mrf.mxu1 }
 0x2e4   : > { %v388_v48 = vsel %vm209_vm1, %v386_v46, -inf }
 0x2e5   : > { %389 = vmax.xlane.f32.xlu1 %v388_v48  ;;  %v382_v49 = vpop.f32.mrf.mxu1 }
 0x2e6   : > { %v387_v50 = vmul.f32 0.35355338, %v382_v49 }
 0x2e7   : > { %v913_v51 = vpop.f32.mrf.mxu1 }
 0x2e8   : > { %v391_v52 = vsel %vm209_vm1, %v387_v50, -inf }
 0x2e9   : > { %392 = vmax.xlane.f32.xlu0 %v391_v52  ;;  %v504_v53 = vpop.f32.mrf.mxu1 }
 0x2ea   : > { %v511_v54 = vmul.f32 0.35355338, %v504_v53 }
 0x2eb   : > { %v924_v55 = vpop.f32.mrf.mxu1 }
 0x2ec   : > { %v513_v56 = vsel %vm209_vm1, %v511_v54, -inf }
 0x2ed   : > { %514 = vmax.xlane.f32.xlu0 %v513_v56  ;;  %v507_v57 = vpop.f32.mrf.mxu1 }
 0x2ee   : > { %v512_v58 = vmul.f32 0.35355338, %v507_v57 }
 0x2ef   : > { %v925_v59 = vpop.f32.mrf.mxu1 }
 0x2f0   : > { %v516_v60 = vsel %vm209_vm1, %v512_v58, -inf }
 0x2f1   : > { %517 = vmax.xlane.f32.xlu0 %v516_v60  ;;  %v629_v61 = vpop.f32.mrf.mxu1 }
 0x2f2   : > { %v636_v62 = vmul.f32 0.35355338, %v629_v61 }
 0x2f3   : > { %v936_v63 = vpop.f32.mrf.mxu1 }
 0x2f4   : > { %v638_v1 = vsel %vm209_vm1, %v636_v62, -inf }
 0x2f5   : > { %639 = vmax.xlane.f32.xlu1 %v638_v1  ;;  %v632_v2 = vpop.f32.mrf.mxu1 }
 0x2f6   : > { %v637_v3 = vmul.f32 0.35355338, %v632_v2 }
 0x2f7   : > { %v937_v5 = vpop.f32.mrf.mxu1 }
 0x2f8   : > { %v641_v6 = vsel %vm209_vm1, %v637_v3, -inf }
 0x2f9   : > { %642 = vmax.xlane.f32.xlu0 %v641_v6 }
 0x306   : > { %411 = vrot.lane.b32.xlu1 %v1121_v4, %s1059_s25 }
 0x36e   : > { %v390_v7 = vpop.xlane.xlu1 %389 }
 0x36f   : > { %v394_v8 = vsub.f32 %v386_v46, %v390_v7 }
 0x371   : > { %v396_v9 = vmul.f32 1.442695, %v394_v8 }
 0x372   : > { %v393_v10 = vpop.xlane.xlu0 %392 }
 0x373   : > { %1005 = vpow2.f32 %v396_v9  ;;  %v395_v11 = vsub.f32 %v387_v50, %v393_v10 }
 0x375   : > { %v398_v12 = vmul.f32 1.442695, %v395_v11 }
 0x376   : > { %v515_v13 = vpop.xlane.xlu0 %514 }
 0x377   : > { %1007 = vpow2.f32 %v398_v12  ;;  %v519_v14 = vsub.f32 %v511_v54, %v515_v13 }
 0x379   : > { %v521_v15 = vmul.f32 1.442695, %v519_v14 }
 0x37a   : > { %v518_v16 = vpop.xlane.xlu0 %517 }
 0x37b   : > { %1009 = vpow2.f32 %v521_v15  ;;  %v520_v17 = vsub.f32 %v512_v58, %v518_v16 }
 0x37d   : > { %v523_v18 = vmul.f32 1.442695, %v520_v17 }
 0x37e   : > { %v640_v19 = vpop.xlane.xlu1 %639 }
 0x37f   : > { %1011 = vpow2.f32 %v523_v18  ;;  %v644_v20 = vsub.f32 %v636_v62, %v640_v19 }
 0x380   : > { %v1006_v21 = vpop.eup %1005 }
 0x381   : > { %v646_v22 = vmul.f32 1.442695, %v644_v20  ;;  %v400_v23 = vsel %vm209_vm1, %v1006_v21, 0.0 }
 0x382   : > { %401 = vadd.xlane.f32.xlu1 %v400_v23  ;;  %v643_v24 = vpop.xlane.xlu0 %642  ;;  %v412_v25 = vpop.permute.xlu1 %411 }
 0x383   : > { %1013 = vpow2.f32 %v646_v22  ;;  %v645_v26 = vsub.f32 %v637_v3, %v643_v24  ;;  %v417_v27 = vsel %vm290_vm2, %v412_v25, 0 }
 0x384   : > { %v1008_v28 = vpop.eup %1007  ;;  %915 = vmatpush3.bf16.msra.mxu0 %v417_v27 }
 0x385   : > { %v648_v29 = vmul.f32 1.442695, %v645_v26  ;;  %v403_v30 = vsel %vm209_vm1, %v1008_v28, 0.0  ;;  %926 = vmatprep.subr.bf16.mxu0 %v1053_v0 }
 0x386   : > { %404 = vadd.xlane.f32.xlu0 %v403_v30 }
 0x387   : > { %1015 = vpow2.f32 %v648_v29 }
 0x388   : > { %v1010_v31 = vpop.eup %1009 }
 0x389   : > { %v525_v32 = vsel %vm209_vm1, %v1010_v31, 0.0 }
 0x38a   : > { %526 = vadd.xlane.f32.xlu1 %v525_v32 }
 0x38c   : > { %v1012_v33 = vpop.eup %1011 }
 0x38d   : > { %v528_v34 = vsel %vm209_vm1, %v1012_v33, 0.0 }
 0x38e   : > { %529 = vadd.xlane.f32.xlu0 %v528_v34 }
 0x390   : > { %v1014_v35 = vpop.eup %1013 }
 0x391   : > { %v650_v36 = vsel %vm209_vm1, %v1014_v35, 0.0 }
 0x392   : > { %651 = vadd.xlane.f32.xlu1 %v650_v36 }
 0x394   : > { %v1016_v37 = vpop.eup %1015 }
 0x395   : > { %v653_v38 = vsel %vm209_vm1, %v1016_v37, 0.0 }
 0x396   : > { %654 = vadd.xlane.f32.xlu0 %v653_v38 }
 0x3a3   : > { %661 = vrot.lane.b32.xlu1 %v1121_v4, %s1060_s26 }
 0x3ac   : > { %536 = vrot.lane.b32.xlu0 %v1121_v4, %s1061_s27 }
 0x40b   : > { %v402_v39 = vpop.xlane.xlu1 %401 }
 0x40c   : > { %1017 = vrcp.f32 %v402_v39 }
 0x40f   : > { %v405_v40 = vpop.xlane.xlu0 %404 }
 0x410   : > { %1019 = vrcp.f32 %v405_v40 }
 0x413   : > { %v527_v42 = vpop.xlane.xlu1 %526 }
 0x414   : > { %1021 = vrcp.f32 %v527_v42 }
 0x417   : > { %v530_v44 = vpop.xlane.xlu0 %529 }
 0x418   : > { %1023 = vrcp.f32 %v530_v44 }
 0x419   : > { %v1018_v45 = vpop.eup %1017 }
 0x41a   : > { %v408_v48 = vmul.f32 %v1018_v45, %v1006_v21 }
 0x41b   : > { %v652_v46 = vpop.xlane.xlu1 %651 }
 0x41c   : > { %1025 = vrcp.f32 %v652_v46 }
 0x41d   : > { %v1020_v47 = vpop.eup %1019 }
 0x41e   : > { %v409_v49 = vmul.f32 %v1020_v47, %v1008_v28 }
 0x41f   : > { %v655_v50 = vpop.xlane.xlu0 %654  ;;  %v662_v55 = vpop.permute.xlu1 %661 }
 0x420   : > { %1027 = vrcp.f32 %v655_v50  ;;  %v410_v51 = vpack.c.bf16 %v409_v49, %v408_v48  ;;  %v667_v59 = vsel %vm290_vm2, %v662_v55, 0 }
 0x421   : > { %v1022_v4 = vpop.eup %1021 }
 0x422   : > { %917 = vmatmul.mubr.msk.bf16.vlgmr.msra.gmra.mxu0 %vm209_vm1, %v410_v51  ;;  %v533_v56 = vmul.f32 %v1022_v4, %v1010_v31 }
 0x423   : > { %v537_v52 = vpop.permute.xlu0 %536  ;;  %928 = vmatprep.mubr.msk.bf16.mxu0 %vm1054_vm0, %v1053_v0 }
 0x424   : > { %v542_v53 = vsel %vm290_vm2, %v537_v52, 0 }
 0x425   : > { %v1024_v54 = vpop.eup %1023  ;;  %927 = vmatpush3.bf16.msra.mxu0 %v542_v53 }
 0x426   : > { %v534_v57 = vmul.f32 %v1024_v54, %v1012_v33  ;;  %938 = vmatprep.subr.bf16.mxu0 %v1053_v0 }
 0x428   : > { %v535_v58 = vpack.c.bf16 %v534_v57, %v533_v56 }
 0x429   : > { %v1026_v60 = vpop.eup %1025 }
 0x42a   : > { %929 = vmatmul.mubr.msk.bf16.vlgmr.msra.gmra.mxu0 %vm209_vm1, %v535_v58  ;;  %v658_v62 = vmul.f32 %v1026_v60, %v1014_v35 }
 0x42b   : > { %939 = vmatpush3.bf16.msra.mxu0 %v667_v59  ;;  %940 = vmatprep.mubr.msk.bf16.mxu0 %vm1054_vm0, %v1053_v0 }
 0x42d   : > { %v1028_v61 = vpop.eup %1027 }
 0x42e   : > { %v659_v63 = vmul.f32 %v1028_v61, %v1016_v37 }
 0x430   : > { %v660_v1 = vpack.c.bf16 %v659_v63, %v658_v62 }
 0x432   : > { %941 = vmatmul.mubr.msk.bf16.vlgmr.msra.gmra.mxu0 %vm209_vm1, %v660_v1 }
 0x4e2   : > { %v453_v2 = vpop.f32.mrf.mxu0 }
 0x4e4   : > { %v918_v3 = vpop.f32.mrf.mxu0 }
 0x4e6   : > { %v456_v5 = vpop.f32.mrf.mxu0 }
 0x4e7   : > { %v980_v6 = vpack.i.bf16 %v456_v5, %v453_v2 }
 0x4e8   : > { %v919_v7 = vpop.f32.mrf.mxu0 }
 0x4e9   : > { %981 = vrot.lane.b32.xlu1 %v980_v6, %s1062_s28 }
 0x4ea   : > { %v578_v8 = vpop.f32.mrf.mxu0 }
 0x4ec   : > { %v930_v9 = vpop.f32.mrf.mxu0 }
 0x4ee   : > { %v581_v10 = vpop.f32.mrf.mxu0 }
 0x4ef   : > { %v985_v11 = vpack.i.bf16 %v581_v10, %v578_v8 }
 0x4f0   : > { %v931_v12 = vpop.f32.mrf.mxu0 }
 0x4f1   : > { %986 = vrot.lane.b32.xlu1 %v985_v11, %s1063_s29 }
 0x4f2   : > { %v703_v0 = vpop.f32.mrf.mxu0 }
 0x4f4   : > { %v942_v13 = vpop.f32.mrf.mxu0 }
 0x4f6   : > { %v706_v14 = vpop.f32.mrf.mxu0 }
 0x4f7   : > { %v990_v15 = vpack.i.bf16 %v706_v14, %v703_v0 }
 0x4f8   : > { %v943_v16 = vpop.f32.mrf.mxu0 }
 0x4f9   : > { %991 = vrot.lane.b32.xlu0 %v990_v15, %s1064_s30 }
 0x55b   : > { %v982_v17 = vpop.permute.xlu1 %981 }
 0x55c   : > { %v984_v19 = vunpack.i.h.bf16 %v982_v17  ;;  %v983_v20 = vunpack.i.l.bf16 %v982_v17 }
 0x55e   : > { %v735_v24 = vsel %vm209_vm1, %v1152_v43, %v984_v19  ;;  %v734_v25 = vsel %vm209_vm1, %v1150_v41, %v983_v20 }
 0x563   : > { %v987_v18 = vpop.permute.xlu1 %986 }
 0x564   : > { %v989_v21 = vunpack.i.h.bf16 %v987_v18  ;;  %v988_v22 = vunpack.i.l.bf16 %v987_v18 }
 0x566   : > { %v738_v28 = vsel %vm736_vm3, %v735_v24, %v989_v21  ;;  %v737_v29 = vsel %vm736_vm3, %v734_v25, %v988_v22 }
 0x56b   : > { %v992_v23 = vpop.permute.xlu0 %991 }
 0x56c   : > { %v994_v26 = vunpack.i.h.bf16 %v992_v23  ;;  %v993_v27 = vunpack.i.l.bf16 %v992_v23 }
 0x56e   : > { %v741_v30 = vsel %vm739_vm4, %v738_v28, %v994_v26  ;;  %v740_v31 = vsel %vm739_vm4, %v737_v29, %v993_v27 }
 0x56f   : > { %v879_v32 = vpack.c.bf16 %v741_v30, %v741_v30  ;;  %v878_v33 = vpack.c.bf16 %v740_v31, %v740_v31 }
 0x571   : > { %752 = vst.msk [vmem:[%s198_s5 + $0x4] sm:$0xf] %vm750_vm5, %v879_v32  ;;  %751 = vst.msk [vmem:[%s198_s5] sm:$0xf] %vm750_vm5, %v878_v33 }
 0x572 PF: > { %s12_s11 = sadd.s32 1, %s1051_s11   ;;  %s1202_s9 = smov %s1047_s10 }
 0x573   : > { %p9_p5 = scmp.ge.s32.totalorder %s12_s11, 4   ;;  %s1203_s10 = smov %s1205_s12 }
 0x575   :  { %11 = sbr.rel (!%p9_p5) target bundleno = 2 (0x2), region = 61 }

// kernel: informer_forward.62
= control target key start
LH: loop header
LB: loop body
LE: loop exit
PB: predicated region body
PF: predicated region fallthrough
CT: control target
= control target key end

     0   :  { %vm18_vm0 = vcmask 261120   ;;  %s174_s0 = inlined_call_operand.vmem [shape: f32[32,32], index: 0, kind: input, shape index: {}]   ;;  %s175_s1 = inlined_call_operand.vmem [shape: f32[1,32], index: 1, kind: input, shape index: {}]   ;;  %s176_s2 = inlined_call_operand.vmem [shape: f32[1,32], index: 2, kind: input, shape index: {}]   ;;  %s177_s3 = inlined_call_operand.vmem [shape: f32[32,32], index: 3, kind: output, shape index: {}]  }
   0x1   :  { %v14_v0 = vld [vmem:[%s174_s0] sm:$0xff]  ;;  %v16_v1 = vld [vmem:[%s174_s0 + $0x10] sm:$0xff]  ;;  %v15_v2 = vld [vmem:[%s174_s0 + $0x8] sm:$0xff] }
   0x2   :  { %v19_v3 = vsel %vm18_vm0, %v14_v0, 0.0  ;;  %v25_v4 = vsel %vm18_vm0, %v16_v1, 0.0  ;;  %v17_v5 = vld [vmem:[%s174_s0 + $0x18] sm:$0xff]  ;;  %v22_v6 = vsel %vm18_vm0, %v15_v2, 0.0  ;;  %v102_v41 = vld [vmem:[%s175_s1] ss:$0 sm:$0xff] }
   0x3   :  { %20 = vadd.xlane.f32.xlu0 %v19_v3  ;;  %26 = vadd.xlane.f32.xlu1 %v25_v4  ;;  %v28_v7 = vsel %vm18_vm0, %v17_v5, 0.0  ;;  %v103_v43 = vld [vmem:[%s176_s2] ss:$0 sm:$0xff] }
   0x7   :  { %23 = vadd.xlane.f32.xlu0 %v22_v6  ;;  %29 = vadd.xlane.f32.xlu1 %v28_v7 }
  0x8c   :  { %v21_v8 = vpop.xlane.xlu0 %20  ;;  %v27_v9 = vpop.xlane.xlu1 %26 }
  0x8d   :  { %v32_v10 = vmul.f32 0.03125, %v21_v8  ;;  %v34_v11 = vmul.f32 0.03125, %v27_v9 }
  0x8f   :  { %v36_v12 = vsub.f32 %v14_v0, %v32_v10  ;;  %v38_v13 = vsub.f32 %v16_v1, %v34_v11 }
  0x90   :  { %v24_v14 = vpop.xlane.xlu0 %23  ;;  %v30_v15 = vpop.xlane.xlu1 %29 }
  0x91   :  { %v33_v16 = vmul.f32 0.03125, %v24_v14  ;;  %v35_v17 = vmul.f32 0.03125, %v30_v15  ;;  %v40_v18 = vmul.f32 %v36_v12, %v36_v12  ;;  %v42_v19 = vmul.f32 %v38_v13, %v38_v13 }
  0x93   :  { %v37_v20 = vsub.f32 %v15_v2, %v33_v16  ;;  %v39_v21 = vsub.f32 %v17_v5, %v35_v17  ;;  %v44_v22 = vsel %vm18_vm0, %v40_v18, 0.0  ;;  %v50_v23 = vsel %vm18_vm0, %v42_v19, 0.0 }
  0x94   :  { %45 = vadd.xlane.f32.xlu0 %v44_v22 }
  0x95   :  { %v41_v24 = vmul.f32 %v37_v20, %v37_v20  ;;  %v43_v25 = vmul.f32 %v39_v21, %v39_v21 }
  0x97   :  { %v47_v26 = vsel %vm18_vm0, %v41_v24, 0.0  ;;  %v53_v27 = vsel %vm18_vm0, %v43_v25, 0.0 }
  0x98   :  { %51 = vadd.xlane.f32.xlu0 %v50_v23  ;;  %48 = vadd.xlane.f32.xlu1 %v47_v26 }
  0x9c   :  { %54 = vadd.xlane.f32.xlu1 %v53_v27 }
 0x11d   :  { %v46_v28 = vpop.xlane.xlu0 %45 }
 0x11e   :  { %v56_v29 = vmul.f32 0.03125, %v46_v28 }
 0x120   :  { %v60_v30 = vadd.f32 1e-05, %v56_v29 }
 0x121   :  { %v49_v31 = vpop.xlane.xlu1 %48  ;;  %v52_v32 = vpop.xlane.xlu0 %51 }
 0x122   :  { %104 = vrsqrt.f32 %v60_v30  ;;  %v57_v33 = vmul.f32 0.03125, %v49_v31  ;;  %v58_v34 = vmul.f32 0.03125, %v52_v32 }
 0x124   :  { %v61_v35 = vadd.f32 1e-05, %v57_v33  ;;  %v62_v36 = vadd.f32 1e-05, %v58_v34 }
 0x125   :  { %v55_v37 = vpop.xlane.xlu1 %54 }
 0x126   :  { %106 = vrsqrt.f32 %v61_v35  ;;  %v59_v38 = vmul.f32 0.03125, %v55_v37 }
 0x127   :  { %108 = vrsqrt.f32 %v62_v36 }
 0x128   :  { %v63_v39 = vadd.f32 1e-05, %v59_v38 }
 0x12a   :  { %110 = vrsqrt.f32 %v63_v39 }
 0x12f   :  { %v105_v40 = vpop.eup %104 }
 0x130   :  { %v68_v42 = vmul.f32 %v105_v40, %v36_v12 }
 0x132   :  { %v79_v44 = vmul.f32 %v102_v41, %v68_v42 }
 0x133   :  { %v107_v45 = vpop.eup %106 }
 0x134   :  { %v109_v46 = vpop.eup %108  ;;  %v90_v47 = vadd.f32 %v103_v43, %v79_v44  ;;  %v69_v48 = vmul.f32 %v107_v45, %v37_v20 }
 0x135   :  { %v70_v49 = vmul.f32 %v109_v46, %v38_v13 }
 0x136   :  { %94 = vst.msk [vmem:[%s177_s3] sm:$0xff] %vm18_vm0, %v90_v47  ;;  %v80_v50 = vmul.f32 %v102_v41, %v69_v48 }
 0x137   :  { %v111_v51 = vpop.eup %110  ;;  %v81_v52 = vmul.f32 %v102_v41, %v70_v49 }
 0x138   :  { %v91_v53 = vadd.f32 %v103_v43, %v80_v50  ;;  %v71_v54 = vmul.f32 %v111_v51, %v39_v21 }
 0x139   :  { %v92_v55 = vadd.f32 %v103_v43, %v81_v52 }
 0x13a   :  { %95 = vst.msk [vmem:[%s177_s3 + $0x8] sm:$0xff] %vm18_vm0, %v91_v53  ;;  %v82_v56 = vmul.f32 %v102_v41, %v71_v54 }
 0x13b   :  { %96 = vst.msk [vmem:[%s177_s3 + $0x10] sm:$0xff] %vm18_vm0, %v92_v55 }
 0x13c   :  { %v93_v57 = vadd.f32 %v103_v43, %v82_v56 }
 0x13e   :  { %97 = vst.msk [vmem:[%s177_s3 + $0x18] sm:$0xff] %vm18_vm0, %v93_v57 }

// kernel: informer_forward.63
= control target key start
LH: loop header
LB: loop body
LE: loop exit
PB: predicated region body
PF: predicated region fallthrough
CT: control target
= control target key end

     0   :  { %vm44_vm0 = vcmask 261120   ;;  %vm100_vm1 = vcmask 31744   ;;  %s181_s1 = inlined_call_operand.vmem [shape: bf16[32,4], index: 1, kind: input, shape index: {}]   ;;  %s182_s0 = inlined_call_operand.vmem [shape: f32[32,32], index: 0, kind: input, shape index: {}]   ;;  %s183_s2 = inlined_call_operand.vmem [shape: f32[1,4], index: 2, kind: input, shape index: {}]   ;;  %s184_s3 = inlined_call_operand.vmem [shape: f32[32,4], index: 3, kind: output, shape index: {}]  }
   0x1   :  { %v126_v0 = vld [vmem:[%s181_s1 + $0x8] sm:$0xff]   ;;  %v127_v1 = vld [vmem:[%s181_s1] sm:$0xff]   ;;  %v17_v5 = vld [vmem:[%s182_s0 + $0x10] sm:$0xff] }
   0x2   :  { %118 = vmatprep.subr.bf16.mxu0 %v126_v0  ;;  %v15_v2 = vld [vmem:[%s182_s0] sm:$0xff]  ;;  %v16_v3 = vld [vmem:[%s182_s0 + $0x8] sm:$0xff]  ;;  %v18_v6 = vld [vmem:[%s182_s0 + $0x18] sm:$0xff] }
   0x3   :  { %119 = vmatpush3.bf16.msra.mxu0 %v126_v0  ;;  %v19_v4 = vpack.c.bf16 %v16_v3, %v15_v2  ;;  %v20_v7 = vpack.c.bf16 %v18_v6, %v17_v5  ;;  %v109_v8 = vld [vmem:[%s183_s2] ss:$0 sm:$0xff] }
   0x4   :  { %120 = vmatprep.subr.bf16.mxu0 %v127_v1 }
   0x5   :  { %122 = vmatprep.mubr.msk.bf16.mxu0 %vm44_vm0, %v19_v4 }
   0x7   :  { %121 = vmatpush3.bf16.msra.mxu0 %v127_v1 }
   0xa   :  { %123 = vmatmul.mubr.msk.bf16.vlgmr.msra.gmra.mxu0 %vm44_vm0, %v20_v7 }
  0xca   :  { %v124_v9 = vpop.f32.mrf.mxu0 }
  0xcb   :  { %v94_v10 = vadd.f32 %v124_v9, %v109_v8 }
  0xcc   :  { %v85_v11 = vpop.f32.mrf.mxu0 }
  0xcd   :  { %103 = vst.msk [vmem:[%s184_s3 + $0x10] sm:$0xff] %vm100_vm1, %v94_v10  ;;  %v86_v12 = vadd.f32 %v109_v8, %v85_v11 }
  0xce   :  { %v125_v13 = vpop.f32.mrf.mxu0 }
  0xcf   :  { %101 = vst.msk [vmem:[%s184_s3] sm:$0xff] %vm100_vm1, %v86_v12  ;;  %v97_v14 = vadd.f32 %v125_v13, %v109_v8 }
  0xd0   :  { %v88_v15 = vpop.f32.mrf.mxu0 }
  0xd1   :  { %104 = vst.msk [vmem:[%s184_s3 + $0x18] sm:$0xff] %vm100_vm1, %v97_v14  ;;  %v89_v16 = vadd.f32 %v109_v8, %v88_v15 }
  0xd3   :  { %102 = vst.msk [vmem:[%s184_s3 + $0x8] sm:$0xff] %vm100_vm1, %v89_v16 }

</bundles_post_ra>
